<compile_context>
chip_gen: v5e
topology: v5e:2x2
jax: 0.10.0
libtpu: 0.0.40
codegen_flags: <defaults>
</compile_context>

<pallas_src>
import functools
import math

import jax
import jax.numpy as jnp
from jax.experimental import pallas as pl
from jax.experimental.pallas import tpu as pltpu

NEG = -1e30   # finite additive mask value (avoids inf-inf NaNs)


def _vmem_limit_bytes():
    """Generation-dependent scoped-VMEM budget: ~96 MiB on v5e/v6e (128 MiB VMEM),
    ~48 MiB on v7x (64 MiB VMEM)."""
    try:
        cap = int(pltpu.get_tpu_info().vmem_capacity_bytes)
    except Exception:
        cap = 64 * 1024 * 1024
    return min(cap * 3 // 4, 96 * 1024 * 1024)


VMEM_LIMIT = _vmem_limit_bytes()


def _round_up8(n):
    return ((n + 7) // 8) * 8


def _row_tile(M, tm):
    """Row tile: multiple of 8, capped so the row grid has >= 2 'parallel' steps
    (lets the v7x megacore shard the row axis even for small M)."""
    if M <= 8:
        return M
    return min(tm, _round_up8(-(-M // 2)))


# ----------------------------------------------------------------------------- kernels

def _erf(x):
    """Abramowitz & Stegun 7.1.26 rational erf (|err| < 1.5e-7) — only exp/mul/add,
    so the exact-GELU fusion uses ops Mosaic definitely lowers."""
    p = 0.3275911
    a1, a2, a3, a4, a5 = 0.254829592, -0.284496736, 1.421413741, -1.453152027, 1.061405429
    sgn = jnp.where(x >= 0.0, 1.0, -1.0)
    ax = jnp.abs(x)
    t = 1.0 / (1.0 + p * ax)
    poly = ((((a5 * t + a4) * t + a3) * t + a2) * t + a1) * t
    return sgn * (1.0 - poly * jnp.exp(-ax * ax))


def _gelu_exact(x):
    return 0.5 * x * (1.0 + _erf(x * 0.7071067811865476))


def _matmul_kernel(x_ref, w_ref, b_ref, o_ref, *, activation):
    """(tm, K) @ (K, tn) + bias, optional fused exact-erf GELU.  bf16 MXU, f32 acc."""
    y = jnp.dot(x_ref[...].astype(jnp.bfloat16), w_ref[...].astype(jnp.bfloat16),
                preferred_element_type=jnp.float32)
    y = y + b_ref[...].astype(jnp.float32)
    if activation == "gelu":
        y = _gelu_exact(y)
    o_ref[...] = y.astype(o_ref.dtype)


def _matmul_add_ln_kernel(x_ref, w_ref, b_ref, r_ref, g_ref, bt_ref, o_ref, *, eps):
    """LayerNorm(residual + (tm, K) @ (K, D) + b) * gamma + beta in one pass."""
    y = jnp.dot(x_ref[...].astype(jnp.bfloat16), w_ref[...].astype(jnp.bfloat16),
                preferred_element_type=jnp.float32)
    y = y + b_ref[...].astype(jnp.float32) + r_ref[...].astype(jnp.float32)
    mu = jnp.mean(y, axis=-1, keepdims=True)
    yc = y - mu
    var = jnp.mean(yc * yc, axis=-1, keepdims=True)
    o_ref[...] = (yc * jax.lax.rsqrt(var + eps) * g_ref[...] + bt_ref[...]).astype(o_ref.dtype)


def _ln_kernel(x_ref, g_ref, b_ref, o_ref, *, eps):
    x = x_ref[...].astype(jnp.float32)
    mu = jnp.mean(x, axis=-1, keepdims=True)
    xc = x - mu
    var = jnp.mean(xc * xc, axis=-1, keepdims=True)
    o_ref[...] = (xc * jax.lax.rsqrt(var + eps) * g_ref[...] + b_ref[...]).astype(o_ref.dtype)


def _attn_kernel(q_ref, k_ref, v_ref, *rest, nheads, scale, causal, has_kbias):
    """All heads of one batch element per grid step.

    q_ref: (1, Tq, D); k_ref/v_ref: (1, Tk, D); optional kbias_ref: (1, 1, Tk) f32.
    Causal mask generated in-kernel via iota; key-padding mask arrives as a tiny
    per-key additive bias row.  Output stored as a lane-dense (Tq, D) slab.
    """
    if has_kbias:
        kb_ref, o_ref = rest
        kbias = kb_ref[0].astype(jnp.float32)                       # (1, Tk)
    else:
        (o_ref,) = rest
        kbias = None

    Tq, D = q_ref.shape[1], q_ref.shape[2]
    Tk = k_ref.shape[1]
    hd = D // nheads

    # softmax scale folded into q (O(Tq*D), not O(Tq*Tk)); bf16 MXU operands
    q = (q_ref[0].astype(jnp.float32) * scale).astype(jnp.bfloat16)  # (Tq, D)
    k = k_ref[0].astype(jnp.bfloat16)                                # (Tk, D)
    v = v_ref[0].astype(jnp.bfloat16)                                # (Tk, D)

    if causal:
        qi = jax.lax.broadcasted_iota(jnp.int32, (Tq, Tk), 0)
        ki = jax.lax.broadcasted_iota(jnp.int32, (Tq, Tk), 1)
        cbias = jnp.where(ki > qi, NEG, 0.0).astype(jnp.float32)
    else:
        cbias = None

    outs = []
    for h in range(nheads):                                          # unrolled; H small
        sl = slice(h * hd, (h + 1) * hd)
        s = jax.lax.dot_general(q[:, sl], k[:, sl], (((1,), (1,)), ((), ())),
                                preferred_element_type=jnp.float32)  # (Tq, Tk)
        if cbias is not None:
            s = s + cbias
        if kbias is not None:
            s = s + kbias
        m = jnp.max(s, axis=-1, keepdims=True)
        p = jnp.exp(s - m)
        l = jnp.sum(p, axis=-1, keepdims=True)
        o = jnp.dot(p.astype(jnp.bfloat16), v[:, sl],
                    preferred_element_type=jnp.float32)              # (Tq, hd)
        outs.append(o * pl.reciprocal(l, approx=True))
    o_ref[0] = jnp.concatenate(outs, axis=-1).astype(o_ref.dtype)


# ---------------------------------------------------------------------------- wrappers

def linear(x, w, b, *, activation=None, tm=512, tn=512):
    """x: [..., K]; w: [K, N] (pre-transposed, bf16); b: [N] f32 -> [..., N]."""
    orig = x.shape
    K = int(orig[-1])
    N = int(w.shape[1])
    M = int(math.prod(orig[:-1]))

    x2 = x.reshape(M, K)
    b2 = b.reshape(1, N)

    tm_eff = _row_tile(M, tm)
    tn_eff = N if N <= tn else tn
    grid = (pl.cdiv(M, tm_eff), pl.cdiv(N, tn_eff))

    out = pl.pallas_call(
        functools.partial(_matmul_kernel, activation=activation),
        out_shape=jax.ShapeDtypeStruct((M, N), x.dtype),
        grid_spec=pltpu.PrefetchScalarGridSpec(
            num_scalar_prefetch=0,
            grid=grid,
            in_specs=[
                pl.BlockSpec((tm_eff, K), lambda i, j: (i, 0)),    # streamed row tile
                pl.BlockSpec((K, tn_eff), lambda i, j: (0, j)),    # weight column slab
                pl.BlockSpec((1, tn_eff), lambda i, j: (0, j)),    # bias slab
            ],
            out_specs=pl.BlockSpec((tm_eff, tn_eff), lambda i, j: (i, j)),
        ),
        compiler_params=pltpu.CompilerParams(
            dimension_semantics=("parallel", "parallel"),
            vmem_limit_bytes=VMEM_LIMIT,
        ),
        cost_estimate=pl.CostEstimate(
            flops=2 * M * K * N,
            transcendentals=(M * N if activation == "gelu" else 0),
            bytes_accessed=4 * (M * K + M * N + N) + 2 * K * N,
        ),
    )(x2, w, b2)
    return out.reshape(orig[:-1] + (N,))


def linear_add_ln(x, w, b, residual, gamma, beta, *, eps, tm=512):
    """LayerNorm(residual + x @ w + b): output projection + residual + LN fused."""
    orig = residual.shape
    K = int(x.shape[-1])
    D = int(w.shape[1])
    M = int(math.prod(orig[:-1]))

    x2 = x.reshape(M, K)
    r2 = residual.reshape(M, D)
    b2 = b.reshape(1, D)
    g2 = gamma.reshape(1, D)
    bt2 = beta.reshape(1, D)

    tm_eff = _row_tile(M, tm)
    grid = (pl.cdiv(M, tm_eff),)

    out = pl.pallas_call(
        functools.partial(_matmul_add_ln_kernel, eps=eps),
        out_shape=jax.ShapeDtypeStruct((M, D), residual.dtype),
        grid_spec=pltpu.PrefetchScalarGridSpec(
            num_scalar_prefetch=0,
            grid=grid,
            in_specs=[
                pl.BlockSpec((tm_eff, K), lambda i: (i, 0)),
                pl.BlockSpec((K, D), lambda i: (0, 0)),            # resident weights
                pl.BlockSpec((1, D), lambda i: (0, 0)),
                pl.BlockSpec((tm_eff, D), lambda i: (i, 0)),       # residual row tile
                pl.BlockSpec((1, D), lambda i: (0, 0)),
                pl.BlockSpec((1, D), lambda i: (0, 0)),
            ],
            out_specs=pl.BlockSpec((tm_eff, D), lambda i: (i, 0)),
        ),
        compiler_params=pltpu.CompilerParams(
            dimension_semantics=("parallel",),
            vmem_limit_bytes=VMEM_LIMIT,
        ),
        cost_estimate=pl.CostEstimate(
            flops=2 * M * K * D + 10 * M * D,
            transcendentals=0,
            bytes_accessed=4 * (M * K + 2 * M * D + 3 * D) + 2 * K * D,
        ),
    )(x2, w, b2, r2, g2, bt2)
    return out.reshape(orig)


def layer_norm(x, gamma, beta, *, eps, tm=512):
    orig = x.shape
    D = int(orig[-1])
    M = int(math.prod(orig[:-1]))
    x2 = x.reshape(M, D)
    g2 = gamma.reshape(1, D)
    b2 = beta.reshape(1, D)

    tm_eff = _row_tile(M, tm)
    grid = (pl.cdiv(M, tm_eff),)
    row = pl.BlockSpec((tm_eff, D), lambda i: (i, 0))
    par = pl.BlockSpec((1, D), lambda i: (0, 0))

    out = pl.pallas_call(
        functools.partial(_ln_kernel, eps=eps),
        out_shape=jax.ShapeDtypeStruct((M, D), x.dtype),
        grid_spec=pltpu.PrefetchScalarGridSpec(
            num_scalar_prefetch=0, grid=grid,
            in_specs=[row, par, par], out_specs=row),
        compiler_params=pltpu.CompilerParams(
            dimension_semantics=("parallel",),
            vmem_limit_bytes=VMEM_LIMIT,
        ),
    )(x2, g2, b2)
    return out.reshape(orig)


def attention(q, k, v, key_bias=None, *, num_heads, scale, causal):
    """q: (B, Tq, D); k, v: (B, Tk, D); key_bias: optional (B, 1, Tk) additive f32."""
    B, Tq, D = q.shape
    Tk = k.shape[1]
    has_kbias = key_bias is not None

    in_specs = [
        pl.BlockSpec((1, Tq, D), lambda i: (i, 0, 0)),
        pl.BlockSpec((1, Tk, D), lambda i: (i, 0, 0)),
        pl.BlockSpec((1, Tk, D), lambda i: (i, 0, 0)),
    ]
    operands = [q, k, v]
    if has_kbias:
        in_specs.append(pl.BlockSpec((1, 1, Tk), lambda i: (i, 0, 0)))
        operands.append(key_bias)

    kernel = functools.partial(_attn_kernel, nheads=num_heads, scale=scale,
                               causal=causal, has_kbias=has_kbias)
    return pl.pallas_call(
        kernel,
        out_shape=jax.ShapeDtypeStruct((B, Tq, D), q.dtype),
        grid_spec=pltpu.PrefetchScalarGridSpec(
            num_scalar_prefetch=0,
            grid=(B,),
            in_specs=in_specs,
            out_specs=pl.BlockSpec((1, Tq, D), lambda i: (i, 0, 0)),
        ),
        compiler_params=pltpu.CompilerParams(
            dimension_semantics=("parallel",),
            vmem_limit_bytes=VMEM_LIMIT,
        ),
        cost_estimate=pl.CostEstimate(
            flops=4 * B * Tq * Tk * D,
            transcendentals=B * num_heads * Tq * Tk,
            bytes_accessed=4 * B * (2 * Tq * D + 2 * Tk * D),
        ),
    )(*operands)


# ------------------------------------------------------------------- pure-JAX reference

def ref_layer_norm(x, gamma, beta, *, eps):
    mu = jnp.mean(x, axis=-1, keepdims=True)
    xc = x - mu
    var = jnp.mean(xc * xc, axis=-1, keepdims=True)
    return xc * jax.lax.rsqrt(var + eps) * gamma + beta


def ref_linear(x, w, b, *, activation=None):
    y = jnp.dot(x, w.astype(jnp.float32)) + b
    if activation == "gelu":
        y = jax.nn.gelu(y, approximate=False)
    return y


def ref_linear_add_ln(x, w, b, residual, gamma, beta, *, eps):
    y = residual + jnp.dot(x, w.astype(jnp.float32)) + b
    return ref_layer_norm(y, gamma, beta, eps=eps)


def ref_attention(q, k, v, key_bias=None, *, num_heads, scale, causal):
    B, Tq, D = q.shape
    Tk = k.shape[1]
    hd = D // num_heads
    qh = q.reshape(B, Tq, num_heads, hd).transpose(0, 2, 1, 3)
    kh = k.reshape(B, Tk, num_heads, hd).transpose(0, 2, 1, 3)
    vh = v.reshape(B, Tk, num_heads, hd).transpose(0, 2, 1, 3)
    s = jnp.einsum('bhqd,bhkd->bhqk', qh, kh) * scale
    if causal:
        s = s + jnp.where(jnp.triu(jnp.ones((Tq, Tk), bool), 1), NEG, 0.0)
    if key_bias is not None:
        s = s + key_bias[:, None]                     # (B,1,1,Tk)
    m = jnp.max(s, axis=-1, keepdims=True)
    p = jnp.exp(s - m)
    o = jnp.einsum('bhqk,bhkd->bhqd', p, vh) / jnp.sum(p, axis=-1, keepdims=True)
    return o.transpose(0, 2, 1, 3).reshape(B, Tq, D)


PALLAS_OPS = dict(linear=linear, linear_add_ln=linear_add_ln,
                  layer_norm=layer_norm, attention=attention)
REF_OPS = dict(linear=ref_linear, linear_add_ln=ref_linear_add_ln,
               layer_norm=ref_layer_norm, attention=ref_attention)


# -------------------------------------------------------------------------- model

def decoder_layer(x, mem, lp, num_heads, mem_key_bias, ops):
    d = x.shape[-1]
    hd = d // num_heads
    scale = 1.0 / math.sqrt(hd)

    # --- self attention: fused (D,3D) QKV projection; causal mask built in-kernel ---
    qkv = ops['linear'](x, lp['sa_in_w'], lp['sa_in_b'])
    q, k, v = jnp.split(qkv, 3, axis=-1)
    o = ops['attention'](q, k, v, None, num_heads=num_heads, scale=scale, causal=True)
    x = ops['linear_add_ln'](o, lp['sa_out_w'], lp['sa_out_b'], x,
                             lp['n1_g'], lp['n1_b'], eps=1e-5)

    # --- cross attention: Q from x, fused (D,2D) K/V projection of memory ---
    q = ops['linear'](x, lp['ca_q_w'], lp['ca_q_b'])
    kv = ops['linear'](mem, lp['ca_kv_w'], lp['ca_kv_b'])
    k, v = jnp.split(kv, 2, axis=-1)
    o = ops['attention'](q, k, v, mem_key_bias, num_heads=num_heads, scale=scale, causal=False)
    x = ops['linear_add_ln'](o, lp['ca_out_w'], lp['ca_out_b'], x,
                             lp['n2_g'], lp['n2_b'], eps=1e-5)

    # --- FFN: exact-erf GELU fused into ff1; ff2 fused with residual + LN ---
    h = ops['linear'](x, lp['ff1_w'], lp['ff1_b'], activation='gelu')
    x = ops['linear_add_ln'](h, lp['ff2_w'], lp['ff2_b'], x,
                             lp['n3_g'], lp['n3_b'], eps=1e-5)
    return x


def forward(params, tgt_byte_seq, memory, memory_key_padding_mask, *, num_heads, ops):
    # byte-embedding gather left to XLA; dropout omitted (eval mode)
    x = jnp.take(params['emb'], tgt_byte_seq, axis=0)

    mem = ops['linear'](memory, params['mem_w'], params['mem_b'])

    if memory_key_padding_mask is None:
        mem_key_bias = None
    else:
        mem_key_bias = jnp.where(memory_key_padding_mask, NEG, 0.0)[:, None, :]
        mem_key_bias = mem_key_bias.astype(jnp.float32)          # (B, 1, S)

    for lp in params['layers']:
        x = decoder_layer(x, mem, lp, num_heads, mem_key_bias, ops)

    x = ops['layer_norm'](x, params['final_g'], params['final_b'], eps=1e-6)
    return ops['linear'](x, params['pred_w'], params['pred_b'])


# -------------------------------------------------------------------------- params

def init_params(key, *, d, d_global, num_layers, ffn):
    """Matmul weights are stored pre-transposed (K, N) in bf16 (no per-forward
    transpose / cast); biases and LN params stay f32."""
    keys = iter(jax.random.split(key, 8 + 8 * num_layers))
    wdt = jnp.bfloat16

    def xavier(k, fan_in, fan_out):
        bound = math.sqrt(6.0 / (fan_in + fan_out))
        return jax.random.uniform(k, (fan_in, fan_out), jnp.float32, -bound, bound).astype(wdt)

    params = {
        'emb': jax.random.normal(next(keys), (256, d), jnp.float32) / math.sqrt(d),
        'mem_w': (0.02 * jax.random.normal(next(keys), (d_global, d), jnp.float32)).astype(wdt),
        'mem_b': jnp.zeros((d,), jnp.float32),
        'final_g': jnp.ones((d,), jnp.float32),
        'final_b': jnp.zeros((d,), jnp.float32),
        'pred_w': (0.02 * jax.random.normal(next(keys), (d, 256), jnp.float32)).astype(wdt),
        'pred_b': jnp.zeros((256,), jnp.float32),
        'layers': [],
    }
    for _ in range(num_layers):
        params['layers'].append({
            'sa_in_w': xavier(next(keys), d, 3 * d), 'sa_in_b': jnp.zeros((3 * d,), jnp.float32),
            'sa_out_w': xavier(next(keys), d, d), 'sa_out_b': jnp.zeros((d,), jnp.float32),
            'ca_q_w': xavier(next(keys), d, d), 'ca_q_b': jnp.zeros((d,), jnp.float32),
            'ca_kv_w': xavier(next(keys), d, 2 * d), 'ca_kv_b': jnp.zeros((2 * d,), jnp.float32),
            'ca_out_w': xavier(next(keys), d, d), 'ca_out_b': jnp.zeros((d,), jnp.float32),
            'ff1_w': xavier(next(keys), d, ffn), 'ff1_b': jnp.zeros((ffn,), jnp.float32),
            'ff2_w': xavier(next(keys), ffn, d), 'ff2_b': jnp.zeros((d,), jnp.float32),
            'n1_g': jnp.ones((d,), jnp.float32), 'n1_b': jnp.zeros((d,), jnp.float32),
            'n2_g': jnp.ones((d,), jnp.float32), 'n2_b': jnp.zeros((d,), jnp.float32),
            'n3_g': jnp.ones((d,), jnp.float32), 'n3_b': jnp.zeros((d,), jnp.float32),
        })
    return params


# -------------------------------------------------------------------------- demo

if __name__ == "__main__":
    # Small shapes consistent with LocalDecoder.forward:
    #   tgt_byte_seq [batch, tgt_len] int, memory [batch, mem_len, global_hidden].
    hidden, global_hidden = 128, 256
    num_layers, num_heads = 2, 4
    batch, tgt_len, mem_len = 2, 8, 16

    key = jax.random.PRNGKey(0)
    k_p, k_tgt, k_mem = jax.random.split(key, 3)

    params = init_params(k_p, d=hidden, d_global=global_hidden,
                         num_layers=num_layers, ffn=4 * hidden)
    tgt_byte_seq = jax.random.randint(k_tgt, (batch, tgt_len), 0, 256, dtype=jnp.int32)
    memory = jax.random.normal(k_mem, (batch, mem_len, global_hidden), jnp.float32)
    # key padding mask: True = padded (last 4 memory positions of batch 1)
    mem_pad_mask = jnp.zeros((batch, mem_len), dtype=bool).at[1, -4:].set(True)

    pallas_fwd = jax.jit(functools.partial(forward, num_heads=num_heads, ops=PALLAS_OPS))
    logits = pallas_fwd(params, tgt_byte_seq, memory, mem_pad_mask)
    jax.block_until_ready(logits)

    ref_logits = forward(params, tgt_byte_seq, memory, mem_pad_mask,
                         num_heads=num_heads, ops=REF_OPS)

    assert logits.shape == (batch, tgt_len, 256), logits.shape
    assert bool(jnp.all(jnp.isfinite(logits)))
    max_err = float(jnp.max(jnp.abs(logits - ref_logits)))
    # bf16 MXU operands + approx reciprocal vs f32 reference: small tolerance needed
    assert max_err < 5e-2, max_err

    print("KERNEL_OK")
</pallas_src>

<mosaic_0001>
module attributes {stable_mosaic.version = 11 : i64} {
  func.func @_matmul_kernel(%arg0: i32, %arg1: i32, %arg2: memref<8x128xf32, #tpu.memory_space<vmem>>, %arg3: memref<128x384xbf16, #tpu.memory_space<vmem>>, %arg4: memref<1x384xf32, #tpu.memory_space<vmem>>, %arg5: memref<8x384xf32, #tpu.memory_space<vmem>>) attributes {dimension_semantics = [#tpu.dimension_semantics<parallel>, #tpu.dimension_semantics<parallel>], iteration_bounds = array<i64: 2, 1>, scalar_prefetch = 0 : i64, scratch_operands = 0 : i64, tpu.core_type = #tpu.core_type<tc>, window_params = [{transform_indices = @transform_0, window_bounds = array<i64: 8, 128>}, {transform_indices = @transform_1, window_bounds = array<i64: 128, 384>}, {transform_indices = @transform_2, window_bounds = array<i64: 1, 384>}, {transform_indices = @transform_3, window_bounds = array<i64: 8, 384>}]} {
    %c0 = arith.constant 0 : index
    %c0_0 = arith.constant 0 : index
    %0 = vector.load %arg2[%c0, %c0_0] : memref<8x128xf32, #tpu.memory_space<vmem>>, vector<8x128xf32>
    %1 = arith.truncf %0 : vector<8x128xf32> to vector<8x128xbf16>
    %c0_1 = arith.constant 0 : index
    %c0_2 = arith.constant 0 : index
    %2 = vector.load %arg3[%c0_1, %c0_2] : memref<128x384xbf16, #tpu.memory_space<vmem>>, vector<128x384xbf16>
    %cst = arith.constant dense<0.000000e+00> : vector<8x384xf32>
    %3 = tpu.matmul %1, %2, %cst {dimension_numbers = #tpu.dot_dimension_numbers<[1], [0], [0], [1], [0, 0, 1, 1], [], []>} : vector<8x128xbf16>, vector<128x384xbf16>, vector<8x384xf32> -> vector<8x384xf32>
    %c0_3 = arith.constant 0 : index
    %c0_4 = arith.constant 0 : index
    %4 = vector.load %arg4[%c0_3, %c0_4] : memref<1x384xf32, #tpu.memory_space<vmem>>, vector<1x384xf32>
    %5 = vector.broadcast %4 : vector<1x384xf32> to vector<8x384xf32>
    %6 = arith.addf %3, %5 : vector<8x384xf32>
    %c0_5 = arith.constant 0 : index
    %c0_6 = arith.constant 0 : index
    %7 = vector.load %arg5[%c0_5, %c0_6] : memref<8x384xf32, #tpu.memory_space<vmem>>, vector<8x384xf32>
    tpu.vector_store %arg5[%c0_5, %c0_6], %6 {strides = array<i32>} : memref<8x384xf32, #tpu.memory_space<vmem>>, vector<8x384xf32>,
    return
  }
  func.func @transform_0(%arg0: i32, %arg1: i32) -> (i32, i32) {
    %c0_i32 = arith.constant 0 : i32
    %c0_i32_0 = arith.constant 0 : i32
    return %arg0, %c0_i32 : i32, i32
  }
  func.func @transform_1(%arg0: i32, %arg1: i32) -> (i32, i32) {
    %c0_i32 = arith.constant 0 : i32
    %c0_i32_0 = arith.constant 0 : i32
    return %c0_i32, %arg1 : i32, i32
  }
  func.func @transform_2(%arg0: i32, %arg1: i32) -> (i32, i32) {
    %c0_i32 = arith.constant 0 : i32
    %c0_i32_0 = arith.constant 0 : i32
    return %c0_i32, %arg1 : i32, i32
  }
  func.func @transform_3(%arg0: i32, %arg1: i32) -> (i32, i32) {
    %c0_i32 = arith.constant 0 : i32
    return %arg0, %arg1 : i32, i32
  }
}

module attributes {stable_mosaic.version = 11 : i64} {
  func.func @_attn_kernel(%arg0: i32, %arg1: memref<1x8x128xf32, #tpu.memory_space<vmem>>, %arg2: memref<1x8x128xf32, #tpu.memory_space<vmem>>, %arg3: memref<1x8x128xf32, #tpu.memory_space<vmem>>, %arg4: memref<1x8x128xf32, #tpu.memory_space<vmem>>) attributes {dimension_semantics = [#tpu.dimension_semantics<parallel>], iteration_bounds = array<i64: 2>, scalar_prefetch = 0 : i64, scratch_operands = 0 : i64, tpu.core_type = #tpu.core_type<tc>, window_params = [{transform_indices = @transform_0, window_bounds = array<i64: 1, 8, 128>}, {transform_indices = @transform_1, window_bounds = array<i64: 1, 8, 128>}, {transform_indices = @transform_2, window_bounds = array<i64: 1, 8, 128>}, {transform_indices = @transform_3, window_bounds = array<i64: 1, 8, 128>}]} {
    %c0 = arith.constant 0 : index
    %c0_0 = arith.constant 0 : index
    %c0_1 = arith.constant 0 : index
    %0 = vector.load %arg1[%c0, %c0_0, %c0_1] : memref<1x8x128xf32, #tpu.memory_space<vmem>>, vector<1x8x128xf32>
    %1 = vector.shape_cast %0 : vector<1x8x128xf32> to vector<8x128xf32>
    %cst = arith.constant 0.176776692 : f32
    %2 = vector.broadcast %cst : f32 to vector<8x128xf32>
    %3 = arith.mulf %1, %2 : vector<8x128xf32>
    %4 = arith.truncf %3 : vector<8x128xf32> to vector<8x128xbf16>
    %c0_2 = arith.constant 0 : index
    %c0_3 = arith.constant 0 : index
    %c0_4 = arith.constant 0 : index
    %5 = vector.load %arg2[%c0_2, %c0_3, %c0_4] : memref<1x8x128xf32, #tpu.memory_space<vmem>>, vector<1x8x128xf32>
    %6 = vector.shape_cast %5 : vector<1x8x128xf32> to vector<8x128xf32>
    %7 = arith.truncf %6 : vector<8x128xf32> to vector<8x128xbf16>
    %c0_5 = arith.constant 0 : index
    %c0_6 = arith.constant 0 : index
    %c0_7 = arith.constant 0 : index
    %8 = vector.load %arg3[%c0_5, %c0_6, %c0_7] : memref<1x8x128xf32, #tpu.memory_space<vmem>>, vector<1x8x128xf32>
    %9 = vector.shape_cast %8 : vector<1x8x128xf32> to vector<8x128xf32>
    %10 = arith.truncf %9 : vector<8x128xf32> to vector<8x128xbf16>
    %11 = tpu.iota {dimensions = array<i32: 0>} : vector<8x8xi32>
    %12 = tpu.iota {dimensions = array<i32: 1>} : vector<8x8xi32>
    %13 = arith.cmpi sgt, %12, %11 : vector<8x8xi32>
    %cst_8 = arith.constant -1.000000e+30 : f32
    %cst_9 = arith.constant 0.000000e+00 : f32
    %14 = vector.broadcast %cst_8 : f32 to vector<8x8xf32>
    %15 = vector.broadcast %cst_9 : f32 to vector<8x8xf32>
    %16 = arith.select %13, %14, %15 : vector<8x8xi1>, vector<8x8xf32>
    %17 = vector.extract_strided_slice %4 {offsets = [0, 0], sizes = [8, 32], strides = [1, 1]} : vector<8x128xbf16> to vector<8x32xbf16>
    %18 = vector.extract_strided_slice %7 {offsets = [0, 0], sizes = [8, 32], strides = [1, 1]} : vector<8x128xbf16> to vector<8x32xbf16>
    %cst_10 = arith.constant dense<0.000000e+00> : vector<8x8xf32>
    %19 = tpu.matmul %17, %18, %cst_10 {dimension_numbers = #tpu.dot_dimension_numbers<[1], [1], [0], [0], [0, 0, 1, 0], [], []>} : vector<8x32xbf16>, vector<8x32xbf16>, vector<8x8xf32> -> vector<8x8xf32>
    %20 = arith.addf %19, %16 : vector<8x8xf32>
    %cst_11 = arith.constant dense<0xFF800000> : vector<8xf32>
    %21 = vector.multi_reduction <maximumf>, %20, %cst_11 [1] : vector<8x8xf32> to vector<8xf32>
    %22 = vector.shape_cast %21 : vector<8xf32> to vector<8x1xf32>
    %23 = vector.broadcast %22 : vector<8x1xf32> to vector<8x8xf32>
    %24 = arith.subf %20, %23 : vector<8x8xf32>
    %25 = math.exp %24 : vector<8x8xf32>
    %cst_12 = arith.constant dense<0.000000e+00> : vector<8xf32>
    %26 = vector.multi_reduction <add>, %25, %cst_12 [1] : vector<8x8xf32> to vector<8xf32>
    %27 = vector.shape_cast %26 : vector<8xf32> to vector<8x1xf32>
    %28 = arith.truncf %25 : vector<8x8xf32> to vector<8x8xbf16>
    %29 = vector.extract_strided_slice %10 {offsets = [0, 0], sizes = [8, 32], strides = [1, 1]} : vector<8x128xbf16> to vector<8x32xbf16>
    %cst_13 = arith.constant dense<0.000000e+00> : vector<8x32xf32>
    %30 = tpu.matmul %28, %29, %cst_13 {dimension_numbers = #tpu.dot_dimension_numbers<[1], [0], [0], [1], [0, 0, 1, 1], [], []>} : vector<8x8xbf16>, vector<8x32xbf16>, vector<8x32xf32> -> vector<8x32xf32>
    %31 = tpu.reciprocal %27 {approx = true} : vector<8x1xf32> -> vector<8x1xf32>
    %32 = vector.broadcast %31 : vector<8x1xf32> to vector<8x32xf32>
    %33 = arith.mulf %30, %32 : vector<8x32xf32>
    %34 = vector.extract_strided_slice %4 {offsets = [0, 32], sizes = [8, 32], strides = [1, 1]} : vector<8x128xbf16> to vector<8x32xbf16>
    %35 = vector.extract_strided_slice %7 {offsets = [0, 32], sizes = [8, 32], strides = [1, 1]} : vector<8x128xbf16> to vector<8x32xbf16>
    %cst_14 = arith.constant dense<0.000000e+00> : vector<8x8xf32>
    %36 = tpu.matmul %34, %35, %cst_14 {dimension_numbers = #tpu.dot_dimension_numbers<[1], [1], [0], [0], [0, 0, 1, 0], [], []>} : vector<8x32xbf16>, vector<8x32xbf16>, vector<8x8xf32> -> vector<8x8xf32>
    %37 = arith.addf %36, %16 : vector<8x8xf32>
    %cst_15 = arith.constant dense<0xFF800000> : vector<8xf32>
    %38 = vector.multi_reduction <maximumf>, %37, %cst_15 [1] : vector<8x8xf32> to vector<8xf32>
    %39 = vector.shape_cast %38 : vector<8xf32> to vector<8x1xf32>
    %40 = vector.broadcast %39 : vector<8x1xf32> to vector<8x8xf32>
    %41 = arith.subf %37, %40 : vector<8x8xf32>
    %42 = math.exp %41 : vector<8x8xf32>
    %cst_16 = arith.constant dense<0.000000e+00> : vector<8xf32>
    %43 = vector.multi_reduction <add>, %42, %cst_16 [1] : vector<8x8xf32> to vector<8xf32>
    %44 = vector.shape_cast %43 : vector<8xf32> to vector<8x1xf32>
    %45 = arith.truncf %42 : vector<8x8xf32> to vector<8x8xbf16>
    %46 = vector.extract_strided_slice %10 {offsets = [0, 32], sizes = [8, 32], strides = [1, 1]} : vector<8x128xbf16> to vector<8x32xbf16>
    %cst_17 = arith.constant dense<0.000000e+00> : vector<8x32xf32>
    %47 = tpu.matmul %45, %46, %cst_17 {dimension_numbers = #tpu.dot_dimension_numbers<[1], [0], [0], [1], [0, 0, 1, 1], [], []>} : vector<8x8xbf16>, vector<8x32xbf16>, vector<8x32xf32> -> vector<8x32xf32>
    %48 = tpu.reciprocal %44 {approx = true} : vector<8x1xf32> -> vector<8x1xf32>
    %49 = vector.broadcast %48 : vector<8x1xf32> to vector<8x32xf32>
    %50 = arith.mulf %47, %49 : vector<8x32xf32>
    %51 = vector.extract_strided_slice %4 {offsets = [0, 64], sizes = [8, 32], strides = [1, 1]} : vector<8x128xbf16> to vector<8x32xbf16>
    %52 = vector.extract_strided_slice %7 {offsets = [0, 64], sizes = [8, 32], strides = [1, 1]} : vector<8x128xbf16> to vector<8x32xbf16>
    %cst_18 = arith.constant dense<0.000000e+00> : vector<8x8xf32>
    %53 = tpu.matmul %51, %52, %cst_18 {dimension_numbers = #tpu.dot_dimension_numbers<[1], [1], [0], [0], [0, 0, 1, 0], [], []>} : vector<8x32xbf16>, vector<8x32xbf16>, vector<8x8xf32> -> vector<8x8xf32>
    %54 = arith.addf %53, %16 : vector<8x8xf32>
    %cst_19 = arith.constant dense<0xFF800000> : vector<8xf32>
    %55 = vector.multi_reduction <maximumf>, %54, %cst_19 [1] : vector<8x8xf32> to vector<8xf32>
    %56 = vector.shape_cast %55 : vector<8xf32> to vector<8x1xf32>
    %57 = vector.broadcast %56 : vector<8x1xf32> to vector<8x8xf32>
    %58 = arith.subf %54, %57 : vector<8x8xf32>
    %59 = math.exp %58 : vector<8x8xf32>
    %cst_20 = arith.constant dense<0.000000e+00> : vector<8xf32>
    %60 = vector.multi_reduction <add>, %59, %cst_20 [1] : vector<8x8xf32> to vector<8xf32>
    %61 = vector.shape_cast %60 : vector<8xf32> to vector<8x1xf32>
    %62 = arith.truncf %59 : vector<8x8xf32> to vector<8x8xbf16>
    %63 = vector.extract_strided_slice %10 {offsets = [0, 64], sizes = [8, 32], strides = [1, 1]} : vector<8x128xbf16> to vector<8x32xbf16>
    %cst_21 = arith.constant dense<0.000000e+00> : vector<8x32xf32>
    %64 = tpu.matmul %62, %63, %cst_21 {dimension_numbers = #tpu.dot_dimension_numbers<[1], [0], [0], [1], [0, 0, 1, 1], [], []>} : vector<8x8xbf16>, vector<8x32xbf16>, vector<8x32xf32> -> vector<8x32xf32>
    %65 = tpu.reciprocal %61 {approx = true} : vector<8x1xf32> -> vector<8x1xf32>
    %66 = vector.broadcast %65 : vector<8x1xf32> to vector<8x32xf32>
    %67 = arith.mulf %64, %66 : vector<8x32xf32>
    %68 = vector.extract_strided_slice %4 {offsets = [0, 96], sizes = [8, 32], strides = [1, 1]} : vector<8x128xbf16> to vector<8x32xbf16>
    %69 = vector.extract_strided_slice %7 {offsets = [0, 96], sizes = [8, 32], strides = [1, 1]} : vector<8x128xbf16> to vector<8x32xbf16>
    %cst_22 = arith.constant dense<0.000000e+00> : vector<8x8xf32>
    %70 = tpu.matmul %68, %69, %cst_22 {dimension_numbers = #tpu.dot_dimension_numbers<[1], [1], [0], [0], [0, 0, 1, 0], [], []>} : vector<8x32xbf16>, vector<8x32xbf16>, vector<8x8xf32> -> vector<8x8xf32>
    %71 = arith.addf %70, %16 : vector<8x8xf32>
    %cst_23 = arith.constant dense<0xFF800000> : vector<8xf32>
    %72 = vector.multi_reduction <maximumf>, %71, %cst_23 [1] : vector<8x8xf32> to vector<8xf32>
    %73 = vector.shape_cast %72 : vector<8xf32> to vector<8x1xf32>
    %74 = vector.broadcast %73 : vector<8x1xf32> to vector<8x8xf32>
    %75 = arith.subf %71, %74 : vector<8x8xf32>
    %76 = math.exp %75 : vector<8x8xf32>
    %cst_24 = arith.constant dense<0.000000e+00> : vector<8xf32>
    %77 = vector.multi_reduction <add>, %76, %cst_24 [1] : vector<8x8xf32> to vector<8xf32>
    %78 = vector.shape_cast %77 : vector<8xf32> to vector<8x1xf32>
    %79 = arith.truncf %76 : vector<8x8xf32> to vector<8x8xbf16>
    %80 = vector.extract_strided_slice %10 {offsets = [0, 96], sizes = [8, 32], strides = [1, 1]} : vector<8x128xbf16> to vector<8x32xbf16>
    %cst_25 = arith.constant dense<0.000000e+00> : vector<8x32xf32>
    %81 = tpu.matmul %79, %80, %cst_25 {dimension_numbers = #tpu.dot_dimension_numbers<[1], [0], [0], [1], [0, 0, 1, 1], [], []>} : vector<8x8xbf16>, vector<8x32xbf16>, vector<8x32xf32> -> vector<8x32xf32>
    %82 = tpu.reciprocal %78 {approx = true} : vector<8x1xf32> -> vector<8x1xf32>
    %83 = vector.broadcast %82 : vector<8x1xf32> to vector<8x32xf32>
    %84 = arith.mulf %81, %83 : vector<8x32xf32>
    %85 = tpu.concatenate %33, %50, %67, %84 in 1 : vector<8x32xf32>, vector<8x32xf32>, vector<8x32xf32>, vector<8x32xf32> -> vector<8x128xf32>
    %c0_26 = arith.constant 0 : index
    %c0_27 = arith.constant 0 : index
    %c0_28 = arith.constant 0 : index
    %86 = vector.load %arg4[%c0_26, %c0_27, %c0_28] : memref<1x8x128xf32, #tpu.memory_space<vmem>>, vector<1x8x128xf32>
    %87 = vector.shape_cast %86 : vector<1x8x128xf32> to vector<8x128xf32>
    %88 = vector.shape_cast %85 : vector<8x128xf32> to vector<1x8x128xf32>
    tpu.vector_store %arg4[%c0_26, %c0_27, %c0_28], %88 {strides = array<i32>} : memref<1x8x128xf32, #tpu.memory_space<vmem>>, vector<1x8x128xf32>,
    return
  }
  func.func @transform_0(%arg0: i32) -> (i32, i32, i32) {
    %c0_i32 = arith.constant 0 : i32
    %c0_i32_0 = arith.constant 0 : i32
    %c0_i32_1 = arith.constant 0 : i32
    return %arg0, %c0_i32, %c0_i32_0 : i32, i32, i32
  }
  func.func @transform_1(%arg0: i32) -> (i32, i32, i32) {
    %c0_i32 = arith.constant 0 : i32
    %c0_i32_0 = arith.constant 0 : i32
    %c0_i32_1 = arith.constant 0 : i32
    return %arg0, %c0_i32, %c0_i32_0 : i32, i32, i32
  }
  func.func @transform_2(%arg0: i32) -> (i32, i32, i32) {
    %c0_i32 = arith.constant 0 : i32
    %c0_i32_0 = arith.constant 0 : i32
    %c0_i32_1 = arith.constant 0 : i32
    return %arg0, %c0_i32, %c0_i32_0 : i32, i32, i32
  }
  func.func @transform_3(%arg0: i32) -> (i32, i32, i32) {
    %c0_i32 = arith.constant 0 : i32
    %c0_i32_0 = arith.constant 0 : i32
    %c0_i32_1 = arith.constant 0 : i32
    return %arg0, %c0_i32, %c0_i32_0 : i32, i32, i32
  }
}

module attributes {stable_mosaic.version = 11 : i64} {
  func.func @_matmul_kernel(%arg0: i32, %arg1: i32, %arg2: memref<8x128xf32, #tpu.memory_space<vmem>>, %arg3: memref<128x128xbf16, #tpu.memory_space<vmem>>, %arg4: memref<1x128xf32, #tpu.memory_space<vmem>>, %arg5: memref<8x128xf32, #tpu.memory_space<vmem>>) attributes {dimension_semantics = [#tpu.dimension_semantics<parallel>, #tpu.dimension_semantics<parallel>], iteration_bounds = array<i64: 2, 1>, scalar_prefetch = 0 : i64, scratch_operands = 0 : i64, tpu.core_type = #tpu.core_type<tc>, window_params = [{transform_indices = @transform_0, window_bounds = array<i64: 8, 128>}, {transform_indices = @transform_1, window_bounds = array<i64: 128, 128>}, {transform_indices = @transform_2, window_bounds = array<i64: 1, 128>}, {transform_indices = @transform_3, window_bounds = array<i64: 8, 128>}]} {
    %c0 = arith.constant 0 : index
    %c0_0 = arith.constant 0 : index
    %0 = vector.load %arg2[%c0, %c0_0] : memref<8x128xf32, #tpu.memory_space<vmem>>, vector<8x128xf32>
    %1 = arith.truncf %0 : vector<8x128xf32> to vector<8x128xbf16>
    %c0_1 = arith.constant 0 : index
    %c0_2 = arith.constant 0 : index
    %2 = vector.load %arg3[%c0_1, %c0_2] : memref<128x128xbf16, #tpu.memory_space<vmem>>, vector<128x128xbf16>
    %cst = arith.constant dense<0.000000e+00> : vector<8x128xf32>
    %3 = tpu.matmul %1, %2, %cst {dimension_numbers = #tpu.dot_dimension_numbers<[1], [0], [0], [1], [0, 0, 1, 1], [], []>} : vector<8x128xbf16>, vector<128x128xbf16>, vector<8x128xf32> -> vector<8x128xf32>
    %c0_3 = arith.constant 0 : index
    %c0_4 = arith.constant 0 : index
    %4 = vector.load %arg4[%c0_3, %c0_4] : memref<1x128xf32, #tpu.memory_space<vmem>>, vector<1x128xf32>
    %5 = vector.broadcast %4 : vector<1x128xf32> to vector<8x128xf32>
    %6 = arith.addf %3, %5 : vector<8x128xf32>
    %c0_5 = arith.constant 0 : index
    %c0_6 = arith.constant 0 : index
    %7 = vector.load %arg5[%c0_5, %c0_6] : memref<8x128xf32, #tpu.memory_space<vmem>>, vector<8x128xf32>
    tpu.vector_store %arg5[%c0_5, %c0_6], %6 {strides = array<i32>} : memref<8x128xf32, #tpu.memory_space<vmem>>, vector<8x128xf32>,
    return
  }
  func.func @transform_0(%arg0: i32, %arg1: i32) -> (i32, i32) {
    %c0_i32 = arith.constant 0 : i32
    %c0_i32_0 = arith.constant 0 : i32
    return %arg0, %c0_i32 : i32, i32
  }
  func.func @transform_1(%arg0: i32, %arg1: i32) -> (i32, i32) {
    %c0_i32 = arith.constant 0 : i32
    %c0_i32_0 = arith.constant 0 : i32
    return %c0_i32, %arg1 : i32, i32
  }
  func.func @transform_2(%arg0: i32, %arg1: i32) -> (i32, i32) {
    %c0_i32 = arith.constant 0 : i32
    %c0_i32_0 = arith.constant 0 : i32
    return %c0_i32, %arg1 : i32, i32
  }
  func.func @transform_3(%arg0: i32, %arg1: i32) -> (i32, i32) {
    %c0_i32 = arith.constant 0 : i32
    return %arg0, %arg1 : i32, i32
  }
}

module attributes {stable_mosaic.version = 11 : i64} {
  func.func @_matmul_add_ln_kernel(%arg0: i32, %arg1: memref<8x128xf32, #tpu.memory_space<vmem>>, %arg2: memref<128x128xbf16, #tpu.memory_space<vmem>>, %arg3: memref<1x128xf32, #tpu.memory_space<vmem>>, %arg4: memref<8x128xf32, #tpu.memory_space<vmem>>, %arg5: memref<1x128xf32, #tpu.memory_space<vmem>>, %arg6: memref<1x128xf32, #tpu.memory_space<vmem>>, %arg7: memref<8x128xf32, #tpu.memory_space<vmem>>) attributes {dimension_semantics = [#tpu.dimension_semantics<parallel>], iteration_bounds = array<i64: 2>, scalar_prefetch = 0 : i64, scratch_operands = 0 : i64, tpu.core_type = #tpu.core_type<tc>, window_params = [{transform_indices = @transform_0, window_bounds = array<i64: 8, 128>}, {pipeline_mode = #tpu.pipeline_mode<synchronous>, transform_indices = @transform_1, window_bounds = array<i64: 128, 128>}, {pipeline_mode = #tpu.pipeline_mode<synchronous>, transform_indices = @transform_2, window_bounds = array<i64: 1, 128>}, {transform_indices = @transform_3, window_bounds = array<i64: 8, 128>}, {pipeline_mode = #tpu.pipeline_mode<synchronous>, transform_indices = @transform_4, window_bounds = array<i64: 1, 128>}, {pipeline_mode = #tpu.pipeline_mode<synchronous>, transform_indices = @transform_5, window_bounds = array<i64: 1, 128>}, {transform_indices = @transform_6, window_bounds = array<i64: 8, 128>}]} {
    %c0 = arith.constant 0 : index
    %c0_0 = arith.constant 0 : index
    %0 = vector.load %arg1[%c0, %c0_0] : memref<8x128xf32, #tpu.memory_space<vmem>>, vector<8x128xf32>
    %1 = arith.truncf %0 : vector<8x128xf32> to vector<8x128xbf16>
    %c0_1 = arith.constant 0 : index
    %c0_2 = arith.constant 0 : index
    %2 = vector.load %arg2[%c0_1, %c0_2] : memref<128x128xbf16, #tpu.memory_space<vmem>>, vector<128x128xbf16>
    %cst = arith.constant dense<0.000000e+00> : vector<8x128xf32>
    %3 = tpu.matmul %1, %2, %cst {dimension_numbers = #tpu.dot_dimension_numbers<[1], [0], [0], [1], [0, 0, 1, 1], [], []>} : vector<8x128xbf16>, vector<128x128xbf16>, vector<8x128xf32> -> vector<8x128xf32>
    %c0_3 = arith.constant 0 : index
    %c0_4 = arith.constant 0 : index
    %4 = vector.load %arg3[%c0_3, %c0_4] : memref<1x128xf32, #tpu.memory_space<vmem>>, vector<1x128xf32>
    %5 = vector.broadcast %4 : vector<1x128xf32> to vector<8x128xf32>
    %6 = arith.addf %3, %5 : vector<8x128xf32>
    %c0_5 = arith.constant 0 : index
    %c0_6 = arith.constant 0 : index
    %7 = vector.load %arg4[%c0_5, %c0_6] : memref<8x128xf32, #tpu.memory_space<vmem>>, vector<8x128xf32>
    %8 = arith.addf %6, %7 : vector<8x128xf32>
    %cst_7 = arith.constant dense<0.000000e+00> : vector<8xf32>
    %9 = vector.multi_reduction <add>, %8, %cst_7 [1] : vector<8x128xf32> to vector<8xf32>
    %10 = vector.shape_cast %9 : vector<8xf32> to vector<8x1xf32>
    %cst_8 = arith.constant 1.280000e+02 : f32
    %11 = vector.broadcast %cst_8 : f32 to vector<8x1xf32>
    %12 = arith.divf %10, %11 : vector<8x1xf32>
    %13 = vector.broadcast %12 : vector<8x1xf32> to vector<8x128xf32>
    %14 = arith.subf %8, %13 : vector<8x128xf32>
    %15 = arith.mulf %14, %14 : vector<8x128xf32>
    %cst_9 = arith.constant dense<0.000000e+00> : vector<8xf32>
    %16 = vector.multi_reduction <add>, %15, %cst_9 [1] : vector<8x128xf32> to vector<8xf32>
    %17 = vector.shape_cast %16 : vector<8xf32> to vector<8x1xf32>
    %cst_10 = arith.constant 1.280000e+02 : f32
    %18 = vector.broadcast %cst_10 : f32 to vector<8x1xf32>
    %19 = arith.divf %17, %18 : vector<8x1xf32>
    %cst_11 = arith.constant 9.99999974E-6 : f32
    %20 = vector.broadcast %cst_11 : f32 to vector<8x1xf32>
    %21 = arith.addf %19, %20 : vector<8x1xf32>
    %22 = math.rsqrt %21 : vector<8x1xf32>
    %23 = vector.broadcast %22 : vector<8x1xf32> to vector<8x128xf32>
    %24 = arith.mulf %14, %23 : vector<8x128xf32>
    %c0_12 = arith.constant 0 : index
    %c0_13 = arith.constant 0 : index
    %25 = vector.load %arg5[%c0_12, %c0_13] : memref<1x128xf32, #tpu.memory_space<vmem>>, vector<1x128xf32>
    %26 = vector.broadcast %25 : vector<1x128xf32> to vector<8x128xf32>
    %27 = arith.mulf %24, %26 : vector<8x128xf32>
    %c0_14 = arith.constant 0 : index
    %c0_15 = arith.constant 0 : index
    %28 = vector.load %arg6[%c0_14, %c0_15] : memref<1x128xf32, #tpu.memory_space<vmem>>, vector<1x128xf32>
    %29 = vector.broadcast %28 : vector<1x128xf32> to vector<8x128xf32>
    %30 = arith.addf %27, %29 : vector<8x128xf32>
    %c0_16 = arith.constant 0 : index
    %c0_17 = arith.constant 0 : index
    %31 = vector.load %arg7[%c0_16, %c0_17] : memref<8x128xf32, #tpu.memory_space<vmem>>, vector<8x128xf32>
    tpu.vector_store %arg7[%c0_16, %c0_17], %30 {strides = array<i32>} : memref<8x128xf32, #tpu.memory_space<vmem>>, vector<8x128xf32>,
    return
  }
  func.func @transform_0(%arg0: i32) -> (i32, i32) {
    %c0_i32 = arith.constant 0 : i32
    %c0_i32_0 = arith.constant 0 : i32
    return %arg0, %c0_i32 : i32, i32
  }
  func.func @transform_1(%arg0: i32) -> (i32, i32) {
    %c0_i32 = arith.constant 0 : i32
    %c0_i32_0 = arith.constant 0 : i32
    %c0_i32_1 = arith.constant 0 : i32
    return %c0_i32, %c0_i32_0 : i32, i32
  }
  func.func @transform_2(%arg0: i32) -> (i32, i32) {
    %c0_i32 = arith.constant 0 : i32
    %c0_i32_0 = arith.constant 0 : i32
    %c0_i32_1 = arith.constant 0 : i32
    return %c0_i32, %c0_i32_0 : i32, i32
  }
  func.func @transform_3(%arg0: i32) -> (i32, i32) {
    %c0_i32 = arith.constant 0 : i32
    %c0_i32_0 = arith.constant 0 : i32
    return %arg0, %c0_i32 : i32, i32
  }
  func.func @transform_4(%arg0: i32) -> (i32, i32) {
    %c0_i32 = arith.constant 0 : i32
    %c0_i32_0 = arith.constant 0 : i32
    %c0_i32_1 = arith.constant 0 : i32
    return %c0_i32, %c0_i32_0 : i32, i32
  }
  func.func @transform_5(%arg0: i32) -> (i32, i32) {
    %c0_i32 = arith.constant 0 : i32
    %c0_i32_0 = arith.constant 0 : i32
    %c0_i32_1 = arith.constant 0 : i32
    return %c0_i32, %c0_i32_0 : i32, i32
  }
  func.func @transform_6(%arg0: i32) -> (i32, i32) {
    %c0_i32 = arith.constant 0 : i32
    %c0_i32_0 = arith.constant 0 : i32
    return %arg0, %c0_i32 : i32, i32
  }
}

module attributes {stable_mosaic.version = 11 : i64} {
  func.func @_matmul_kernel(%arg0: i32, %arg1: i32, %arg2: memref<16x256xf32, #tpu.memory_space<vmem>>, %arg3: memref<256x128xbf16, #tpu.memory_space<vmem>>, %arg4: memref<1x128xf32, #tpu.memory_space<vmem>>, %arg5: memref<16x128xf32, #tpu.memory_space<vmem>>) attributes {dimension_semantics = [#tpu.dimension_semantics<parallel>, #tpu.dimension_semantics<parallel>], iteration_bounds = array<i64: 2, 1>, scalar_prefetch = 0 : i64, scratch_operands = 0 : i64, tpu.core_type = #tpu.core_type<tc>, window_params = [{transform_indices = @transform_0, window_bounds = array<i64: 16, 256>}, {transform_indices = @transform_1, window_bounds = array<i64: 256, 128>}, {transform_indices = @transform_2, window_bounds = array<i64: 1, 128>}, {transform_indices = @transform_3, window_bounds = array<i64: 16, 128>}]} {
    %c0 = arith.constant 0 : index
    %c0_0 = arith.constant 0 : index
    %0 = vector.load %arg2[%c0, %c0_0] : memref<16x256xf32, #tpu.memory_space<vmem>>, vector<16x256xf32>
    %1 = arith.truncf %0 : vector<16x256xf32> to vector<16x256xbf16>
    %c0_1 = arith.constant 0 : index
    %c0_2 = arith.constant 0 : index
    %2 = vector.load %arg3[%c0_1, %c0_2] : memref<256x128xbf16, #tpu.memory_space<vmem>>, vector<256x128xbf16>
    %cst = arith.constant dense<0.000000e+00> : vector<16x128xf32>
    %3 = tpu.matmul %1, %2, %cst {dimension_numbers = #tpu.dot_dimension_numbers<[1], [0], [0], [1], [0, 0, 1, 1], [], []>} : vector<16x256xbf16>, vector<256x128xbf16>, vector<16x128xf32> -> vector<16x128xf32>
    %c0_3 = arith.constant 0 : index
    %c0_4 = arith.constant 0 : index
    %4 = vector.load %arg4[%c0_3, %c0_4] : memref<1x128xf32, #tpu.memory_space<vmem>>, vector<1x128xf32>
    %5 = vector.broadcast %4 : vector<1x128xf32> to vector<16x128xf32>
    %6 = arith.addf %3, %5 : vector<16x128xf32>
    %c0_5 = arith.constant 0 : index
    %c0_6 = arith.constant 0 : index
    %7 = vector.load %arg5[%c0_5, %c0_6] : memref<16x128xf32, #tpu.memory_space<vmem>>, vector<16x128xf32>
    tpu.vector_store %arg5[%c0_5, %c0_6], %6 {strides = array<i32>} : memref<16x128xf32, #tpu.memory_space<vmem>>, vector<16x128xf32>,
    return
  }
  func.func @transform_0(%arg0: i32, %arg1: i32) -> (i32, i32) {
    %c0_i32 = arith.constant 0 : i32
    %c0_i32_0 = arith.constant 0 : i32
    return %arg0, %c0_i32 : i32, i32
  }
  func.func @transform_1(%arg0: i32, %arg1: i32) -> (i32, i32) {
    %c0_i32 = arith.constant 0 : i32
    %c0_i32_0 = arith.constant 0 : i32
    return %c0_i32, %arg1 : i32, i32
  }
  func.func @transform_2(%arg0: i32, %arg1: i32) -> (i32, i32) {
    %c0_i32 = arith.constant 0 : i32
    %c0_i32_0 = arith.constant 0 : i32
    return %c0_i32, %arg1 : i32, i32
  }
  func.func @transform_3(%arg0: i32, %arg1: i32) -> (i32, i32) {
    %c0_i32 = arith.constant 0 : i32
    return %arg0, %arg1 : i32, i32
  }
}

module attributes {stable_mosaic.version = 11 : i64} {
  func.func @_matmul_kernel(%arg0: i32, %arg1: i32, %arg2: memref<16x128xf32, #tpu.memory_space<vmem>>, %arg3: memref<128x256xbf16, #tpu.memory_space<vmem>>, %arg4: memref<1x256xf32, #tpu.memory_space<vmem>>, %arg5: memref<16x256xf32, #tpu.memory_space<vmem>>) attributes {dimension_semantics = [#tpu.dimension_semantics<parallel>, #tpu.dimension_semantics<parallel>], iteration_bounds = array<i64: 2, 1>, scalar_prefetch = 0 : i64, scratch_operands = 0 : i64, tpu.core_type = #tpu.core_type<tc>, window_params = [{transform_indices = @transform_0, window_bounds = array<i64: 16, 128>}, {transform_indices = @transform_1, window_bounds = array<i64: 128, 256>}, {transform_indices = @transform_2, window_bounds = array<i64: 1, 256>}, {transform_indices = @transform_3, window_bounds = array<i64: 16, 256>}]} {
    %c0 = arith.constant 0 : index
    %c0_0 = arith.constant 0 : index
    %0 = vector.load %arg2[%c0, %c0_0] : memref<16x128xf32, #tpu.memory_space<vmem>>, vector<16x128xf32>
    %1 = arith.truncf %0 : vector<16x128xf32> to vector<16x128xbf16>
    %c0_1 = arith.constant 0 : index
    %c0_2 = arith.constant 0 : index
    %2 = vector.load %arg3[%c0_1, %c0_2] : memref<128x256xbf16, #tpu.memory_space<vmem>>, vector<128x256xbf16>
    %cst = arith.constant dense<0.000000e+00> : vector<16x256xf32>
    %3 = tpu.matmul %1, %2, %cst {dimension_numbers = #tpu.dot_dimension_numbers<[1], [0], [0], [1], [0, 0, 1, 1], [], []>} : vector<16x128xbf16>, vector<128x256xbf16>, vector<16x256xf32> -> vector<16x256xf32>
    %c0_3 = arith.constant 0 : index
    %c0_4 = arith.constant 0 : index
    %4 = vector.load %arg4[%c0_3, %c0_4] : memref<1x256xf32, #tpu.memory_space<vmem>>, vector<1x256xf32>
    %5 = vector.broadcast %4 : vector<1x256xf32> to vector<16x256xf32>
    %6 = arith.addf %3, %5 : vector<16x256xf32>
    %c0_5 = arith.constant 0 : index
    %c0_6 = arith.constant 0 : index
    %7 = vector.load %arg5[%c0_5, %c0_6] : memref<16x256xf32, #tpu.memory_space<vmem>>, vector<16x256xf32>
    tpu.vector_store %arg5[%c0_5, %c0_6], %6 {strides = array<i32>} : memref<16x256xf32, #tpu.memory_space<vmem>>, vector<16x256xf32>,
    return
  }
  func.func @transform_0(%arg0: i32, %arg1: i32) -> (i32, i32) {
    %c0_i32 = arith.constant 0 : i32
    %c0_i32_0 = arith.constant 0 : i32
    return %arg0, %c0_i32 : i32, i32
  }
  func.func @transform_1(%arg0: i32, %arg1: i32) -> (i32, i32) {
    %c0_i32 = arith.constant 0 : i32
    %c0_i32_0 = arith.constant 0 : i32
    return %c0_i32, %arg1 : i32, i32
  }
  func.func @transform_2(%arg0: i32, %arg1: i32) -> (i32, i32) {
    %c0_i32 = arith.constant 0 : i32
    %c0_i32_0 = arith.constant 0 : i32
    return %c0_i32, %arg1 : i32, i32
  }
  func.func @transform_3(%arg0: i32, %arg1: i32) -> (i32, i32) {
    %c0_i32 = arith.constant 0 : i32
    return %arg0, %arg1 : i32, i32
  }
}

module attributes {stable_mosaic.version = 11 : i64} {
  func.func @_attn_kernel(%arg0: i32, %arg1: memref<1x8x128xf32, #tpu.memory_space<vmem>>, %arg2: memref<1x16x128xf32, #tpu.memory_space<vmem>>, %arg3: memref<1x16x128xf32, #tpu.memory_space<vmem>>, %arg4: memref<1x1x16xf32, #tpu.memory_space<vmem>>, %arg5: memref<1x8x128xf32, #tpu.memory_space<vmem>>) attributes {dimension_semantics = [#tpu.dimension_semantics<parallel>], iteration_bounds = array<i64: 2>, scalar_prefetch = 0 : i64, scratch_operands = 0 : i64, tpu.core_type = #tpu.core_type<tc>, window_params = [{transform_indices = @transform_0, window_bounds = array<i64: 1, 8, 128>}, {transform_indices = @transform_1, window_bounds = array<i64: 1, 16, 128>}, {transform_indices = @transform_2, window_bounds = array<i64: 1, 16, 128>}, {transform_indices = @transform_3, window_bounds = array<i64: 1, 1, 16>}, {transform_indices = @transform_4, window_bounds = array<i64: 1, 8, 128>}]} {
    %c0 = arith.constant 0 : index
    %c0_0 = arith.constant 0 : index
    %c0_1 = arith.constant 0 : index
    %0 = vector.load %arg4[%c0, %c0_0, %c0_1] : memref<1x1x16xf32, #tpu.memory_space<vmem>>, vector<1x1x16xf32>
    %1 = vector.shape_cast %0 : vector<1x1x16xf32> to vector<1x16xf32>
    %c0_2 = arith.constant 0 : index
    %c0_3 = arith.constant 0 : index
    %c0_4 = arith.constant 0 : index
    %2 = vector.load %arg1[%c0_2, %c0_3, %c0_4] : memref<1x8x128xf32, #tpu.memory_space<vmem>>, vector<1x8x128xf32>
    %3 = vector.shape_cast %2 : vector<1x8x128xf32> to vector<8x128xf32>
    %cst = arith.constant 0.176776692 : f32
    %4 = vector.broadcast %cst : f32 to vector<8x128xf32>
    %5 = arith.mulf %3, %4 : vector<8x128xf32>
    %6 = arith.truncf %5 : vector<8x128xf32> to vector<8x128xbf16>
    %c0_5 = arith.constant 0 : index
    %c0_6 = arith.constant 0 : index
    %c0_7 = arith.constant 0 : index
    %7 = vector.load %arg2[%c0_5, %c0_6, %c0_7] : memref<1x16x128xf32, #tpu.memory_space<vmem>>, vector<1x16x128xf32>
    %8 = vector.shape_cast %7 : vector<1x16x128xf32> to vector<16x128xf32>
    %9 = arith.truncf %8 : vector<16x128xf32> to vector<16x128xbf16>
    %c0_8 = arith.constant 0 : index
    %c0_9 = arith.constant 0 : index
    %c0_10 = arith.constant 0 : index
    %10 = vector.load %arg3[%c0_8, %c0_9, %c0_10] : memref<1x16x128xf32, #tpu.memory_space<vmem>>, vector<1x16x128xf32>
    %11 = vector.shape_cast %10 : vector<1x16x128xf32> to vector<16x128xf32>
    %12 = arith.truncf %11 : vector<16x128xf32> to vector<16x128xbf16>
    %13 = vector.extract_strided_slice %6 {offsets = [0, 0], sizes = [8, 32], strides = [1, 1]} : vector<8x128xbf16> to vector<8x32xbf16>
    %14 = vector.extract_strided_slice %9 {offsets = [0, 0], sizes = [16, 32], strides = [1, 1]} : vector<16x128xbf16> to vector<16x32xbf16>
    %cst_11 = arith.constant dense<0.000000e+00> : vector<8x16xf32>
    %15 = tpu.matmul %13, %14, %cst_11 {dimension_numbers = #tpu.dot_dimension_numbers<[1], [1], [0], [0], [0, 0, 1, 0], [], []>} : vector<8x32xbf16>, vector<16x32xbf16>, vector<8x16xf32> -> vector<8x16xf32>
    %16 = vector.broadcast %1 : vector<1x16xf32> to vector<8x16xf32>
    %17 = arith.addf %15, %16 : vector<8x16xf32>
    %cst_12 = arith.constant dense<0xFF800000> : vector<8xf32>
    %18 = vector.multi_reduction <maximumf>, %17, %cst_12 [1] : vector<8x16xf32> to vector<8xf32>
    %19 = vector.shape_cast %18 : vector<8xf32> to vector<8x1xf32>
    %20 = vector.broadcast %19 : vector<8x1xf32> to vector<8x16xf32>
    %21 = arith.subf %17, %20 : vector<8x16xf32>
    %22 = math.exp %21 : vector<8x16xf32>
    %cst_13 = arith.constant dense<0.000000e+00> : vector<8xf32>
    %23 = vector.multi_reduction <add>, %22, %cst_13 [1] : vector<8x16xf32> to vector<8xf32>
    %24 = vector.shape_cast %23 : vector<8xf32> to vector<8x1xf32>
    %25 = arith.truncf %22 : vector<8x16xf32> to vector<8x16xbf16>
    %26 = vector.extract_strided_slice %12 {offsets = [0, 0], sizes = [16, 32], strides = [1, 1]} : vector<16x128xbf16> to vector<16x32xbf16>
    %cst_14 = arith.constant dense<0.000000e+00> : vector<8x32xf32>
    %27 = tpu.matmul %25, %26, %cst_14 {dimension_numbers = #tpu.dot_dimension_numbers<[1], [0], [0], [1], [0, 0, 1, 1], [], []>} : vector<8x16xbf16>, vector<16x32xbf16>, vector<8x32xf32> -> vector<8x32xf32>
    %28 = tpu.reciprocal %24 {approx = true} : vector<8x1xf32> -> vector<8x1xf32>
    %29 = vector.broadcast %28 : vector<8x1xf32> to vector<8x32xf32>
    %30 = arith.mulf %27, %29 : vector<8x32xf32>
    %31 = vector.extract_strided_slice %6 {offsets = [0, 32], sizes = [8, 32], strides = [1, 1]} : vector<8x128xbf16> to vector<8x32xbf16>
    %32 = vector.extract_strided_slice %9 {offsets = [0, 32], sizes = [16, 32], strides = [1, 1]} : vector<16x128xbf16> to vector<16x32xbf16>
    %cst_15 = arith.constant dense<0.000000e+00> : vector<8x16xf32>
    %33 = tpu.matmul %31, %32, %cst_15 {dimension_numbers = #tpu.dot_dimension_numbers<[1], [1], [0], [0], [0, 0, 1, 0], [], []>} : vector<8x32xbf16>, vector<16x32xbf16>, vector<8x16xf32> -> vector<8x16xf32>
    %34 = vector.broadcast %1 : vector<1x16xf32> to vector<8x16xf32>
    %35 = arith.addf %33, %34 : vector<8x16xf32>
    %cst_16 = arith.constant dense<0xFF800000> : vector<8xf32>
    %36 = vector.multi_reduction <maximumf>, %35, %cst_16 [1] : vector<8x16xf32> to vector<8xf32>
    %37 = vector.shape_cast %36 : vector<8xf32> to vector<8x1xf32>
    %38 = vector.broadcast %37 : vector<8x1xf32> to vector<8x16xf32>
    %39 = arith.subf %35, %38 : vector<8x16xf32>
    %40 = math.exp %39 : vector<8x16xf32>
    %cst_17 = arith.constant dense<0.000000e+00> : vector<8xf32>
    %41 = vector.multi_reduction <add>, %40, %cst_17 [1] : vector<8x16xf32> to vector<8xf32>
    %42 = vector.shape_cast %41 : vector<8xf32> to vector<8x1xf32>
    %43 = arith.truncf %40 : vector<8x16xf32> to vector<8x16xbf16>
    %44 = vector.extract_strided_slice %12 {offsets = [0, 32], sizes = [16, 32], strides = [1, 1]} : vector<16x128xbf16> to vector<16x32xbf16>
    %cst_18 = arith.constant dense<0.000000e+00> : vector<8x32xf32>
    %45 = tpu.matmul %43, %44, %cst_18 {dimension_numbers = #tpu.dot_dimension_numbers<[1], [0], [0], [1], [0, 0, 1, 1], [], []>} : vector<8x16xbf16>, vector<16x32xbf16>, vector<8x32xf32> -> vector<8x32xf32>
    %46 = tpu.reciprocal %42 {approx = true} : vector<8x1xf32> -> vector<8x1xf32>
    %47 = vector.broadcast %46 : vector<8x1xf32> to vector<8x32xf32>
    %48 = arith.mulf %45, %47 : vector<8x32xf32>
    %49 = vector.extract_strided_slice %6 {offsets = [0, 64], sizes = [8, 32], strides = [1, 1]} : vector<8x128xbf16> to vector<8x32xbf16>
    %50 = vector.extract_strided_slice %9 {offsets = [0, 64], sizes = [16, 32], strides = [1, 1]} : vector<16x128xbf16> to vector<16x32xbf16>
    %cst_19 = arith.constant dense<0.000000e+00> : vector<8x16xf32>
    %51 = tpu.matmul %49, %50, %cst_19 {dimension_numbers = #tpu.dot_dimension_numbers<[1], [1], [0], [0], [0, 0, 1, 0], [], []>} : vector<8x32xbf16>, vector<16x32xbf16>, vector<8x16xf32> -> vector<8x16xf32>
    %52 = vector.broadcast %1 : vector<1x16xf32> to vector<8x16xf32>
    %53 = arith.addf %51, %52 : vector<8x16xf32>
    %cst_20 = arith.constant dense<0xFF800000> : vector<8xf32>
    %54 = vector.multi_reduction <maximumf>, %53, %cst_20 [1] : vector<8x16xf32> to vector<8xf32>
    %55 = vector.shape_cast %54 : vector<8xf32> to vector<8x1xf32>
    %56 = vector.broadcast %55 : vector<8x1xf32> to vector<8x16xf32>
    %57 = arith.subf %53, %56 : vector<8x16xf32>
    %58 = math.exp %57 : vector<8x16xf32>
    %cst_21 = arith.constant dense<0.000000e+00> : vector<8xf32>
    %59 = vector.multi_reduction <add>, %58, %cst_21 [1] : vector<8x16xf32> to vector<8xf32>
    %60 = vector.shape_cast %59 : vector<8xf32> to vector<8x1xf32>
    %61 = arith.truncf %58 : vector<8x16xf32> to vector<8x16xbf16>
    %62 = vector.extract_strided_slice %12 {offsets = [0, 64], sizes = [16, 32], strides = [1, 1]} : vector<16x128xbf16> to vector<16x32xbf16>
    %cst_22 = arith.constant dense<0.000000e+00> : vector<8x32xf32>
    %63 = tpu.matmul %61, %62, %cst_22 {dimension_numbers = #tpu.dot_dimension_numbers<[1], [0], [0], [1], [0, 0, 1, 1], [], []>} : vector<8x16xbf16>, vector<16x32xbf16>, vector<8x32xf32> -> vector<8x32xf32>
    %64 = tpu.reciprocal %60 {approx = true} : vector<8x1xf32> -> vector<8x1xf32>
    %65 = vector.broadcast %64 : vector<8x1xf32> to vector<8x32xf32>
    %66 = arith.mulf %63, %65 : vector<8x32xf32>
    %67 = vector.extract_strided_slice %6 {offsets = [0, 96], sizes = [8, 32], strides = [1, 1]} : vector<8x128xbf16> to vector<8x32xbf16>
    %68 = vector.extract_strided_slice %9 {offsets = [0, 96], sizes = [16, 32], strides = [1, 1]} : vector<16x128xbf16> to vector<16x32xbf16>
    %cst_23 = arith.constant dense<0.000000e+00> : vector<8x16xf32>
    %69 = tpu.matmul %67, %68, %cst_23 {dimension_numbers = #tpu.dot_dimension_numbers<[1], [1], [0], [0], [0, 0, 1, 0], [], []>} : vector<8x32xbf16>, vector<16x32xbf16>, vector<8x16xf32> -> vector<8x16xf32>
    %70 = vector.broadcast %1 : vector<1x16xf32> to vector<8x16xf32>
    %71 = arith.addf %69, %70 : vector<8x16xf32>
    %cst_24 = arith.constant dense<0xFF800000> : vector<8xf32>
    %72 = vector.multi_reduction <maximumf>, %71, %cst_24 [1] : vector<8x16xf32> to vector<8xf32>
    %73 = vector.shape_cast %72 : vector<8xf32> to vector<8x1xf32>
    %74 = vector.broadcast %73 : vector<8x1xf32> to vector<8x16xf32>
    %75 = arith.subf %71, %74 : vector<8x16xf32>
    %76 = math.exp %75 : vector<8x16xf32>
    %cst_25 = arith.constant dense<0.000000e+00> : vector<8xf32>
    %77 = vector.multi_reduction <add>, %76, %cst_25 [1] : vector<8x16xf32> to vector<8xf32>
    %78 = vector.shape_cast %77 : vector<8xf32> to vector<8x1xf32>
    %79 = arith.truncf %76 : vector<8x16xf32> to vector<8x16xbf16>
    %80 = vector.extract_strided_slice %12 {offsets = [0, 96], sizes = [16, 32], strides = [1, 1]} : vector<16x128xbf16> to vector<16x32xbf16>
    %cst_26 = arith.constant dense<0.000000e+00> : vector<8x32xf32>
    %81 = tpu.matmul %79, %80, %cst_26 {dimension_numbers = #tpu.dot_dimension_numbers<[1], [0], [0], [1], [0, 0, 1, 1], [], []>} : vector<8x16xbf16>, vector<16x32xbf16>, vector<8x32xf32> -> vector<8x32xf32>
    %82 = tpu.reciprocal %78 {approx = true} : vector<8x1xf32> -> vector<8x1xf32>
    %83 = vector.broadcast %82 : vector<8x1xf32> to vector<8x32xf32>
    %84 = arith.mulf %81, %83 : vector<8x32xf32>
    %85 = tpu.concatenate %30, %48, %66, %84 in 1 : vector<8x32xf32>, vector<8x32xf32>, vector<8x32xf32>, vector<8x32xf32> -> vector<8x128xf32>
    %c0_27 = arith.constant 0 : index
    %c0_28 = arith.constant 0 : index
    %c0_29 = arith.constant 0 : index
    %86 = vector.load %arg5[%c0_27, %c0_28, %c0_29] : memref<1x8x128xf32, #tpu.memory_space<vmem>>, vector<1x8x128xf32>
    %87 = vector.shape_cast %86 : vector<1x8x128xf32> to vector<8x128xf32>
    %88 = vector.shape_cast %85 : vector<8x128xf32> to vector<1x8x128xf32>
    tpu.vector_store %arg5[%c0_27, %c0_28, %c0_29], %88 {strides = array<i32>} : memref<1x8x128xf32, #tpu.memory_space<vmem>>, vector<1x8x128xf32>,
    return
  }
  func.func @transform_0(%arg0: i32) -> (i32, i32, i32) {
    %c0_i32 = arith.constant 0 : i32
    %c0_i32_0 = arith.constant 0 : i32
    %c0_i32_1 = arith.constant 0 : i32
    return %arg0, %c0_i32, %c0_i32_0 : i32, i32, i32
  }
  func.func @transform_1(%arg0: i32) -> (i32, i32, i32) {
    %c0_i32 = arith.constant 0 : i32
    %c0_i32_0 = arith.constant 0 : i32
    %c0_i32_1 = arith.constant 0 : i32
    return %arg0, %c0_i32, %c0_i32_0 : i32, i32, i32
  }
  func.func @transform_2(%arg0: i32) -> (i32, i32, i32) {
    %c0_i32 = arith.constant 0 : i32
    %c0_i32_0 = arith.constant 0 : i32
    %c0_i32_1 = arith.constant 0 : i32
    return %arg0, %c0_i32, %c0_i32_0 : i32, i32, i32
  }
  func.func @transform_3(%arg0: i32) -> (i32, i32, i32) {
    %c0_i32 = arith.constant 0 : i32
    %c0_i32_0 = arith.constant 0 : i32
    %c0_i32_1 = arith.constant 0 : i32
    return %arg0, %c0_i32, %c0_i32_0 : i32, i32, i32
  }
  func.func @transform_4(%arg0: i32) -> (i32, i32, i32) {
    %c0_i32 = arith.constant 0 : i32
    %c0_i32_0 = arith.constant 0 : i32
    %c0_i32_1 = arith.constant 0 : i32
    return %arg0, %c0_i32, %c0_i32_0 : i32, i32, i32
  }
}

module attributes {stable_mosaic.version = 11 : i64} {
  func.func @_matmul_kernel(%arg0: i32, %arg1: i32, %arg2: memref<8x128xf32, #tpu.memory_space<vmem>>, %arg3: memref<128x512xbf16, #tpu.memory_space<vmem>>, %arg4: memref<1x512xf32, #tpu.memory_space<vmem>>, %arg5: memref<8x512xf32, #tpu.memory_space<vmem>>) attributes {dimension_semantics = [#tpu.dimension_semantics<parallel>, #tpu.dimension_semantics<parallel>], iteration_bounds = array<i64: 2, 1>, scalar_prefetch = 0 : i64, scratch_operands = 0 : i64, tpu.core_type = #tpu.core_type<tc>, window_params = [{transform_indices = @transform_0, window_bounds = array<i64: 8, 128>}, {transform_indices = @transform_1, window_bounds = array<i64: 128, 512>}, {transform_indices = @transform_2, window_bounds = array<i64: 1, 512>}, {transform_indices = @transform_3, window_bounds = array<i64: 8, 512>}]} {
    %c0 = arith.constant 0 : index
    %c0_0 = arith.constant 0 : index
    %0 = vector.load %arg2[%c0, %c0_0] : memref<8x128xf32, #tpu.memory_space<vmem>>, vector<8x128xf32>
    %1 = arith.truncf %0 : vector<8x128xf32> to vector<8x128xbf16>
    %c0_1 = arith.constant 0 : index
    %c0_2 = arith.constant 0 : index
    %2 = vector.load %arg3[%c0_1, %c0_2] : memref<128x512xbf16, #tpu.memory_space<vmem>>, vector<128x512xbf16>
    %cst = arith.constant dense<0.000000e+00> : vector<8x512xf32>
    %3 = tpu.matmul %1, %2, %cst {dimension_numbers = #tpu.dot_dimension_numbers<[1], [0], [0], [1], [0, 0, 1, 1], [], []>} : vector<8x128xbf16>, vector<128x512xbf16>, vector<8x512xf32> -> vector<8x512xf32>
    %c0_3 = arith.constant 0 : index
    %c0_4 = arith.constant 0 : index
    %4 = vector.load %arg4[%c0_3, %c0_4] : memref<1x512xf32, #tpu.memory_space<vmem>>, vector<1x512xf32>
    %5 = vector.broadcast %4 : vector<1x512xf32> to vector<8x512xf32>
    %6 = arith.addf %3, %5 : vector<8x512xf32>
    %cst_5 = arith.constant 5.000000e-01 : f32
    %7 = vector.broadcast %cst_5 : f32 to vector<8x512xf32>
    %8 = arith.mulf %7, %6 : vector<8x512xf32>
    %cst_6 = arith.constant 0.707106769 : f32
    %9 = vector.broadcast %cst_6 : f32 to vector<8x512xf32>
    %10 = arith.mulf %6, %9 : vector<8x512xf32>
    %cst_7 = arith.constant 0.000000e+00 : f32
    %11 = vector.broadcast %cst_7 : f32 to vector<8x512xf32>
    %12 = arith.cmpf oge, %10, %11 : vector<8x512xf32>
    %cst_8 = arith.constant 1.000000e+00 : f32
    %cst_9 = arith.constant -1.000000e+00 : f32
    %13 = vector.broadcast %cst_8 : f32 to vector<8x512xf32>
    %14 = vector.broadcast %cst_9 : f32 to vector<8x512xf32>
    %15 = arith.select %12, %13, %14 : vector<8x512xi1>, vector<8x512xf32>
    %16 = math.absf %10 : vector<8x512xf32>
    %cst_10 = arith.constant 0.327591091 : f32
    %17 = vector.broadcast %cst_10 : f32 to vector<8x512xf32>
    %18 = arith.mulf %17, %16 : vector<8x512xf32>
    %cst_11 = arith.constant 1.000000e+00 : f32
    %19 = vector.broadcast %cst_11 : f32 to vector<8x512xf32>
    %20 = arith.addf %19, %18 : vector<8x512xf32>
    %cst_12 = arith.constant 1.000000e+00 : f32
    %21 = vector.broadcast %cst_12 : f32 to vector<8x512xf32>
    %22 = arith.divf %21, %20 : vector<8x512xf32>
    %cst_13 = arith.constant 1.06140542 : f32
    %23 = vector.broadcast %cst_13 : f32 to vector<8x512xf32>
    %24 = arith.mulf %23, %22 : vector<8x512xf32>
    %cst_14 = arith.constant -1.45315206 : f32
    %25 = vector.broadcast %cst_14 : f32 to vector<8x512xf32>
    %26 = arith.addf %24, %25 : vector<8x512xf32>
    %27 = arith.mulf %26, %22 : vector<8x512xf32>
    %cst_15 = arith.constant 1.42141378 : f32
    %28 = vector.broadcast %cst_15 : f32 to vector<8x512xf32>
    %29 = arith.addf %27, %28 : vector<8x512xf32>
    %30 = arith.mulf %29, %22 : vector<8x512xf32>
    %cst_16 = arith.constant -0.284496725 : f32
    %31 = vector.broadcast %cst_16 : f32 to vector<8x512xf32>
    %32 = arith.addf %30, %31 : vector<8x512xf32>
    %33 = arith.mulf %32, %22 : vector<8x512xf32>
    %cst_17 = arith.constant 0.254829586 : f32
    %34 = vector.broadcast %cst_17 : f32 to vector<8x512xf32>
    %35 = arith.addf %33, %34 : vector<8x512xf32>
    %36 = arith.mulf %35, %22 : vector<8x512xf32>
    %cst_18 = arith.constant 0.000000e+00 : f32
    %37 = vector.broadcast %cst_18 : f32 to vector<8x512xf32>
    %38 = arith.subf %37, %16 : vector<8x512xf32>
    %39 = arith.mulf %38, %16 : vector<8x512xf32>
    %40 = math.exp %39 : vector<8x512xf32>
    %41 = arith.mulf %36, %40 : vector<8x512xf32>
    %cst_19 = arith.constant 1.000000e+00 : f32
    %42 = vector.broadcast %cst_19 : f32 to vector<8x512xf32>
    %43 = arith.subf %42, %41 : vector<8x512xf32>
    %44 = arith.mulf %15, %43 : vector<8x512xf32>
    %cst_20 = arith.constant 1.000000e+00 : f32
    %45 = vector.broadcast %cst_20 : f32 to vector<8x512xf32>
    %46 = arith.addf %45, %44 : vector<8x512xf32>
    %47 = arith.mulf %8, %46 : vector<8x512xf32>
    %c0_21 = arith.constant 0 : index
    %c0_22 = arith.constant 0 : index
    %48 = vector.load %arg5[%c0_21, %c0_22] : memref<8x512xf32, #tpu.memory_space<vmem>>, vector<8x512xf32>
    tpu.vector_store %arg5[%c0_21, %c0_22], %47 {strides = array<i32>} : memref<8x512xf32, #tpu.memory_space<vmem>>, vector<8x512xf32>,
    return
  }
  func.func @transform_0(%arg0: i32, %arg1: i32) -> (i32, i32) {
    %c0_i32 = arith.constant 0 : i32
    %c0_i32_0 = arith.constant 0 : i32
    return %arg0, %c0_i32 : i32, i32
  }
  func.func @transform_1(%arg0: i32, %arg1: i32) -> (i32, i32) {
    %c0_i32 = arith.constant 0 : i32
    %c0_i32_0 = arith.constant 0 : i32
    return %c0_i32, %arg1 : i32, i32
  }
  func.func @transform_2(%arg0: i32, %arg1: i32) -> (i32, i32) {
    %c0_i32 = arith.constant 0 : i32
    %c0_i32_0 = arith.constant 0 : i32
    return %c0_i32, %arg1 : i32, i32
  }
  func.func @transform_3(%arg0: i32, %arg1: i32) -> (i32, i32) {
    %c0_i32 = arith.constant 0 : i32
    return %arg0, %arg1 : i32, i32
  }
}

module attributes {stable_mosaic.version = 11 : i64} {
  func.func @_matmul_add_ln_kernel(%arg0: i32, %arg1: memref<8x512xf32, #tpu.memory_space<vmem>>, %arg2: memref<512x128xbf16, #tpu.memory_space<vmem>>, %arg3: memref<1x128xf32, #tpu.memory_space<vmem>>, %arg4: memref<8x128xf32, #tpu.memory_space<vmem>>, %arg5: memref<1x128xf32, #tpu.memory_space<vmem>>, %arg6: memref<1x128xf32, #tpu.memory_space<vmem>>, %arg7: memref<8x128xf32, #tpu.memory_space<vmem>>) attributes {dimension_semantics = [#tpu.dimension_semantics<parallel>], iteration_bounds = array<i64: 2>, scalar_prefetch = 0 : i64, scratch_operands = 0 : i64, tpu.core_type = #tpu.core_type<tc>, window_params = [{transform_indices = @transform_0, window_bounds = array<i64: 8, 512>}, {pipeline_mode = #tpu.pipeline_mode<synchronous>, transform_indices = @transform_1, window_bounds = array<i64: 512, 128>}, {pipeline_mode = #tpu.pipeline_mode<synchronous>, transform_indices = @transform_2, window_bounds = array<i64: 1, 128>}, {transform_indices = @transform_3, window_bounds = array<i64: 8, 128>}, {pipeline_mode = #tpu.pipeline_mode<synchronous>, transform_indices = @transform_4, window_bounds = array<i64: 1, 128>}, {pipeline_mode = #tpu.pipeline_mode<synchronous>, transform_indices = @transform_5, window_bounds = array<i64: 1, 128>}, {transform_indices = @transform_6, window_bounds = array<i64: 8, 128>}]} {
    %c0 = arith.constant 0 : index
    %c0_0 = arith.constant 0 : index
    %0 = vector.load %arg1[%c0, %c0_0] : memref<8x512xf32, #tpu.memory_space<vmem>>, vector<8x512xf32>
    %1 = arith.truncf %0 : vector<8x512xf32> to vector<8x512xbf16>
    %c0_1 = arith.constant 0 : index
    %c0_2 = arith.constant 0 : index
    %2 = vector.load %arg2[%c0_1, %c0_2] : memref<512x128xbf16, #tpu.memory_space<vmem>>, vector<512x128xbf16>
    %cst = arith.constant dense<0.000000e+00> : vector<8x128xf32>
    %3 = tpu.matmul %1, %2, %cst {dimension_numbers = #tpu.dot_dimension_numbers<[1], [0], [0], [1], [0, 0, 1, 1], [], []>} : vector<8x512xbf16>, vector<512x128xbf16>, vector<8x128xf32> -> vector<8x128xf32>
    %c0_3 = arith.constant 0 : index
    %c0_4 = arith.constant 0 : index
    %4 = vector.load %arg3[%c0_3, %c0_4] : memref<1x128xf32, #tpu.memory_space<vmem>>, vector<1x128xf32>
    %5 = vector.broadcast %4 : vector<1x128xf32> to vector<8x128xf32>
    %6 = arith.addf %3, %5 : vector<8x128xf32>
    %c0_5 = arith.constant 0 : index
    %c0_6 = arith.constant 0 : index
    %7 = vector.load %arg4[%c0_5, %c0_6] : memref<8x128xf32, #tpu.memory_space<vmem>>, vector<8x128xf32>
    %8 = arith.addf %6, %7 : vector<8x128xf32>
    %cst_7 = arith.constant dense<0.000000e+00> : vector<8xf32>
    %9 = vector.multi_reduction <add>, %8, %cst_7 [1] : vector<8x128xf32> to vector<8xf32>
    %10 = vector.shape_cast %9 : vector<8xf32> to vector<8x1xf32>
    %cst_8 = arith.constant 1.280000e+02 : f32
    %11 = vector.broadcast %cst_8 : f32 to vector<8x1xf32>
    %12 = arith.divf %10, %11 : vector<8x1xf32>
    %13 = vector.broadcast %12 : vector<8x1xf32> to vector<8x128xf32>
    %14 = arith.subf %8, %13 : vector<8x128xf32>
    %15 = arith.mulf %14, %14 : vector<8x128xf32>
    %cst_9 = arith.constant dense<0.000000e+00> : vector<8xf32>
    %16 = vector.multi_reduction <add>, %15, %cst_9 [1] : vector<8x128xf32> to vector<8xf32>
    %17 = vector.shape_cast %16 : vector<8xf32> to vector<8x1xf32>
    %cst_10 = arith.constant 1.280000e+02 : f32
    %18 = vector.broadcast %cst_10 : f32 to vector<8x1xf32>
    %19 = arith.divf %17, %18 : vector<8x1xf32>
    %cst_11 = arith.constant 9.99999974E-6 : f32
    %20 = vector.broadcast %cst_11 : f32 to vector<8x1xf32>
    %21 = arith.addf %19, %20 : vector<8x1xf32>
    %22 = math.rsqrt %21 : vector<8x1xf32>
    %23 = vector.broadcast %22 : vector<8x1xf32> to vector<8x128xf32>
    %24 = arith.mulf %14, %23 : vector<8x128xf32>
    %c0_12 = arith.constant 0 : index
    %c0_13 = arith.constant 0 : index
    %25 = vector.load %arg5[%c0_12, %c0_13] : memref<1x128xf32, #tpu.memory_space<vmem>>, vector<1x128xf32>
    %26 = vector.broadcast %25 : vector<1x128xf32> to vector<8x128xf32>
    %27 = arith.mulf %24, %26 : vector<8x128xf32>
    %c0_14 = arith.constant 0 : index
    %c0_15 = arith.constant 0 : index
    %28 = vector.load %arg6[%c0_14, %c0_15] : memref<1x128xf32, #tpu.memory_space<vmem>>, vector<1x128xf32>
    %29 = vector.broadcast %28 : vector<1x128xf32> to vector<8x128xf32>
    %30 = arith.addf %27, %29 : vector<8x128xf32>
    %c0_16 = arith.constant 0 : index
    %c0_17 = arith.constant 0 : index
    %31 = vector.load %arg7[%c0_16, %c0_17] : memref<8x128xf32, #tpu.memory_space<vmem>>, vector<8x128xf32>
    tpu.vector_store %arg7[%c0_16, %c0_17], %30 {strides = array<i32>} : memref<8x128xf32, #tpu.memory_space<vmem>>, vector<8x128xf32>,
    return
  }
  func.func @transform_0(%arg0: i32) -> (i32, i32) {
    %c0_i32 = arith.constant 0 : i32
    %c0_i32_0 = arith.constant 0 : i32
    return %arg0, %c0_i32 : i32, i32
  }
  func.func @transform_1(%arg0: i32) -> (i32, i32) {
    %c0_i32 = arith.constant 0 : i32
    %c0_i32_0 = arith.constant 0 : i32
    %c0_i32_1 = arith.constant 0 : i32
    return %c0_i32, %c0_i32_0 : i32, i32
  }
  func.func @transform_2(%arg0: i32) -> (i32, i32) {
    %c0_i32 = arith.constant 0 : i32
    %c0_i32_0 = arith.constant 0 : i32
    %c0_i32_1 = arith.constant 0 : i32
    return %c0_i32, %c0_i32_0 : i32, i32
  }
  func.func @transform_3(%arg0: i32) -> (i32, i32) {
    %c0_i32 = arith.constant 0 : i32
    %c0_i32_0 = arith.constant 0 : i32
    return %arg0, %c0_i32 : i32, i32
  }
  func.func @transform_4(%arg0: i32) -> (i32, i32) {
    %c0_i32 = arith.constant 0 : i32
    %c0_i32_0 = arith.constant 0 : i32
    %c0_i32_1 = arith.constant 0 : i32
    return %c0_i32, %c0_i32_0 : i32, i32
  }
  func.func @transform_5(%arg0: i32) -> (i32, i32) {
    %c0_i32 = arith.constant 0 : i32
    %c0_i32_0 = arith.constant 0 : i32
    %c0_i32_1 = arith.constant 0 : i32
    return %c0_i32, %c0_i32_0 : i32, i32
  }
  func.func @transform_6(%arg0: i32) -> (i32, i32) {
    %c0_i32 = arith.constant 0 : i32
    %c0_i32_0 = arith.constant 0 : i32
    return %arg0, %c0_i32 : i32, i32
  }
}

module attributes {stable_mosaic.version = 11 : i64} {
  func.func @_ln_kernel(%arg0: i32, %arg1: memref<8x128xf32, #tpu.memory_space<vmem>>, %arg2: memref<1x128xf32, #tpu.memory_space<vmem>>, %arg3: memref<1x128xf32, #tpu.memory_space<vmem>>, %arg4: memref<8x128xf32, #tpu.memory_space<vmem>>) attributes {dimension_semantics = [#tpu.dimension_semantics<parallel>], iteration_bounds = array<i64: 2>, scalar_prefetch = 0 : i64, scratch_operands = 0 : i64, tpu.core_type = #tpu.core_type<tc>, window_params = [{transform_indices = @transform_0, window_bounds = array<i64: 8, 128>}, {pipeline_mode = #tpu.pipeline_mode<synchronous>, transform_indices = @transform_1, window_bounds = array<i64: 1, 128>}, {pipeline_mode = #tpu.pipeline_mode<synchronous>, transform_indices = @transform_2, window_bounds = array<i64: 1, 128>}, {transform_indices = @transform_3, window_bounds = array<i64: 8, 128>}]} {
    %c0 = arith.constant 0 : index
    %c0_0 = arith.constant 0 : index
    %0 = vector.load %arg1[%c0, %c0_0] : memref<8x128xf32, #tpu.memory_space<vmem>>, vector<8x128xf32>
    %cst = arith.constant dense<0.000000e+00> : vector<8xf32>
    %1 = vector.multi_reduction <add>, %0, %cst [1] : vector<8x128xf32> to vector<8xf32>
    %2 = vector.shape_cast %1 : vector<8xf32> to vector<8x1xf32>
    %cst_1 = arith.constant 1.280000e+02 : f32
    %3 = vector.broadcast %cst_1 : f32 to vector<8x1xf32>
    %4 = arith.divf %2, %3 : vector<8x1xf32>
    %5 = vector.broadcast %4 : vector<8x1xf32> to vector<8x128xf32>
    %6 = arith.subf %0, %5 : vector<8x128xf32>
    %7 = arith.mulf %6, %6 : vector<8x128xf32>
    %cst_2 = arith.constant dense<0.000000e+00> : vector<8xf32>
    %8 = vector.multi_reduction <add>, %7, %cst_2 [1] : vector<8x128xf32> to vector<8xf32>
    %9 = vector.shape_cast %8 : vector<8xf32> to vector<8x1xf32>
    %cst_3 = arith.constant 1.280000e+02 : f32
    %10 = vector.broadcast %cst_3 : f32 to vector<8x1xf32>
    %11 = arith.divf %9, %10 : vector<8x1xf32>
    %cst_4 = arith.constant 9.99999997E-7 : f32
    %12 = vector.broadcast %cst_4 : f32 to vector<8x1xf32>
    %13 = arith.addf %11, %12 : vector<8x1xf32>
    %14 = math.rsqrt %13 : vector<8x1xf32>
    %15 = vector.broadcast %14 : vector<8x1xf32> to vector<8x128xf32>
    %16 = arith.mulf %6, %15 : vector<8x128xf32>
    %c0_5 = arith.constant 0 : index
    %c0_6 = arith.constant 0 : index
    %17 = vector.load %arg2[%c0_5, %c0_6] : memref<1x128xf32, #tpu.memory_space<vmem>>, vector<1x128xf32>
    %18 = vector.broadcast %17 : vector<1x128xf32> to vector<8x128xf32>
    %19 = arith.mulf %16, %18 : vector<8x128xf32>
    %c0_7 = arith.constant 0 : index
    %c0_8 = arith.constant 0 : index
    %20 = vector.load %arg3[%c0_7, %c0_8] : memref<1x128xf32, #tpu.memory_space<vmem>>, vector<1x128xf32>
    %21 = vector.broadcast %20 : vector<1x128xf32> to vector<8x128xf32>
    %22 = arith.addf %19, %21 : vector<8x128xf32>
    %c0_9 = arith.constant 0 : index
    %c0_10 = arith.constant 0 : index
    %23 = vector.load %arg4[%c0_9, %c0_10] : memref<8x128xf32, #tpu.memory_space<vmem>>, vector<8x128xf32>
    tpu.vector_store %arg4[%c0_9, %c0_10], %22 {strides = array<i32>} : memref<8x128xf32, #tpu.memory_space<vmem>>, vector<8x128xf32>,
    return
  }
  func.func @transform_0(%arg0: i32) -> (i32, i32) {
    %c0_i32 = arith.constant 0 : i32
    %c0_i32_0 = arith.constant 0 : i32
    return %arg0, %c0_i32 : i32, i32
  }
  func.func @transform_1(%arg0: i32) -> (i32, i32) {
    %c0_i32 = arith.constant 0 : i32
    %c0_i32_0 = arith.constant 0 : i32
    %c0_i32_1 = arith.constant 0 : i32
    return %c0_i32, %c0_i32_0 : i32, i32
  }
  func.func @transform_2(%arg0: i32) -> (i32, i32) {
    %c0_i32 = arith.constant 0 : i32
    %c0_i32_0 = arith.constant 0 : i32
    %c0_i32_1 = arith.constant 0 : i32
    return %c0_i32, %c0_i32_0 : i32, i32
  }
  func.func @transform_3(%arg0: i32) -> (i32, i32) {
    %c0_i32 = arith.constant 0 : i32
    %c0_i32_0 = arith.constant 0 : i32
    return %arg0, %c0_i32 : i32, i32
  }
}

module attributes {stable_mosaic.version = 11 : i64} {
  func.func @_matmul_kernel(%arg0: i32, %arg1: i32, %arg2: memref<8x128xf32, #tpu.memory_space<vmem>>, %arg3: memref<128x256xbf16, #tpu.memory_space<vmem>>, %arg4: memref<1x256xf32, #tpu.memory_space<vmem>>, %arg5: memref<8x256xf32, #tpu.memory_space<vmem>>) attributes {dimension_semantics = [#tpu.dimension_semantics<parallel>, #tpu.dimension_semantics<parallel>], iteration_bounds = array<i64: 2, 1>, scalar_prefetch = 0 : i64, scratch_operands = 0 : i64, tpu.core_type = #tpu.core_type<tc>, window_params = [{transform_indices = @transform_0, window_bounds = array<i64: 8, 128>}, {transform_indices = @transform_1, window_bounds = array<i64: 128, 256>}, {transform_indices = @transform_2, window_bounds = array<i64: 1, 256>}, {transform_indices = @transform_3, window_bounds = array<i64: 8, 256>}]} {
    %c0 = arith.constant 0 : index
    %c0_0 = arith.constant 0 : index
    %0 = vector.load %arg2[%c0, %c0_0] : memref<8x128xf32, #tpu.memory_space<vmem>>, vector<8x128xf32>
    %1 = arith.truncf %0 : vector<8x128xf32> to vector<8x128xbf16>
    %c0_1 = arith.constant 0 : index
    %c0_2 = arith.constant 0 : index
    %2 = vector.load %arg3[%c0_1, %c0_2] : memref<128x256xbf16, #tpu.memory_space<vmem>>, vector<128x256xbf16>
    %cst = arith.constant dense<0.000000e+00> : vector<8x256xf32>
    %3 = tpu.matmul %1, %2, %cst {dimension_numbers = #tpu.dot_dimension_numbers<[1], [0], [0], [1], [0, 0, 1, 1], [], []>} : vector<8x128xbf16>, vector<128x256xbf16>, vector<8x256xf32> -> vector<8x256xf32>
    %c0_3 = arith.constant 0 : index
    %c0_4 = arith.constant 0 : index
    %4 = vector.load %arg4[%c0_3, %c0_4] : memref<1x256xf32, #tpu.memory_space<vmem>>, vector<1x256xf32>
    %5 = vector.broadcast %4 : vector<1x256xf32> to vector<8x256xf32>
    %6 = arith.addf %3, %5 : vector<8x256xf32>
    %c0_5 = arith.constant 0 : index
    %c0_6 = arith.constant 0 : index
    %7 = vector.load %arg5[%c0_5, %c0_6] : memref<8x256xf32, #tpu.memory_space<vmem>>, vector<8x256xf32>
    tpu.vector_store %arg5[%c0_5, %c0_6], %6 {strides = array<i32>} : memref<8x256xf32, #tpu.memory_space<vmem>>, vector<8x256xf32>,
    return
  }
  func.func @transform_0(%arg0: i32, %arg1: i32) -> (i32, i32) {
    %c0_i32 = arith.constant 0 : i32
    %c0_i32_0 = arith.constant 0 : i32
    return %arg0, %c0_i32 : i32, i32
  }
  func.func @transform_1(%arg0: i32, %arg1: i32) -> (i32, i32) {
    %c0_i32 = arith.constant 0 : i32
    %c0_i32_0 = arith.constant 0 : i32
    return %c0_i32, %arg1 : i32, i32
  }
  func.func @transform_2(%arg0: i32, %arg1: i32) -> (i32, i32) {
    %c0_i32 = arith.constant 0 : i32
    %c0_i32_0 = arith.constant 0 : i32
    return %c0_i32, %arg1 : i32, i32
  }
  func.func @transform_3(%arg0: i32, %arg1: i32) -> (i32, i32) {
    %c0_i32 = arith.constant 0 : i32
    return %arg0, %arg1 : i32, i32
  }
}

</mosaic_0001>

<bundles_post_ra>
// kernel: forward.25
= control target key start
LH: loop header
LB: loop body
LE: loop exit
PB: predicated region body
PF: predicated region fallthrough
CT: control target
= control target key end

     0   :  { %s520_s12 = smov 0   ;;  %s522_s13 = smov 0   ;;  %s580_s0 = inlined_call_operand.vmem [shape: f32[16,128], index: 0, kind: input, shape index: {}]   ;;  %s581_s1 = inlined_call_operand.vmem [shape: bf16[128,128], index: 1, kind: input, shape index: {}]   ;;  %s582_s2 = inlined_call_operand.vmem [shape: f32[1,128], index: 2, kind: input, shape index: {}]   ;;  %s583_s3 = inlined_call_operand.vmem [shape: f32[16,128], index: 3, kind: output, shape index: {}]  }
   0x1   :  { %s524_s14 = smov 0  }
   0x2 LB: > { %s25_s15 = sadd.s32 1, %s494_s13  ;;  %p406_p0 = scmp.ge.s32.totalorder %s498_s14, 1  ;;  %s498_s14 = sphi %s524_s14, %s13_s14   ;;  %s494_s13 = sphi %s522_s13, %s585_s13   ;;  %s490_s12 = sphi %s520_s12, %s584_s12  }
   0x3   : > { %p27_p1 = scmp.ge.s32.totalorder %s25_s15, 2  ;;  %p167_p2 = scmp.lt.s32.totalorder %s498_s14, 3 }
   0x5   : > { %s587_s15 = smov (%p27_p1, %s25_s15), 0  ;;  %p168_p3 = pnand %p406_p0, %p167_p2 }
   0x6   : > { %p199_p4 = scmp.lt.s32.totalorder (!%p168_p3), %s490_s12, 1 }
   0x7   : > { %171 = sbr.rel (%p168_p3) target bundleno = 178 (0xb2), region = 32 }
   0xc   : > { %v450_v0 = vld [vmem:[%s581_s1 + $0x38] sm:$0xff]  ;;  %v449_v1 = vld [vmem:[%s581_s1 + $0x30] sm:$0xff]  ;;  %v448_v2 = vld [vmem:[%s581_s1 + $0x28] sm:$0xff]  ;;  %s589_s12 = smov (!%p199_p4, %s490_s12), 1 }
   0xd   : > { %287 = vmatpush.bf16.msra.mxu0 %v450_v0  ;;  %v447_v3 = vld [vmem:[%s581_s1 + $0x20] sm:$0xff]  ;;  %v446_v4 = vld [vmem:[%s581_s1 + $0x18] sm:$0xff]  ;;  %v445_v5 = vld [vmem:[%s581_s1 + $0x10] sm:$0xff]  ;;  %s407_s28 = sshll.u32 %s589_s12, 3 }
   0xe   : > { %v444_v6 = vld [vmem:[%s581_s1 + $0x8] sm:$0xff]  ;;  %s202_s6 = scalar_lea.vmem %s580_s0, %s407_s28  ;;  %v443_v7 = vld [vmem:[%s581_s1] sm:$0xff]  ;;  %s216_s16 = scalar_lea.vmem %s583_s3, %s407_s28 }
   0xf   : > { %v217_v8 = vld [vmem:[%s202_s6] sm:$0xff] }
  0x10   : > { %v218_v9 = vpack.c.bf16 %v217_v8, %v217_v8  ;;  %v475_v10 = vld [vmem:[%s582_s2] ss:$0 sm:$0xff] }
  0x11   : > { %288 = vmatpush.bf16.msra.mxu0 %v449_v1 }
  0x15   : > { %289 = vmatpush.bf16.msra.mxu0 %v448_v2 }
  0x19   : > { %290 = vmatpush.bf16.msra.mxu0 %v447_v3 }
  0x1d   : > { %291 = vmatpush.bf16.msra.mxu0 %v446_v4 }
  0x21   : > { %292 = vmatpush.bf16.msra.mxu0 %v445_v5 }
  0x25   : > { %293 = vmatpush.bf16.msra.mxu0 %v444_v6 }
  0x29   : > { %294 = vmatpush.bf16.msra.mxu0 %v443_v7 }
  0x2c   : > { %295 = vmatmul.bf16.vlgmr.msra.gmra.mxu0 %v218_v9 }
  0xa9   : > { %v296_v11 = vpop.f32.mrf.mxu0 }
  0xaa   : > { %v297_v12 = vadd.f32 %v475_v10, %v296_v11 }
  0xac   : > { %300 = vst [vmem:[%s216_s16] sm:$0xff] %v297_v12 }
  0xb1   : > { %v298_v13 = vpop.f32.mrf.mxu0 }
  0xb2 PF: > { %s13_s14 = sadd.s32 1, %s498_s14   ;;  %s584_s12 = smov %s494_s13 }
  0xb3   : > { %p10_p5 = scmp.ge.s32.totalorder %s13_s14, 4   ;;  %s585_s13 = smov %s587_s15 }
  0xb5   :  { %12 = sbr.rel (!%p10_p5) target bundleno = 2 (0x2), region = 68 }

// kernel: forward.22
= control target key start
LH: loop header
LB: loop body
LE: loop exit
PB: predicated region body
PF: predicated region fallthrough
CT: control target
= control target key end

     0   :  { %s752_s12 = smov 0   ;;  %s754_s13 = smov 0   ;;  %s940_s0 = inlined_call_operand.vmem [shape: f32[16,128], index: 0, kind: input, shape index: {}]   ;;  %s941_s1 = inlined_call_operand.vmem [shape: bf16[128,384], index: 1, kind: input, shape index: {}]   ;;  %s942_s2 = inlined_call_operand.vmem [shape: f32[1,384], index: 2, kind: input, shape index: {}]   ;;  %s943_s3 = inlined_call_operand.vmem [shape: f32[16,384], index: 3, kind: output, shape index: {}]  }
   0x1   :  { %s756_s14 = smov 0  }
   0x2 LB: > { %s25_s15 = sadd.s32 1, %s726_s13  ;;  %p558_p0 = scmp.ge.s32.totalorder %s730_s14, 1  ;;  %s730_s14 = sphi %s756_s14, %s13_s14   ;;  %s726_s13 = sphi %s754_s13, %s945_s13   ;;  %s722_s12 = sphi %s752_s12, %s944_s12  }
   0x3   : > { %p27_p1 = scmp.ge.s32.totalorder %s25_s15, 2  ;;  %p171_p2 = scmp.lt.s32.totalorder %s730_s14, 3 }
   0x5   : > { %s947_s15 = smov (%p27_p1, %s25_s15), 0  ;;  %p172_p3 = pnand %p558_p0, %p171_p2 }
   0x6   : > { %p207_p4 = scmp.lt.s32.totalorder (!%p172_p3), %s722_s12, 1 }
   0x7   : > { %175 = sbr.rel (%p172_p3) target bundleno = 187 (0xbb), region = 32 }
   0xc   : > { %v647_v0 = vld [vmem:[%s941_s1 + $0xa8] sm:$0xf]  ;;  %v681_v1 = vld [vmem:[%s941_s1 + $0xb0] sm:$0xf0]  ;;  %v680_v2 = vld [vmem:[%s941_s1 + $0xac] sm:$0xf] }
   0xd   : > { %v648_v3 = vor.u32 %v681_v1, %v647_v0  ;;  %v649_v4 = vld [vmem:[%s941_s1 + $0xb4] sm:$0xf0]  ;;  %v655_v5 = vld [vmem:[%s941_s1 + $0xb0] sm:$0xf]  ;;  %v682_v6 = vld [vmem:[%s941_s1 + $0xb8] sm:$0xf0] }
   0xe   : > { %v652_v7 = vor.u32 %v680_v2, %v649_v4  ;;  %v656_v8 = vor.u32 %v682_v6, %v655_v5  ;;  %v635_v9 = vld [vmem:[%s941_s1 + $0x90] sm:$0xf]  ;;  %v678_v10 = vld [vmem:[%s941_s1 + $0x98] sm:$0xf0]  ;;  %v677_v11 = vld [vmem:[%s941_s1 + $0x94] sm:$0xf] }
   0xf   : > { %402 = vmatpush.bf16.msra.mxu0 %v648_v3  ;;  %v636_v12 = vor.u32 %v678_v10, %v635_v9  ;;  %v637_v13 = vld [vmem:[%s941_s1 + $0x9c] sm:$0xf0]  ;;  %v643_v14 = vld [vmem:[%s941_s1 + $0x98] sm:$0xf]  ;;  %v679_v15 = vld [vmem:[%s941_s1 + $0xa0] sm:$0xf0] }
  0x10   : > { %415 = vmatpush.bf16.msra.mxu1 %v652_v7  ;;  %428 = vmatpush.bf16.msra.mxu2 %v656_v8  ;;  %v640_v16 = vor.u32 %v677_v11, %v637_v13  ;;  %v644_v17 = vor.u32 %v679_v15, %v643_v14  ;;  %v623_v18 = vld [vmem:[%s941_s1 + $0x78] sm:$0xf]  ;;  %v675_v19 = vld [vmem:[%s941_s1 + $0x80] sm:$0xf0]  ;;  %v674_v20 = vld [vmem:[%s941_s1 + $0x7c] sm:$0xf] }
  0x11   : > { %v625_v21 = vld [vmem:[%s941_s1 + $0x84] sm:$0xf0]  ;;  %v631_v22 = vld [vmem:[%s941_s1 + $0x80] sm:$0xf]  ;;  %v676_v23 = vld [vmem:[%s941_s1 + $0x88] sm:$0xf0]  ;;  %v624_v24 = vor.u32 %v675_v19, %v623_v18 }
  0x12   : > { %v628_v25 = vor.u32 %v674_v20, %v625_v21  ;;  %v632_v26 = vor.u32 %v676_v23, %v631_v22  ;;  %v611_v27 = vld [vmem:[%s941_s1 + $0x60] sm:$0xf]  ;;  %v672_v28 = vld [vmem:[%s941_s1 + $0x68] sm:$0xf0]  ;;  %v671_v29 = vld [vmem:[%s941_s1 + $0x64] sm:$0xf] }
  0x13   : > { %403 = vmatpush.bf16.msra.mxu0 %v636_v12  ;;  %v613_v30 = vld [vmem:[%s941_s1 + $0x6c] sm:$0xf0]  ;;  %v619_v31 = vld [vmem:[%s941_s1 + $0x68] sm:$0xf]  ;;  %v673_v32 = vld [vmem:[%s941_s1 + $0x70] sm:$0xf0]  ;;  %v612_v33 = vor.u32 %v672_v28, %v611_v27 }
  0x14   : > { %416 = vmatpush.bf16.msra.mxu1 %v640_v16  ;;  %429 = vmatpush.bf16.msra.mxu2 %v644_v17  ;;  %v616_v34 = vor.u32 %v671_v29, %v613_v30  ;;  %v620_v35 = vor.u32 %v673_v32, %v619_v31  ;;  %v599_v36 = vld [vmem:[%s941_s1 + $0x48] sm:$0xf]  ;;  %v669_v37 = vld [vmem:[%s941_s1 + $0x50] sm:$0xf0]  ;;  %v668_v38 = vld [vmem:[%s941_s1 + $0x4c] sm:$0xf] }
  0x15   : > { %v601_v39 = vld [vmem:[%s941_s1 + $0x54] sm:$0xf0]  ;;  %v607_v40 = vld [vmem:[%s941_s1 + $0x50] sm:$0xf]  ;;  %v670_v41 = vld [vmem:[%s941_s1 + $0x58] sm:$0xf0]  ;;  %v600_v42 = vor.u32 %v669_v37, %v599_v36 }
  0x16   : > { %v587_v43 = vld [vmem:[%s941_s1 + $0x30] sm:$0xf]  ;;  %v604_v44 = vor.u32 %v668_v38, %v601_v39  ;;  %v608_v45 = vor.u32 %v670_v41, %v607_v40  ;;  %v666_v46 = vld [vmem:[%s941_s1 + $0x38] sm:$0xf0]  ;;  %v665_v47 = vld [vmem:[%s941_s1 + $0x34] sm:$0xf] }
  0x17   : > { %404 = vmatpush.bf16.msra.mxu0 %v624_v24  ;;  %v589_v48 = vld [vmem:[%s941_s1 + $0x3c] sm:$0xf0]  ;;  %v595_v49 = vld [vmem:[%s941_s1 + $0x38] sm:$0xf]  ;;  %v667_v50 = vld [vmem:[%s941_s1 + $0x40] sm:$0xf0]  ;;  %v588_v51 = vor.u32 %v666_v46, %v587_v43 }
  0x18   : > { %417 = vmatpush.bf16.msra.mxu1 %v628_v25  ;;  %430 = vmatpush.bf16.msra.mxu2 %v632_v26  ;;  %s949_s12 = smov (!%p207_p4, %s722_s12), 1  ;;  %v575_v52 = vld [vmem:[%s941_s1 + $0x18] sm:$0xf]  ;;  %v592_v53 = vor.u32 %v665_v47, %v589_v48  ;;  %v596_v54 = vor.u32 %v667_v50, %v595_v49  ;;  %v663_v55 = vld [vmem:[%s941_s1 + $0x20] sm:$0xf0] }
  0x19   : > { %v662_v56 = vld [vmem:[%s941_s1 + $0x1c] sm:$0xf]  ;;  %v577_v57 = vld [vmem:[%s941_s1 + $0x24] sm:$0xf0]  ;;  %v583_v58 = vld [vmem:[%s941_s1 + $0x20] sm:$0xf]  ;;  %v576_v60 = vor.u32 %v663_v55, %v575_v52 }
  0x1a   : > { %v664_v59 = vld [vmem:[%s941_s1 + $0x28] sm:$0xf0]  ;;  %s559_s4 = sshll.u32 %s949_s12, 3  ;;  %v580_v61 = vor.u32 %v662_v56, %v577_v57  ;;  %v563_v63 = vld [vmem:[%s941_s1] sm:$0xf]  ;;  %s683_s26 = smul.u32 24, %s949_s12 }
  0x1b   : > { %405 = vmatpush.bf16.msra.mxu0 %v612_v33  ;;  %v584_v62 = vor.u32 %v664_v59, %v583_v58  ;;  %v660_v0 = vld [vmem:[%s941_s1 + $0x8] sm:$0xf0]  ;;  %v659_v1 = vld [vmem:[%s941_s1 + $0x4] sm:$0xf]  ;;  %s210_s17 = scalar_lea.vmem %s940_s0, %s559_s4  ;;  %v565_v2 = vld [vmem:[%s941_s1 + $0xc] sm:$0xf0] }
  0x1c   : > { %418 = vmatpush.bf16.msra.mxu1 %v616_v34  ;;  %431 = vmatpush.bf16.msra.mxu2 %v620_v35  ;;  %v571_v3 = vld [vmem:[%s941_s1 + $0x8] sm:$0xf]  ;;  %v661_v4 = vld [vmem:[%s941_s1 + $0x10] sm:$0xf0]  ;;  %v564_v5 = vor.u32 %v660_v0, %v563_v63  ;;  %v232_v6 = vld [vmem:[%s210_s17] sm:$0xff]  ;;  %v568_v7 = vor.u32 %v659_v1, %v565_v2  ;;  %s230_s29 = scalar_lea.vmem %s943_s3, %s683_s26 }
  0x1d   : > { %v572_v8 = vor.u32 %v661_v4, %v571_v3  ;;  %v233_v9 = vpack.c.bf16 %v232_v6, %v232_v6  ;;  %v266_v10 = vld [vmem:[%s942_s2] sm:$0x7] }
  0x1e   : > { %v268_v11 = vperm.slane %v266_v10, 0  ;;  %v269_v12 = vperm.slane %v266_v10, 1  ;;  %v270_v17 = vperm.slane %v266_v10, 2 }
  0x1f   : > { %406 = vmatpush.bf16.msra.mxu0 %v600_v42 }
  0x20   : > { %419 = vmatpush.bf16.msra.mxu1 %v604_v44  ;;  %432 = vmatpush.bf16.msra.mxu2 %v608_v45 }
  0x23   : > { %407 = vmatpush.bf16.msra.mxu0 %v588_v51 }
  0x24   : > { %420 = vmatpush.bf16.msra.mxu1 %v592_v53  ;;  %433 = vmatpush.bf16.msra.mxu2 %v596_v54 }
  0x27   : > { %408 = vmatpush.bf16.msra.mxu0 %v576_v60 }
  0x28   : > { %421 = vmatpush.bf16.msra.mxu1 %v580_v61  ;;  %434 = vmatpush.bf16.msra.mxu2 %v584_v62 }
  0x2b   : > { %409 = vmatpush.bf16.msra.mxu0 %v564_v5 }
  0x2c   : > { %422 = vmatpush.bf16.msra.mxu1 %v568_v7  ;;  %435 = vmatpush.bf16.msra.mxu2 %v572_v8 }
  0x2e   : > { %410 = vmatmul.bf16.vlgmr.msra.gmra.mxu0 %v233_v9 }
  0x2f   : > { %423 = vmatmul.bf16.vlgmr.msra.gmra.mxu1 %v233_v9  ;;  %436 = vmatmul.bf16.vlgmr.msra.gmra.mxu2 %v233_v9 }
  0xab   : > { %v411_v13 = vpop.f32.mrf.mxu0 }
  0xac   : > { %v412_v14 = vadd.f32 %v411_v13, %v268_v11  ;;  %v424_v15 = vpop.f32.mrf.mxu1 }
  0xad   : > { %v425_v16 = vadd.f32 %v424_v15, %v269_v12 }
  0xae   : > { %441 = vst [vmem:[%s230_s29] sm:$0xff] %v412_v14 }
  0xaf   : > { %442 = vst [vmem:[%s230_s29 + $0x8] sm:$0xff] %v425_v16 }
  0xb2   : > { %v437_v18 = vpop.f32.mrf.mxu2 }
  0xb3   : > { %v438_v19 = vadd.f32 %v437_v18, %v270_v17  ;;  %v413_v20 = vpop.f32.mrf.mxu0 }
  0xb4   : > { %v426_v21 = vpop.f32.mrf.mxu1 }
  0xb5   : > { %443 = vst [vmem:[%s230_s29 + $0x10] sm:$0xff] %v438_v19 }
  0xba   : > { %v439_v22 = vpop.f32.mrf.mxu2 }
  0xbb PF: > { %s13_s14 = sadd.s32 1, %s730_s14   ;;  %s944_s12 = smov %s726_s13 }
  0xbc   : > { %p10_p5 = scmp.ge.s32.totalorder %s13_s14, 4   ;;  %s945_s13 = smov %s947_s15 }
  0xbe   :  { %12 = sbr.rel (!%p10_p5) target bundleno = 2 (0x2), region = 68 }

// kernel: forward.23
= control target key start
LH: loop header
LB: loop body
LE: loop exit
PB: predicated region body
PF: predicated region fallthrough
CT: control target
= control target key end

     0   :  { %s618_s12 = smov 0   ;;  %s687_s0 = inlined_call_operand.vmem [shape: f32[2,8,128], index: 0, kind: input, shape index: {}]   ;;  %s688_s1 = inlined_call_operand.vmem [shape: f32[2,8,128], index: 1, kind: input, shape index: {}]   ;;  %s689_s2 = inlined_call_operand.vmem [shape: f32[2,8,128], index: 2, kind: input, shape index: {}]   ;;  %s690_s3 = inlined_call_operand.vmem [shape: f32[2,8,128], index: 3, kind: output, shape index: {}]  }
   0x1 LB: > { %s539_s13 = sadd.s32 4294967295, %s592_s12   ;;  %p543_p0 = scmp.ge.s32.totalorder %s592_s12, 1  ;;  %s592_s12 = sphi %s618_s12, %s13_s12  }
   0x2   : > { %p154_p1 = scmp.lt.s32.totalorder %s592_s12, 3 }
   0x4   : > { %p155_p2 = pnand %p543_p0, %p154_p1 }
   0x5   : > { %p184_p3 = scmp.lt.s32.totalorder (!%p155_p2), %s539_s13, 1  ;;  %s594_s21 = smov (!%p155_p2), 32  }
   0x6   : > { %158 = sbr.rel (%p155_p2) target bundleno = 829 (0x33d), region = 32  ;;  %s595_s22 = smov (!%p155_p2), 96  }
   0x7   : > { %s596_s23 = smov (!%p155_p2), 64  }
   0xb   : > { %s692_s13 = smov (!%p184_p3, %s539_s13), 1  ;;  %vm214_vm0 = vcmask 261120   ;;  %v208_v10 = vlaneseq  ;;  %v597_v16 = vmov 0.0   ;;  %vm234_vm2 = vcmask 64512  }
   0xc   : > { %s626_s14 = sshll.u32 %s692_s13, 3  ;;  %vm248_vm3 = vcmask 1043456   ;;  %vm457_vm4 = vcmask 523264   ;;  %vm459_vm5 = vcmask 785408  }
   0xd   : > { %s191_s17 = scalar_lea.vmem %s688_s1, %s626_s14  ;;  %s187_s20 = scalar_lea.vmem %s687_s0, %s626_s14  ;;  %v209_v11 = vshrl.u32 %v208_v10, 7  ;;  %v211_v12 = vand.u32 127, %v208_v10 }
   0xe   : > { %v204_v0 = vld [vmem:[%s191_s17] sm:$0xff]  ;;  %s195_s26 = scalar_lea.vmem %s689_s2, %s626_s14  ;;  %s199_s29 = scalar_lea.vmem %s690_s3, %s626_s14 }
   0xf   : > { %v201_v1 = vld [vmem:[%s187_s20] sm:$0xff]  ;;  %v205_v2 = vpack.c.bf16 %v204_v0, %v204_v0  ;;  %vm212_vm1 = vcmp.gt.s32.totalorder %v211_v12, %v209_v11 }
  0x10   : > { %v202_v3 = vmul.f32 0.17677669, %v201_v1  ;;  %v213_v17 = vsel %vm212_vm1, -1e+30, %v597_v16  ;;  %v206_v24 = vld [vmem:[%s195_s26] sm:$0xff] }
  0x11   : > { %v219_v4 = vsel %vm214_vm0, %v205_v2, 0  ;;  %v273_v5 = vunpack.c.l.b16 %v205_v2  ;;  %v207_v25 = vpack.c.bf16 %v206_v24, %v206_v24 }
  0x12   : > { %v203_v6 = vpack.c.bf16 %v202_v3, %v202_v3  ;;  %228 = vmatpush.bf16.xpose.msra.mxu0 %v219_v4 }
  0x13   : > { %v274_v8 = vpack.c.b16 %v273_v5, %v273_v5  ;;  %v250_v26 = vsel %vm248_vm3, %v207_v25, 0  ;;  %v307_v28 = vunpack.c.l.b16 %v207_v25 }
  0x14   : > { %v268_v7 = vunpack.c.l.b16 %v203_v6  ;;  %259 = vmatpush.bf16.msra.mxu1 %v250_v26 }
  0x15   : > { %390 = vrot.lane.b32.xlu2 %v274_v8, %s594_s21  ;;  %v308_v29 = vpack.c.b16 %v307_v28, %v307_v28 }
  0x16   : > { %v269_v9 = vpack.c.b16 %v268_v7, %v268_v7 }
  0x18   : > { %270 = vrot.lane.b32.xlu1 %v269_v9, %s595_s22 }
  0x19   : > { %548 = vmatmul.msk.bf16.vlgmr.msra.gmra.mxu0 %vm214_vm0, %v203_v6 }
  0x1d   : > { %332 = vrot.lane.b32.xlu2 %v269_v9, %s596_s23 }
  0x20   : > { %334 = vrot.lane.b32.xlu1 %v274_v8, %s596_s23 }
  0x28   : > { %388 = vrot.lane.b32.xlu1 %v269_v9, %s594_s21 }
  0x30   : > { %309 = vrot.lane.b32.xlu1 %v308_v29, %s595_s22 }
  0x6f   : > { %v391_v14 = vpop.permute.xlu2 %390 }
  0x70   : > { %v396_v15 = vsel %vm214_vm0, %v391_v14, 0 }
  0x71   : > { %405 = vmatpush.bf16.xpose.msrb.mxu0 %v396_v15 }
  0x77   : > { %v333_v39 = vpop.permute.xlu2 %332 }
  0x8a   : > { %v271_v13 = vpop.permute.xlu1 %270 }
  0x92   : > { %v335_v19 = vpop.permute.xlu1 %334 }
  0x93   : > { %v340_v27 = vsel %vm214_vm0, %v335_v19, 0 }
  0x94   : > { %349 = vmatpush.bf16.xpose.msrb.mxu1 %v340_v27 }
  0x96   : > { %v230_v18 = vpop.f32.mrf.mxu0 }
  0x97   : > { %v231_v20 = vadd.f32 %v230_v18, %v213_v17 }
  0x99   : > { %v235_v21 = vsel %vm234_vm2, %v231_v20, -inf }
  0x9a   : > { %236 = vmax.xlane.f32.xlu0 %v235_v21  ;;  %v389_v23 = vpop.permute.xlu1 %388 }
  0x9b   : > { %554 = vmatmul.msk.bf16.vlgmr.msrb.gmra.mxu0 %vm214_vm0, %v389_v23 }
  0x9e   : > { %v232_v22 = vpop.f32.mrf.mxu0 }
  0xa2   : > { %v310_v53 = vpop.permute.xlu1 %309 }
  0xa3   : > { %v315_v54 = vsel %vm248_vm3, %v310_v53, 0 }
  0xa4   : > { %324 = vmatpush.bf16.msra.mxu3 %v315_v54 }
  0xae   : > { %275 = vrot.lane.b32.xlu0 %v274_v8, %s595_s22 }
 0x10d   : > { %v237_v30 = vpop.xlane.xlu0 %236 }
 0x10e   : > { %v238_v31 = vsub.f32 %v231_v20, %v237_v30 }
 0x110   : > { %v239_v32 = vmul.f32 1.442695, %v238_v31 }
 0x112   : > { %570 = vpow2.f32 %v239_v32 }
 0x118   : > { %v571_v33 = vpop.eup %570  ;;  %v407_v35 = vpop.f32.mrf.mxu0 }
 0x119   : > { %v244_v34 = vpack.c.bf16 %v571_v33, %v571_v33  ;;  %v408_v40 = vadd.f32 %v407_v35, %v213_v17  ;;  %v241_v52 = vsel %vm234_vm2, %v571_v33, 0.0 }
 0x11b   : > { %549 = vmatmul.msk.bf16.vlgmr.msra.gmra.mxu1 %vm234_vm2, %v244_v34  ;;  %v411_v41 = vsel %vm234_vm2, %v408_v40, -inf }
 0x11c   : > { %412 = vmax.xlane.f32.xlu1 %v411_v41 }
 0x120   : > { %v276_v36 = vpop.permute.xlu0 %275  ;;  %v409_v38 = vpop.f32.mrf.mxu0 }
 0x121   : > { %v281_v37 = vsel %vm214_vm0, %v276_v36, 0 }
 0x122   : > { %290 = vmatpush.bf16.xpose.msra.mxu2 %v281_v37 }
 0x129   : > { %550 = vmatmul.msk.bf16.vlgmr.msra.gmra.mxu2 %vm214_vm0, %v271_v13 }
 0x12b   : > { %552 = vmatmul.msk.bf16.vlgmr.msrb.gmra.mxu1 %vm214_vm0, %v333_v39 }
 0x18f   : > { %v413_v57 = vpop.xlane.xlu1 %412 }
 0x190   : > { %v414_v60 = vsub.f32 %v408_v40, %v413_v57 }
 0x192   : > { %v415_v63 = vmul.f32 1.442695, %v414_v60 }
 0x198   : > { %v659_v42 = vpop.f32.mrf.mxu1 }
 0x1a0   : > { %v263_v43 = vpop.f32.mrf.mxu1 }
 0x1a8   : > { %v351_v44 = vpop.f32.mrf.mxu1 }
 0x1a9   : > { %v352_v45 = vadd.f32 %v351_v44, %v213_v17 }
 0x1ab   : > { %v355_v46 = vsel %vm234_vm2, %v352_v45, -inf }
 0x1ac   : > { %356 = vmax.xlane.f32.xlu0 %v355_v46  ;;  %v292_v47 = vpop.f32.mrf.mxu2 }
 0x1ad   : > { %v293_v48 = vadd.f32 %v292_v47, %v213_v17 }
 0x1af   : > { %v296_v49 = vsel %vm234_vm2, %v293_v48, -inf }
 0x1b0   : > { %297 = vmax.xlane.f32.xlu2 %v296_v49  ;;  %v353_v50 = vpop.f32.mrf.mxu1 }
 0x1b4   : > { %v294_v51 = vpop.f32.mrf.mxu2 }
 0x1c0   : > { %421 = vrot.lane.b32.xlu0 %v308_v29, %s594_s21 }
 0x1c8   : > { %365 = vrot.lane.b32.xlu2 %v308_v29, %s596_s23 }
 0x1ea   : > { %242 = vadd.xlane.f32.xlu0 %v241_v52 }
 0x21f   : > { %v357_v55 = vpop.xlane.xlu0 %356 }
 0x220   : > { %v358_v56 = vsub.f32 %v352_v45, %v357_v55 }
 0x222   : > { %v359_v58 = vmul.f32 1.442695, %v358_v56 }
 0x223   : > { %v298_v59 = vpop.xlane.xlu2 %297 }
 0x224   : > { %572 = vpow2.f32 %v359_v58  ;;  %v299_v61 = vsub.f32 %v293_v48, %v298_v59 }
 0x226   : > { %v300_v62 = vmul.f32 1.442695, %v299_v61 }
 0x228   : > { %574 = vpow2.f32 %v300_v62 }
 0x229   : > { %576 = vpow2.f32 %v415_v63 }
 0x22a   : > { %v573_v0 = vpop.eup %572 }
 0x22b   : > { %v361_v1 = vsel %vm234_vm2, %v573_v0, 0.0  ;;  %v366_v2 = vpop.permute.xlu2 %365  ;;  %v364_v12 = vpack.c.bf16 %v573_v0, %v573_v0 }
 0x22c   : > { %362 = vadd.xlane.f32.xlu2 %v361_v1  ;;  %v371_v3 = vsel %vm248_vm3, %v366_v2, 0 }
 0x22d   : > { %380 = vmatpush.bf16.msrb.mxu3 %v371_v3 }
 0x22e   : > { %v575_v4 = vpop.eup %574 }
 0x22f   : > { %v302_v5 = vsel %vm234_vm2, %v575_v4, 0.0  ;;  %v305_v6 = vpack.c.bf16 %v575_v4, %v575_v4  ;;  %v577_v7 = vpop.eup %576 }
 0x230   : > { %303 = vadd.xlane.f32.xlu1 %v302_v5  ;;  %v420_v10 = vpack.c.bf16 %v577_v7, %v577_v7  ;;  %v417_v11 = vsel %vm234_vm2, %v577_v7, 0.0 }
 0x231   : > { %551 = vmatmul.msk.bf16.vlgmr.msra.gmra.mxu3 %vm234_vm2, %v305_v6 }
 0x232   : > { %v422_v8 = vpop.permute.xlu0 %421 }
 0x233   : > { %v427_v9 = vsel %vm248_vm3, %v422_v8, 0 }
 0x234   : > { %436 = vmatpush.bf16.msrb.mxu2 %v427_v9 }
 0x237   : > { %555 = vmatmul.msk.bf16.vlgmr.msrb.gmra.mxu2 %vm234_vm2, %v420_v10 }
 0x238   : > { %418 = vadd.xlane.f32.xlu1 %v417_v11 }
 0x241   : > { %553 = vmatmul.msk.bf16.vlgmr.msrb.gmra.mxu3 %vm234_vm2, %v364_v12 }
 0x25d   : > { %v243_v28 = vpop.xlane.xlu0 %242 }
 0x29f   : > { %v363_v20 = vpop.xlane.xlu2 %362 }
 0x2a3   : > { %v304_v13 = vpop.xlane.xlu1 %303 }
 0x2a4   : > { %578 = vrcp.f32 %v304_v13 }
 0x2aa   : > { %v579_v15 = vpop.eup %578 }
 0x2ab   : > { %v419_v14 = vpop.xlane.xlu1 %418 }
 0x2ac   : > { %580 = vrcp.f32 %v419_v14 }
 0x2ad   : > { %582 = vrcp.f32 %v363_v20 }
 0x2ae   : > { %584 = vrcp.f32 %v243_v28 }
 0x2b2   : > { %v581_v18 = vpop.eup %580 }
 0x2b3   : > { %v583_v24 = vpop.eup %582 }
 0x2b4   : > { %v326_v16 = vpop.f32.mrf.mxu3  ;;  %v585_v30 = vpop.eup %584 }
 0x2b5   : > { %v331_v17 = vmul.f32 %v579_v15, %v326_v16  ;;  %v266_v31 = vmul.f32 %v585_v30, %v659_v42 }
 0x2b7   : > { %445 = vrot.lane.b32.xlu1 %v331_v17, %s594_s21 }
 0x2ba   : > { %v438_v19 = vpop.f32.mrf.mxu2 }
 0x2bb   : > { %v443_v21 = vmul.f32 %v581_v18, %v438_v19 }
 0x2bc   : > { %v328_v22 = vpop.f32.mrf.mxu3 }
 0x2bd   : > { %453 = vrot.lane.b32.xlu2 %v443_v21, %s595_s22 }
 0x2c2   : > { %v440_v23 = vpop.f32.mrf.mxu2 }
 0x2c4   : > { %v382_v25 = vpop.f32.mrf.mxu3 }
 0x2c5   : > { %v387_v26 = vmul.f32 %v583_v24, %v382_v25 }
 0x2c7   : > { %449 = vrot.lane.b32.xlu1 %v387_v26, %s596_s23 }
 0x2cc   : > { %v384_v27 = vpop.f32.mrf.mxu3 }
 0x317   : > { %v454_v34 = vpop.permute.xlu2 %453 }
 0x329   : > { %v446_v29 = vpop.permute.xlu1 %445 }
 0x32a   : > { %v456_v32 = vsel %vm214_vm0, %v266_v31, %v446_v29 }
 0x339   : > { %v450_v33 = vpop.permute.xlu1 %449 }
 0x33a   : > { %v458_v35 = vsel %vm457_vm4, %v456_v32, %v450_v33 }
 0x33b   : > { %v460_v36 = vsel %vm459_vm5, %v458_v35, %v454_v34 }
 0x33c   : > { %461 = vst [vmem:[%s199_s29] sm:$0xff] %v460_v36 }
 0x33d PF: > { %s13_s12 = sadd.s32 1, %s592_s12  }
 0x33e   : > { %p10_p4 = scmp.ge.s32.totalorder %s13_s12, 4  }
 0x340   :  { %12 = sbr.rel (!%p10_p4) target bundleno = 1 (0x1), region = 68 }

// kernel: forward.24
= control target key start
LH: loop header
LB: loop body
LE: loop exit
PB: predicated region body
PF: predicated region fallthrough
CT: control target
= control target key end

     0   :  { %s562_s21 = smov 0   ;;  %s620_s0 = inlined_call_operand.vmem [shape: f32[16,128], index: 0, kind: input, shape index: {}]   ;;  %s621_s1 = inlined_call_operand.vmem [shape: bf16[128,128], index: 1, kind: input, shape index: {}]   ;;  %s622_s2 = inlined_call_operand.vmem [shape: f32[1,128], index: 2, kind: input, shape index: {}]   ;;  %s623_s3 = inlined_call_operand.vmem [shape: f32[16,128], index: 3, kind: input, shape index: {}]   ;;  %s624_s4 = inlined_call_operand.vmem [shape: f32[1,128], index: 4, kind: input, shape index: {}]   ;;  %s625_s5 = inlined_call_operand.vmem [shape: f32[1,128], index: 5, kind: input, shape index: {}]   ;;  %s626_s6 = inlined_call_operand.vmem [shape: f32[16,128], index: 6, kind: output, shape index: {}]  }
   0x1 LB: > { %s452_s22 = sadd.s32 4294967295, %s524_s21   ;;  %p456_p0 = scmp.ge.s32.totalorder %s524_s21, 1  ;;  %s524_s21 = sphi %s562_s21, %s16_s21  }
   0x2   : > { %p220_p1 = scmp.lt.s32.totalorder %s524_s21, 3 }
   0x4   : > { %p221_p2 = pnand %p456_p0, %p220_p1 }
   0x5   : > { %p252_p3 = scmp.lt.s32.totalorder (!%p221_p2), %s452_s22, 1 }
   0x6   : > { %224 = sbr.rel (%p221_p2) target bundleno = 440 (0x1b8), region = 44 }
   0xb   : > { %v501_v0 = vld [vmem:[%s621_s1 + $0x38] sm:$0xff]  ;;  %v500_v1 = vld [vmem:[%s621_s1 + $0x30] sm:$0xff]  ;;  %v499_v2 = vld [vmem:[%s621_s1 + $0x28] sm:$0xff]  ;;  %s628_s22 = smov (!%p252_p3, %s452_s22), 1  ;;  %v526_v16 = vmov 128.0  }
   0xc   : > { %334 = vmatpush.bf16.msra.mxu0 %v501_v0  ;;  %v498_v3 = vld [vmem:[%s621_s1 + $0x20] sm:$0xff]  ;;  %v497_v4 = vld [vmem:[%s621_s1 + $0x18] sm:$0xff]  ;;  %v496_v5 = vld [vmem:[%s621_s1 + $0x10] sm:$0xff]  ;;  %s588_s11 = sshll.u32 %s628_s22, 3  ;;  %514 = vrcp.f32 %v526_v16 }
   0xd   : > { %v495_v6 = vld [vmem:[%s621_s1 + $0x8] sm:$0xff]  ;;  %s255_s16 = scalar_lea.vmem %s620_s0, %s588_s11  ;;  %v494_v7 = vld [vmem:[%s621_s1] sm:$0xff]  ;;  %s259_s24 = scalar_lea.vmem %s623_s3, %s588_s11 }
   0xe   : > { %v264_v8 = vld [vmem:[%s255_s16] sm:$0xff]  ;;  %s263_s7 = scalar_lea.vmem %s626_s6, %s588_s11 }
   0xf   : > { %v265_v9 = vpack.c.bf16 %v264_v8, %v264_v8  ;;  %v511_v10 = vld [vmem:[%s622_s2] ss:$0 sm:$0xff] }
  0x10   : > { %335 = vmatpush.bf16.msra.mxu0 %v500_v1  ;;  %v347_v12 = vld [vmem:[%s259_s24] sm:$0xff] }
  0x11   : > { %v512_v36 = vld [vmem:[%s624_s4] ss:$0 sm:$0xff] }
  0x12   : > { %v515_v17 = vpop.eup %514  ;;  %v513_v38 = vld [vmem:[%s625_s5] ss:$0 sm:$0xff] }
  0x13   : > { %v352_v18 = vmul.f32 128.0, %v515_v17  ;;  %vm356_vm0 = vweird.f32 %v515_v17 }
  0x14   : > { %336 = vmatpush.bf16.msra.mxu0 %v499_v2 }
  0x15   : > { %v353_v19 = vsub.f32 1.0, %v352_v18 }
  0x17   : > { %v354_v20 = vmul.f32 %v515_v17, %v353_v19 }
  0x18   : > { %337 = vmatpush.bf16.msra.mxu0 %v498_v3 }
  0x19   : > { %v355_v21 = vadd.f32 %v515_v17, %v354_v20 }
  0x1b   : > { %v357_v22 = vsel %vm356_vm0, %v515_v17, %v355_v21 }
  0x1c   : > { %338 = vmatpush.bf16.msra.mxu0 %v497_v4 }
  0x20   : > { %339 = vmatpush.bf16.msra.mxu0 %v496_v5 }
  0x24   : > { %340 = vmatpush.bf16.msra.mxu0 %v495_v6 }
  0x28   : > { %341 = vmatpush.bf16.msra.mxu0 %v494_v7 }
  0x2b   : > { %342 = vmatmul.bf16.vlgmr.msra.gmra.mxu0 %v265_v9 }
  0xa8   : > { %v343_v11 = vpop.f32.mrf.mxu0 }
  0xa9   : > { %v344_v13 = vadd.f32 %v511_v10, %v343_v11 }
  0xab   : > { %v348_v14 = vadd.f32 %v347_v12, %v344_v13 }
  0xad   : > { %349 = vadd.xlane.f32.xlu0 %v348_v14 }
  0xb0   : > { %v345_v15 = vpop.f32.mrf.mxu0 }
 0x120   : > { %v350_v23 = vpop.xlane.xlu0 %349 }
 0x121   : > { %v358_v24 = vmul.f32 %v357_v22, %v350_v23 }
 0x123   : > { %v359_v25 = vsub.f32 %v348_v14, %v358_v24 }
 0x125   : > { %v360_v26 = vmul.f32 %v359_v25, %v359_v25 }
 0x127   : > { %361 = vadd.xlane.f32.xlu0 %v360_v26 }
 0x19a   : > { %v362_v27 = vpop.xlane.xlu0 %361 }
 0x19b   : > { %v363_v28 = vmul.f32 %v362_v27, %v357_v22 }
 0x19d   : > { %v364_v29 = vadd.f32 1e-05, %v363_v28 }
 0x19f   : > { %516 = vrsqrt.f32 %v364_v29  ;;  %vm371_vm2 = vweird.f32 %v364_v29 }
 0x1a5   : > { %v517_v30 = vpop.eup %516 }
 0x1a6   : > { %v366_v31 = vmul.f32 %v517_v30, %v364_v29  ;;  %vm372_vm1 = vweird.f32 %v517_v30 }
 0x1a7   : > { %vm373_vm3 = vmor %vm371_vm2, %vm372_vm1 }
 0x1a8   : > { %v367_v32 = vmul.f32 %v517_v30, %v366_v31 }
 0x1aa   : > { %v368_v33 = vmul.f32 0.5, %v367_v32 }
 0x1ac   : > { %v369_v34 = vsub.f32 1.5, %v368_v33 }
 0x1ae   : > { %v370_v35 = vmul.f32 %v517_v30, %v369_v34 }
 0x1b0   : > { %v374_v37 = vsel %vm373_vm3, %v517_v30, %v370_v35 }
 0x1b1   : > { %v375_v39 = vmul.f32 %v374_v37, %v359_v25 }
 0x1b3   : > { %v380_v40 = vmul.f32 %v512_v36, %v375_v39 }
 0x1b5   : > { %v385_v41 = vadd.f32 %v513_v38, %v380_v40 }
 0x1b7   : > { %386 = vst [vmem:[%s263_s7] sm:$0xff] %v385_v41 }
 0x1b8 PF: > { %s16_s21 = sadd.s32 1, %s524_s21  }
 0x1b9   : > { %p13_p4 = scmp.ge.s32.totalorder %s16_s21, 4  }
 0x1bb   :  { %15 = sbr.rel (!%p13_p4) target bundleno = 1 (0x1), region = 77 }

// kernel: forward.26
= control target key start
LH: loop header
LB: loop body
LE: loop exit
PB: predicated region body
PF: predicated region fallthrough
CT: control target
= control target key end

     0   :  { %s651_s12 = smov 0   ;;  %s653_s13 = smov 0   ;;  %s790_s0 = inlined_call_operand.vmem [shape: f32[32,128], index: 0, kind: input, shape index: {}]   ;;  %s791_s1 = inlined_call_operand.vmem [shape: bf16[128,256], index: 1, kind: input, shape index: {}]   ;;  %s792_s2 = inlined_call_operand.vmem [shape: f32[1,256], index: 2, kind: input, shape index: {}]   ;;  %s793_s3 = inlined_call_operand.vmem [shape: f32[32,256], index: 3, kind: output, shape index: {}]  }
   0x1   :  { %s655_s14 = smov 0  }
   0x2 LB: > { %s25_s15 = sadd.s32 1, %s625_s13  ;;  %p494_p0 = scmp.ge.s32.totalorder %s629_s14, 1  ;;  %s629_s14 = sphi %s655_s14, %s13_s14   ;;  %s625_s13 = sphi %s653_s13, %s795_s13   ;;  %s621_s12 = sphi %s651_s12, %s794_s12  }
   0x3   : > { %p27_p1 = scmp.ge.s32.totalorder %s25_s15, 2  ;;  %p173_p2 = scmp.lt.s32.totalorder %s629_s14, 3 }
   0x5   : > { %s797_s15 = smov (%p27_p1, %s25_s15), 0  ;;  %p174_p3 = pnand %p494_p0, %p173_p2 }
   0x6   : > { %s495_s25 = sshll.u32 (!%p174_p3), %s621_s12, 1 }
   0x7   : > { %177 = sbr.rel (%p174_p3) target bundleno = 184 (0xb8), region = 32  ;;  %p212_p4 = scmp.lt.s32.totalorder (!%p174_p3), %s495_s25, 3 }
   0xc   : > { %v558_v0 = vld [vmem:[%s791_s1 + $0x70] sm:$0xf]  ;;  %v582_v1 = vld [vmem:[%s791_s1 + $0x74] sm:$0xf0]  ;;  %v581_v2 = vld [vmem:[%s791_s1 + $0x74] sm:$0xf] }
   0xd   : > { %v559_v3 = vor.u32 %v582_v1, %v558_v0  ;;  %v560_v4 = vld [vmem:[%s791_s1 + $0x78] sm:$0xf0]  ;;  %v550_v5 = vld [vmem:[%s791_s1 + $0x60] sm:$0xf]  ;;  %v580_v6 = vld [vmem:[%s791_s1 + $0x64] sm:$0xf0] }
   0xe   : > { %v563_v7 = vor.u32 %v581_v2, %v560_v4  ;;  %v579_v8 = vld [vmem:[%s791_s1 + $0x64] sm:$0xf]  ;;  %v552_v9 = vld [vmem:[%s791_s1 + $0x68] sm:$0xf0]  ;;  %v551_v10 = vor.u32 %v580_v6, %v550_v5  ;;  %v542_v12 = vld [vmem:[%s791_s1 + $0x50] sm:$0xf] }
   0xf   : > { %345 = vmatpush.bf16.msra.mxu0 %v559_v3  ;;  %v555_v11 = vor.u32 %v579_v8, %v552_v9  ;;  %v578_v13 = vld [vmem:[%s791_s1 + $0x54] sm:$0xf0]  ;;  %v577_v14 = vld [vmem:[%s791_s1 + $0x54] sm:$0xf]  ;;  %v544_v15 = vld [vmem:[%s791_s1 + $0x58] sm:$0xf0] }
  0x10   : > { %359 = vmatpush.bf16.msra.mxu1 %v563_v7  ;;  %v543_v16 = vor.u32 %v578_v13, %v542_v12  ;;  %v547_v17 = vor.u32 %v577_v14, %v544_v15  ;;  %v534_v18 = vld [vmem:[%s791_s1 + $0x40] sm:$0xf]  ;;  %v576_v19 = vld [vmem:[%s791_s1 + $0x44] sm:$0xf0]  ;;  %v575_v20 = vld [vmem:[%s791_s1 + $0x44] sm:$0xf] }
  0x11   : > { %v536_v21 = vld [vmem:[%s791_s1 + $0x48] sm:$0xf0]  ;;  %v535_v22 = vor.u32 %v576_v19, %v534_v18  ;;  %v526_v24 = vld [vmem:[%s791_s1 + $0x30] sm:$0xf]  ;;  %v574_v25 = vld [vmem:[%s791_s1 + $0x34] sm:$0xf0] }
  0x12   : > { %v539_v23 = vor.u32 %v575_v20, %v536_v21  ;;  %v573_v26 = vld [vmem:[%s791_s1 + $0x34] sm:$0xf]  ;;  %v528_v27 = vld [vmem:[%s791_s1 + $0x38] sm:$0xf0]  ;;  %v527_v28 = vor.u32 %v574_v25, %v526_v24  ;;  %v518_v30 = vld [vmem:[%s791_s1 + $0x20] sm:$0xf] }
  0x13   : > { %346 = vmatpush.bf16.msra.mxu0 %v551_v10  ;;  %v531_v29 = vor.u32 %v573_v26, %v528_v27  ;;  %v572_v31 = vld [vmem:[%s791_s1 + $0x24] sm:$0xf0]  ;;  %v571_v32 = vld [vmem:[%s791_s1 + $0x24] sm:$0xf]  ;;  %v520_v33 = vld [vmem:[%s791_s1 + $0x28] sm:$0xf0] }
  0x14   : > { %360 = vmatpush.bf16.msra.mxu1 %v555_v11  ;;  %s799_s25 = smov (!%p212_p4, %s495_s25), 3  ;;  %v519_v34 = vor.u32 %v572_v31, %v518_v30  ;;  %v523_v35 = vor.u32 %v571_v32, %v520_v33  ;;  %v510_v36 = vld [vmem:[%s791_s1 + $0x10] sm:$0xf]  ;;  %v570_v37 = vld [vmem:[%s791_s1 + $0x14] sm:$0xf0] }
  0x15   : > { %v569_v38 = vld [vmem:[%s791_s1 + $0x14] sm:$0xf]  ;;  %v512_v39 = vld [vmem:[%s791_s1 + $0x18] sm:$0xf0]  ;;  %s496_s27 = sshll.u32 %s799_s25, 3  ;;  %v511_v40 = vor.u32 %v570_v37, %v510_v36  ;;  %s566_s17 = sshll.u32 %s799_s25, 4 }
  0x16   : > { %v515_v41 = vor.u32 %v569_v38, %v512_v39  ;;  %v502_v42 = vld [vmem:[%s791_s1] sm:$0xf]  ;;  %v568_v43 = vld [vmem:[%s791_s1 + $0x4] sm:$0xf0]  ;;  %s215_s12 = scalar_lea.vmem %s790_s0, %s496_s27  ;;  %v567_v44 = vld [vmem:[%s791_s1 + $0x4] sm:$0xf]  ;;  %s237_s20 = scalar_lea.vmem %s793_s3, %s566_s17 }
  0x17   : > { %347 = vmatpush.bf16.msra.mxu0 %v543_v16  ;;  %v504_v45 = vld [vmem:[%s791_s1 + $0x8] sm:$0xf0]  ;;  %v503_v46 = vor.u32 %v568_v43, %v502_v42  ;;  %v240_v47 = vld [vmem:[%s215_s12] sm:$0xff] }
  0x18   : > { %361 = vmatpush.bf16.msra.mxu1 %v547_v17  ;;  %v241_v48 = vld [vmem:[%s215_s12 + $0x8] sm:$0xff]  ;;  %v507_v49 = vor.u32 %v567_v44, %v504_v45  ;;  %v259_v51 = vld [vmem:[%s792_s2] sm:$0x3] }
  0x19   : > { %v242_v50 = vpack.c.bf16 %v241_v48, %v240_v47  ;;  %v261_v52 = vperm.slane %v259_v51, 0  ;;  %v262_v53 = vperm.slane %v259_v51, 1 }
  0x1b   : > { %348 = vmatpush.bf16.msra.mxu0 %v535_v22 }
  0x1c   : > { %362 = vmatpush.bf16.msra.mxu1 %v539_v23 }
  0x1f   : > { %349 = vmatpush.bf16.msra.mxu0 %v527_v28 }
  0x20   : > { %363 = vmatpush.bf16.msra.mxu1 %v531_v29 }
  0x23   : > { %350 = vmatpush.bf16.msra.mxu0 %v519_v34 }
  0x24   : > { %364 = vmatpush.bf16.msra.mxu1 %v523_v35 }
  0x27   : > { %351 = vmatpush.bf16.msra.mxu0 %v511_v40 }
  0x28   : > { %365 = vmatpush.bf16.msra.mxu1 %v515_v41 }
  0x2b   : > { %352 = vmatpush.bf16.msra.mxu0 %v503_v46 }
  0x2c   : > { %366 = vmatpush.bf16.msra.mxu1 %v507_v49 }
  0x2e   : > { %353 = vmatmul.bf16.vlgmr.msra.gmra.mxu0 %v242_v50 }
  0x2f   : > { %367 = vmatmul.bf16.vlgmr.msra.gmra.mxu1 %v242_v50 }
  0xab   : > { %v354_v54 = vpop.f32.mrf.mxu0 }
  0xac   : > { %v355_v55 = vadd.f32 %v354_v54, %v261_v52  ;;  %v368_v56 = vpop.f32.mrf.mxu1 }
  0xad   : > { %v369_v57 = vadd.f32 %v368_v56, %v262_v53 }
  0xae   : > { %373 = vst [vmem:[%s237_s20] sm:$0xff] %v355_v55 }
  0xaf   : > { %374 = vst [vmem:[%s237_s20 + $0x8] sm:$0xff] %v369_v57 }
  0xb3   : > { %v356_v58 = vpop.f32.mrf.mxu0 }
  0xb4   : > { %v357_v59 = vadd.f32 %v356_v58, %v261_v52  ;;  %v370_v60 = vpop.f32.mrf.mxu1 }
  0xb5   : > { %v371_v61 = vadd.f32 %v370_v60, %v262_v53 }
  0xb6   : > { %375 = vst [vmem:[%s237_s20 + $0x10] sm:$0xff] %v357_v59 }
  0xb7   : > { %376 = vst [vmem:[%s237_s20 + $0x18] sm:$0xff] %v371_v61 }
  0xb8 PF: > { %s13_s14 = sadd.s32 1, %s629_s14   ;;  %s794_s12 = smov %s625_s13 }
  0xb9   : > { %p10_p5 = scmp.ge.s32.totalorder %s13_s14, 4   ;;  %s795_s13 = smov %s797_s15 }
  0xbb   :  { %12 = sbr.rel (!%p10_p5) target bundleno = 2 (0x2), region = 68 }

// kernel: forward.21
= control target key start
LH: loop header
LB: loop body
LE: loop exit
PB: predicated region body
PF: predicated region fallthrough
CT: control target
= control target key end

     0   :  { %s662_s12 = smov 0   ;;  %s664_s13 = smov 0   ;;  %s753_s0 = inlined_call_operand.vmem [shape: f32[32,256], index: 0, kind: input, shape index: {}]   ;;  %s754_s1 = inlined_call_operand.vmem [shape: bf16[256,128], index: 1, kind: input, shape index: {}]   ;;  %s755_s2 = inlined_call_operand.vmem [shape: f32[1,128], index: 2, kind: input, shape index: {}]   ;;  %s756_s3 = inlined_call_operand.vmem [shape: f32[32,128], index: 3, kind: output, shape index: {}]  }
   0x1   :  { %s666_s14 = smov 0  }
   0x2 LB: > { %s25_s15 = sadd.s32 1, %s636_s13  ;;  %p504_p0 = scmp.ge.s32.totalorder %s640_s14, 1  ;;  %s640_s14 = sphi %s666_s14, %s13_s14   ;;  %s636_s13 = sphi %s664_s13, %s758_s13   ;;  %s632_s12 = sphi %s662_s12, %s757_s12  }
   0x3   : > { %p27_p1 = scmp.ge.s32.totalorder %s25_s15, 2  ;;  %p170_p2 = scmp.lt.s32.totalorder %s640_s14, 3 }
   0x5   : > { %s760_s15 = smov (%p27_p1, %s25_s15), 0  ;;  %p171_p3 = pnand %p504_p0, %p170_p2 }
   0x6   : > { %s505_s28 = sshll.u32 (!%p171_p3), %s632_s12, 1 }
   0x7   : > { %174 = sbr.rel (%p171_p3) target bundleno = 183 (0xb7), region = 32  ;;  %p206_p4 = scmp.lt.s32.totalorder (!%p171_p3), %s505_s28, 3 }
   0xc   : > { %v584_v0 = vld [vmem:[%s754_s1 + $0x38] sm:$0xff]  ;;  %v583_v2 = vld [vmem:[%s754_s1 + $0x30] sm:$0xff]  ;;  %v582_v4 = vld [vmem:[%s754_s1 + $0x28] sm:$0xff]  ;;  %s762_s28 = smov (!%p206_p4, %s505_s28), 3 }
   0xd   : > { %v592_v1 = vld [vmem:[%s754_s1 + $0x78] sm:$0xff]  ;;  %366 = vmatpush.bf16.msra.mxu0 %v584_v0  ;;  %v591_v3 = vld [vmem:[%s754_s1 + $0x70] sm:$0xff]  ;;  %v590_v5 = vld [vmem:[%s754_s1 + $0x68] sm:$0xff]  ;;  %s576_s17 = sshll.u32 %s762_s28, 4  ;;  %s509_s5 = sshll.u32 %s762_s28, 3 }
   0xe   : > { %380 = vmatpush.bf16.msra.mxu1 %v592_v1  ;;  %v581_v6 = vld [vmem:[%s754_s1 + $0x20] sm:$0xff]  ;;  %v580_v8 = vld [vmem:[%s754_s1 + $0x18] sm:$0xff]  ;;  %v579_v10 = vld [vmem:[%s754_s1 + $0x10] sm:$0xff]  ;;  %s210_s24 = scalar_lea.vmem %s753_s0, %s576_s17  ;;  %s226_s8 = scalar_lea.vmem %s756_s3, %s509_s5 }
   0xf   : > { %v589_v7 = vld [vmem:[%s754_s1 + $0x60] sm:$0xff]  ;;  %v588_v9 = vld [vmem:[%s754_s1 + $0x58] sm:$0xff]  ;;  %v587_v11 = vld [vmem:[%s754_s1 + $0x50] sm:$0xff] }
  0x10   : > { %v578_v12 = vld [vmem:[%s754_s1 + $0x8] sm:$0xff]  ;;  %v577_v14 = vld [vmem:[%s754_s1] sm:$0xff]  ;;  %v230_v17 = vld [vmem:[%s210_s24 + $0x10] sm:$0xff] }
  0x11   : > { %367 = vmatpush.bf16.msra.mxu0 %v583_v2  ;;  %v586_v13 = vld [vmem:[%s754_s1 + $0x48] sm:$0xff]  ;;  %v585_v15 = vld [vmem:[%s754_s1 + $0x40] sm:$0xff]  ;;  %v231_v19 = vld [vmem:[%s210_s24 + $0x18] sm:$0xff] }
  0x12   : > { %381 = vmatpush.bf16.msra.mxu1 %v591_v3  ;;  %v228_v16 = vld [vmem:[%s210_s24] sm:$0xff]  ;;  %v229_v18 = vld [vmem:[%s210_s24 + $0x8] sm:$0xff] }
  0x13   : > { %v232_v20 = vpack.c.bf16 %v230_v17, %v228_v16  ;;  %v233_v21 = vpack.c.bf16 %v231_v19, %v229_v18  ;;  %v617_v22 = vld [vmem:[%s755_s2] ss:$0 sm:$0xff] }
  0x15   : > { %368 = vmatpush.bf16.msra.mxu0 %v582_v4 }
  0x16   : > { %382 = vmatpush.bf16.msra.mxu1 %v590_v5 }
  0x19   : > { %369 = vmatpush.bf16.msra.mxu0 %v581_v6 }
  0x1a   : > { %383 = vmatpush.bf16.msra.mxu1 %v589_v7 }
  0x1d   : > { %370 = vmatpush.bf16.msra.mxu0 %v580_v8 }
  0x1e   : > { %384 = vmatpush.bf16.msra.mxu1 %v588_v9 }
  0x21   : > { %371 = vmatpush.bf16.msra.mxu0 %v579_v10 }
  0x22   : > { %385 = vmatpush.bf16.msra.mxu1 %v587_v11 }
  0x25   : > { %372 = vmatpush.bf16.msra.mxu0 %v578_v12 }
  0x26   : > { %386 = vmatpush.bf16.msra.mxu1 %v586_v13 }
  0x29   : > { %373 = vmatpush.bf16.msra.mxu0 %v577_v14 }
  0x2a   : > { %387 = vmatpush.bf16.msra.mxu1 %v585_v15 }
  0x2c   : > { %374 = vmatmul.bf16.vlgmr.msra.gmra.mxu0 %v232_v20 }
  0x2d   : > { %388 = vmatmul.bf16.vlgmr.msra.gmra.mxu1 %v233_v21 }
  0xa9   : > { %v375_v23 = vpop.f32.mrf.mxu0 }
  0xaa   : > { %v389_v24 = vpop.f32.mrf.mxu1  ;;  %v376_v25 = vadd.f32 %v617_v22, %v375_v23 }
  0xac   : > { %v390_v26 = vadd.f32 %v389_v24, %v376_v25 }
  0xae   : > { %394 = vst [vmem:[%s226_s8] sm:$0xff] %v390_v26 }
  0xb1   : > { %v377_v27 = vpop.f32.mrf.mxu0 }
  0xb2   : > { %v378_v28 = vadd.f32 %v617_v22, %v377_v27  ;;  %v391_v29 = vpop.f32.mrf.mxu1 }
  0xb4   : > { %v392_v30 = vadd.f32 %v391_v29, %v378_v28 }
  0xb6   : > { %395 = vst [vmem:[%s226_s8 + $0x8] sm:$0xff] %v392_v30 }
  0xb7 PF: > { %s13_s14 = sadd.s32 1, %s640_s14   ;;  %s757_s12 = smov %s636_s13 }
  0xb8   : > { %p10_p5 = scmp.ge.s32.totalorder %s13_s14, 4   ;;  %s758_s13 = smov %s760_s15 }
  0xba   :  { %12 = sbr.rel (!%p10_p5) target bundleno = 2 (0x2), region = 68 }

// kernel: forward.27
= control target key start
LH: loop header
LB: loop body
LE: loop exit
PB: predicated region body
PF: predicated region fallthrough
CT: control target
= control target key end

     0   :  { %s679_s15 = smov 0   ;;  %s754_s0 = inlined_call_operand.vmem [shape: f32[2,8,128], index: 0, kind: input, shape index: {}]   ;;  %s755_s1 = inlined_call_operand.vmem [shape: f32[2,16,128], index: 1, kind: input, shape index: {}]   ;;  %s756_s2 = inlined_call_operand.vmem [shape: f32[2,16,128], index: 2, kind: input, shape index: {}]   ;;  %s757_s3 = inlined_call_operand.vmem [shape: f32[2,1,16], index: 3, kind: input, shape index: {}]   ;;  %s758_s4 = inlined_call_operand.vmem [shape: f32[2,8,128], index: 4, kind: output, shape index: {}]  }
   0x1 LB: > { %s592_s16 = sadd.s32 4294967295, %s649_s15   ;;  %p596_p0 = scmp.ge.s32.totalorder %s649_s15, 1  ;;  %s649_s15 = sphi %s679_s15, %s14_s15  }
   0x2   : > { %p189_p1 = scmp.lt.s32.totalorder %s649_s15, 3 }
   0x4   : > { %p190_p2 = pnand %p596_p0, %p189_p1 }
   0x5   : > { %p226_p3 = scmp.lt.s32.totalorder (!%p190_p2), %s592_s16, 1  ;;  %s651_s28 = smov (!%p190_p2), 32  }
   0x6   : > { %193 = sbr.rel (%p190_p2) target bundleno = 833 (0x341), region = 36  ;;  %s652_s29 = smov (!%p190_p2), 96  }
   0x7   : > { %s653_s30 = smov (!%p190_p2), 64  }
   0xb   : > { %s760_s16 = smov (!%p226_p3, %s592_s16), 1  ;;  %vm268_vm0 = vcmask 261120   ;;  %vm288_vm1 = vcmask 130048   ;;  %vm501_vm2 = vcmask 523264   ;;  %vm503_vm3 = vcmask 785408  }
   0xc   : > { %s613_s17 = sshll.u32 %s760_s16, 4  ;;  %s597_s18 = sshll.u32 %s760_s16, 3 }
   0xd   : > { %s234_s21 = scalar_lea.vmem %s755_s1, %s613_s17  ;;  %s229_s24 = scalar_lea.vmem %s754_s0, %s597_s18 }
   0xe   : > { %v252_v0 = vld [vmem:[%s234_s21] sm:$0xff]  ;;  %v253_v1 = vld [vmem:[%s234_s21 + $0x8] sm:$0xff]  ;;  %s242_s27 = scalar_lea.vmem %s757_s3, %s760_s16  ;;  %s239_s7 = scalar_lea.vmem %s756_s2, %s613_s17 }
   0xf   : > { %v249_v2 = vld [vmem:[%s229_s24] sm:$0xff]  ;;  %v254_v3 = vpack.c.bf16 %v252_v0, %v252_v0  ;;  %v255_v4 = vpack.c.bf16 %v253_v1, %v253_v1  ;;  %v257_v24 = vld [vmem:[%s239_s7 + $0x8] sm:$0xff]  ;;  %s246_s10 = scalar_lea.vmem %s758_s4, %s597_s18 }
  0x10   : > { %v250_v5 = vmul.f32 0.17677669, %v249_v2  ;;  %v626_v16 = vld [vmem:[%s242_s27] ss:$0 sm:$0xff]  ;;  %v259_v26 = vpack.c.bf16 %v257_v24, %v257_v24 }
  0x11   : > { %v265_v6 = vunpack.c.l.b16 %v254_v3  ;;  %v266_v7 = vunpack.c.l.b16 %v255_v4  ;;  %v256_v23 = vld [vmem:[%s239_s7] sm:$0xff] }
  0x12   : > { %v251_v8 = vpack.c.bf16 %v250_v5, %v250_v5  ;;  %v258_v25 = vpack.c.bf16 %v256_v23, %v256_v23  ;;  %v302_v28 = vunpack.c.l.b16 %v259_v26 }
  0x13   : > { %v267_v9 = vpack.c.b16 %v266_v7, %v265_v6 }
  0x14   : > { %v324_v10 = vunpack.c.l.b16 %v251_v8  ;;  %v301_v27 = vunpack.c.l.b16 %v258_v25 }
  0x15   : > { %v273_v11 = vsel %vm268_vm0, %v267_v9, 0  ;;  %436 = vrot.lane.b32.xlu2 %v267_v9, %s651_s28 }
  0x16   : > { %v325_v12 = vpack.c.b16 %v324_v10, %v324_v10  ;;  %282 = vmatpush.bf16.xpose.msra.mxu0 %v273_v11  ;;  %v303_v29 = vpack.c.b16 %v302_v28, %v301_v27 }
  0x18   : > { %326 = vrot.lane.b32.xlu1 %v325_v12, %s652_s29  ;;  %315 = vmatpush.bf16.msra.mxu1 %v303_v29 }
  0x1d   : > { %603 = vmatmul.msk.bf16.vlgmr.msra.gmra.mxu0 %vm268_vm0, %v251_v8  ;;  %380 = vrot.lane.b32.xlu2 %v325_v12, %s653_s30 }
  0x20   : > { %382 = vrot.lane.b32.xlu1 %v267_v9, %s653_s30 }
  0x28   : > { %434 = vrot.lane.b32.xlu1 %v325_v12, %s651_s28 }
  0x30   : > { %359 = vrot.lane.b32.xlu1 %v303_v29, %s652_s29 }
  0x6f   : > { %v437_v14 = vpop.permute.xlu2 %436 }
  0x70   : > { %v442_v15 = vsel %vm268_vm0, %v437_v14, 0 }
  0x71   : > { %451 = vmatpush.bf16.xpose.msrb.mxu0 %v442_v15 }
  0x77   : > { %v381_v42 = vpop.permute.xlu2 %380 }
  0x8a   : > { %v327_v13 = vpop.permute.xlu1 %326 }
  0x92   : > { %v383_v18 = vpop.permute.xlu1 %382 }
  0x93   : > { %v388_v30 = vsel %vm268_vm0, %v383_v18, 0 }
  0x94   : > { %397 = vmatpush.bf16.xpose.msrb.mxu1 %v388_v30 }
  0x9a   : > { %v284_v17 = vpop.f32.mrf.mxu0  ;;  %v435_v22 = vpop.permute.xlu1 %434 }
  0x9b   : > { %v285_v19 = vadd.f32 %v626_v16, %v284_v17  ;;  %609 = vmatmul.msk.bf16.vlgmr.msrb.gmra.mxu0 %vm268_vm0, %v435_v22 }
  0x9d   : > { %v289_v20 = vsel %vm288_vm1, %v285_v19, -inf }
  0x9e   : > { %290 = vmax.xlane.f32.xlu0 %v289_v20 }
  0xa2   : > { %v286_v21 = vpop.f32.mrf.mxu0  ;;  %v360_v45 = vpop.permute.xlu1 %359 }
  0xa3   : > { %372 = vmatpush.bf16.msra.mxu3 %v360_v45 }
  0xb2   : > { %328 = vrot.lane.b32.xlu0 %v267_v9, %s652_s29 }
 0x111   : > { %v291_v31 = vpop.xlane.xlu0 %290 }
 0x112   : > { %v292_v32 = vsub.f32 %v285_v19, %v291_v31 }
 0x114   : > { %v293_v33 = vmul.f32 1.442695, %v292_v32 }
 0x116   : > { %627 = vpow2.f32 %v293_v33 }
 0x118   : > { %v453_v36 = vpop.f32.mrf.mxu0 }
 0x119   : > { %v454_v37 = vadd.f32 %v626_v16, %v453_v36 }
 0x11b   : > { %v457_v38 = vsel %vm288_vm1, %v454_v37, -inf }
 0x11c   : > { %v628_v34 = vpop.eup %627  ;;  %458 = vmax.xlane.f32.xlu1 %v457_v38 }
 0x11d   : > { %v298_v35 = vpack.c.bf16 %v628_v34, %v628_v34  ;;  %v295_v54 = vsel %vm288_vm1, %v628_v34, 0.0 }
 0x11f   : > { %604 = vmatmul.msk.bf16.vlgmr.msra.gmra.mxu1 %vm288_vm1, %v298_v35 }
 0x120   : > { %v455_v41 = vpop.f32.mrf.mxu0 }
 0x124   : > { %v329_v39 = vpop.permute.xlu0 %328 }
 0x125   : > { %v334_v40 = vsel %vm268_vm0, %v329_v39, 0 }
 0x126   : > { %343 = vmatpush.bf16.xpose.msra.mxu2 %v334_v40 }
 0x12d   : > { %605 = vmatmul.msk.bf16.vlgmr.msra.gmra.mxu2 %vm268_vm0, %v327_v13 }
 0x12f   : > { %607 = vmatmul.msk.bf16.vlgmr.msrb.gmra.mxu1 %vm268_vm0, %v381_v42 }
 0x18f   : > { %v459_v56 = vpop.xlane.xlu1 %458 }
 0x190   : > { %v460_v59 = vsub.f32 %v454_v37, %v459_v56 }
 0x192   : > { %v461_v63 = vmul.f32 1.442695, %v460_v59 }
 0x19c   : > { %v728_v43 = vpop.f32.mrf.mxu1 }
 0x1a4   : > { %v319_v44 = vpop.f32.mrf.mxu1 }
 0x1ac   : > { %v399_v46 = vpop.f32.mrf.mxu1 }
 0x1ad   : > { %v400_v47 = vadd.f32 %v626_v16, %v399_v46 }
 0x1af   : > { %v403_v48 = vsel %vm288_vm1, %v400_v47, -inf }
 0x1b0   : > { %404 = vmax.xlane.f32.xlu0 %v403_v48  ;;  %v345_v49 = vpop.f32.mrf.mxu2 }
 0x1b1   : > { %v346_v50 = vadd.f32 %v626_v16, %v345_v49 }
 0x1b3   : > { %v349_v51 = vsel %vm288_vm1, %v346_v50, -inf }
 0x1b4   : > { %350 = vmax.xlane.f32.xlu2 %v349_v51  ;;  %v401_v52 = vpop.f32.mrf.mxu1 }
 0x1b8   : > { %v347_v53 = vpop.f32.mrf.mxu2 }
 0x1c4   : > { %467 = vrot.lane.b32.xlu0 %v303_v29, %s651_s28 }
 0x1cc   : > { %413 = vrot.lane.b32.xlu2 %v303_v29, %s653_s30 }
 0x1ee   : > { %296 = vadd.xlane.f32.xlu0 %v295_v54 }
 0x223   : > { %v405_v55 = vpop.xlane.xlu0 %404 }
 0x224   : > { %v406_v57 = vsub.f32 %v400_v47, %v405_v55 }
 0x226   : > { %v407_v58 = vmul.f32 1.442695, %v406_v57 }
 0x227   : > { %v351_v60 = vpop.xlane.xlu2 %350 }
 0x228   : > { %629 = vpow2.f32 %v407_v58  ;;  %v352_v61 = vsub.f32 %v346_v50, %v351_v60 }
 0x22a   : > { %v353_v62 = vmul.f32 1.442695, %v352_v61 }
 0x22c   : > { %631 = vpow2.f32 %v353_v62 }
 0x22d   : > { %633 = vpow2.f32 %v461_v63 }
 0x22e   : > { %v630_v0 = vpop.eup %629 }
 0x22f   : > { %v409_v1 = vsel %vm288_vm1, %v630_v0, 0.0  ;;  %v414_v2 = vpop.permute.xlu2 %413  ;;  %v412_v10 = vpack.c.bf16 %v630_v0, %v630_v0 }
 0x230   : > { %410 = vadd.xlane.f32.xlu2 %v409_v1  ;;  %426 = vmatpush.bf16.msrb.mxu3 %v414_v2 }
 0x232   : > { %v632_v3 = vpop.eup %631 }
 0x233   : > { %v355_v4 = vsel %vm288_vm1, %v632_v3, 0.0  ;;  %v358_v5 = vpack.c.bf16 %v632_v3, %v632_v3  ;;  %v634_v6 = vpop.eup %633 }
 0x234   : > { %356 = vadd.xlane.f32.xlu1 %v355_v4  ;;  %v466_v8 = vpack.c.bf16 %v634_v6, %v634_v6  ;;  %v463_v9 = vsel %vm288_vm1, %v634_v6, 0.0 }
 0x235   : > { %606 = vmatmul.msk.bf16.vlgmr.msra.gmra.mxu3 %vm288_vm1, %v358_v5 }
 0x236   : > { %v468_v7 = vpop.permute.xlu0 %467 }
 0x237   : > { %480 = vmatpush.bf16.msrb.mxu2 %v468_v7 }
 0x23a   : > { %610 = vmatmul.msk.bf16.vlgmr.msrb.gmra.mxu2 %vm288_vm1, %v466_v8 }
 0x23c   : > { %464 = vadd.xlane.f32.xlu1 %v463_v9 }
 0x245   : > { %608 = vmatmul.msk.bf16.vlgmr.msrb.gmra.mxu3 %vm288_vm1, %v412_v10 }
 0x261   : > { %v297_v26 = vpop.xlane.xlu0 %296 }
 0x2a3   : > { %v411_v19 = vpop.xlane.xlu2 %410 }
 0x2a7   : > { %v357_v11 = vpop.xlane.xlu1 %356 }
 0x2a8   : > { %635 = vrcp.f32 %v357_v11 }
 0x2ae   : > { %v636_v13 = vpop.eup %635 }
 0x2af   : > { %v465_v12 = vpop.xlane.xlu1 %464 }
 0x2b0   : > { %637 = vrcp.f32 %v465_v12 }
 0x2b1   : > { %639 = vrcp.f32 %v411_v19 }
 0x2b2   : > { %641 = vrcp.f32 %v297_v26 }
 0x2b6   : > { %v638_v16 = vpop.eup %637 }
 0x2b7   : > { %v640_v22 = vpop.eup %639 }
 0x2b8   : > { %v374_v14 = vpop.f32.mrf.mxu3  ;;  %v642_v28 = vpop.eup %641 }
 0x2b9   : > { %v379_v15 = vmul.f32 %v636_v13, %v374_v14  ;;  %v322_v29 = vmul.f32 %v642_v28, %v728_v43 }
 0x2bb   : > { %489 = vrot.lane.b32.xlu1 %v379_v15, %s651_s28 }
 0x2bd   : > { %v482_v17 = vpop.f32.mrf.mxu2 }
 0x2be   : > { %v487_v18 = vmul.f32 %v638_v16, %v482_v17 }
 0x2c0   : > { %v376_v20 = vpop.f32.mrf.mxu3  ;;  %497 = vrot.lane.b32.xlu2 %v487_v18, %s652_s29 }
 0x2c5   : > { %v484_v21 = vpop.f32.mrf.mxu2 }
 0x2c8   : > { %v428_v23 = vpop.f32.mrf.mxu3 }
 0x2c9   : > { %v433_v24 = vmul.f32 %v640_v22, %v428_v23 }
 0x2cb   : > { %493 = vrot.lane.b32.xlu1 %v433_v24, %s653_s30 }
 0x2d0   : > { %v430_v25 = vpop.f32.mrf.mxu3 }
 0x31a   : > { %v498_v32 = vpop.permute.xlu2 %497 }
 0x32d   : > { %v490_v27 = vpop.permute.xlu1 %489 }
 0x32e   : > { %v500_v30 = vsel %vm268_vm0, %v322_v29, %v490_v27 }
 0x33d   : > { %v494_v31 = vpop.permute.xlu1 %493 }
 0x33e   : > { %v502_v33 = vsel %vm501_vm2, %v500_v30, %v494_v31 }
 0x33f   : > { %v504_v34 = vsel %vm503_vm3, %v502_v33, %v498_v32 }
 0x340   : > { %505 = vst [vmem:[%s246_s10] sm:$0xff] %v504_v34 }
 0x341 PF: > { %s14_s15 = sadd.s32 1, %s649_s15  }
 0x342   : > { %p11_p4 = scmp.ge.s32.totalorder %s14_s15, 4  }
 0x344   :  { %13 = sbr.rel (!%p11_p4) target bundleno = 1 (0x1), region = 75 }

// kernel: forward.40
= control target key start
LH: loop header
LB: loop body
LE: loop exit
PB: predicated region body
PF: predicated region fallthrough
CT: control target
= control target key end

     0   :  { %s311_s12 = smov 0   ;;  %s341_s0 = inlined_call_operand.vmem [shape: f32[16,128], index: 0, kind: input, shape index: {}]   ;;  %s342_s1 = inlined_call_operand.vmem [shape: f32[1,128], index: 1, kind: input, shape index: {}]   ;;  %s343_s2 = inlined_call_operand.vmem [shape: f32[1,128], index: 2, kind: input, shape index: {}]   ;;  %s344_s3 = inlined_call_operand.vmem [shape: f32[16,128], index: 3, kind: output, shape index: {}]  }
   0x1 LB: > { %s258_s13 = sadd.s32 4294967295, %s288_s12   ;;  %p262_p0 = scmp.ge.s32.totalorder %s288_s12, 1  ;;  %s288_s12 = sphi %s311_s12, %s13_s12  }
   0x2   : > { %p136_p1 = scmp.lt.s32.totalorder %s288_s12, 3 }
   0x4   : > { %p137_p2 = pnand %p262_p0, %p136_p1 }
   0x5   : > { %p158_p3 = scmp.lt.s32.totalorder (!%p137_p2), %s258_s13, 1 }
   0x6   : > { %140 = sbr.rel (%p137_p2) target bundleno = 282 (0x11a), region = 32 }
   0xb   : > { %s346_s13 = smov (!%p158_p3, %s258_s13), 1  ;;  %v290_v1 = vmov 128.0   ;;  %v276_v21 = vld [vmem:[%s342_s1] ss:$0 sm:$0xff] }
   0xc   : > { %s263_s14 = sshll.u32 %s346_s13, 3  ;;  %278 = vrcp.f32 %v290_v1  ;;  %v277_v23 = vld [vmem:[%s343_s2] ss:$0 sm:$0xff] }
   0xd   : > { %s161_s17 = scalar_lea.vmem %s341_s0, %s263_s14  ;;  %s165_s24 = scalar_lea.vmem %s344_s3, %s263_s14 }
   0xe   : > { %v166_v0 = vld [vmem:[%s161_s17] sm:$0xff] }
   0xf   : > { %167 = vadd.xlane.f32.xlu0 %v166_v0 }
  0x12   : > { %v279_v2 = vpop.eup %278 }
  0x13   : > { %v170_v3 = vmul.f32 128.0, %v279_v2  ;;  %vm174_vm0 = vweird.f32 %v279_v2 }
  0x15   : > { %v171_v4 = vsub.f32 1.0, %v170_v3 }
  0x17   : > { %v172_v5 = vmul.f32 %v279_v2, %v171_v4 }
  0x19   : > { %v173_v6 = vadd.f32 %v279_v2, %v172_v5 }
  0x1b   : > { %v175_v7 = vsel %vm174_vm0, %v279_v2, %v173_v6 }
  0x82   : > { %v168_v8 = vpop.xlane.xlu0 %167 }
  0x83   : > { %v176_v9 = vmul.f32 %v175_v7, %v168_v8 }
  0x85   : > { %v177_v10 = vsub.f32 %v166_v0, %v176_v9 }
  0x87   : > { %v178_v11 = vmul.f32 %v177_v10, %v177_v10 }
  0x89   : > { %179 = vadd.xlane.f32.xlu0 %v178_v11 }
  0xfc   : > { %v180_v12 = vpop.xlane.xlu0 %179 }
  0xfd   : > { %v181_v13 = vmul.f32 %v180_v12, %v175_v7 }
  0xff   : > { %v182_v14 = vadd.f32 1e-06, %v181_v13 }
 0x101   : > { %280 = vrsqrt.f32 %v182_v14  ;;  %vm189_vm2 = vweird.f32 %v182_v14 }
 0x107   : > { %v281_v15 = vpop.eup %280 }
 0x108   : > { %v184_v16 = vmul.f32 %v281_v15, %v182_v14  ;;  %vm190_vm1 = vweird.f32 %v281_v15 }
 0x109   : > { %vm191_vm3 = vmor %vm189_vm2, %vm190_vm1 }
 0x10a   : > { %v185_v17 = vmul.f32 %v281_v15, %v184_v16 }
 0x10c   : > { %v186_v18 = vmul.f32 0.5, %v185_v17 }
 0x10e   : > { %v187_v19 = vsub.f32 1.5, %v186_v18 }
 0x110   : > { %v188_v20 = vmul.f32 %v281_v15, %v187_v19 }
 0x112   : > { %v192_v22 = vsel %vm191_vm3, %v281_v15, %v188_v20 }
 0x113   : > { %v193_v24 = vmul.f32 %v192_v22, %v177_v10 }
 0x115   : > { %v198_v25 = vmul.f32 %v276_v21, %v193_v24 }
 0x117   : > { %v203_v26 = vadd.f32 %v277_v23, %v198_v25 }
 0x119   : > { %204 = vst [vmem:[%s165_s24] sm:$0xff] %v203_v26 }
 0x11a PF: > { %s13_s12 = sadd.s32 1, %s288_s12  }
 0x11b   : > { %p10_p4 = scmp.ge.s32.totalorder %s13_s12, 4  }
 0x11d   :  { %12 = sbr.rel (!%p10_p4) target bundleno = 1 (0x1), region = 62 }

// kernel: forward.29
= control target key start
LH: loop header
LB: loop body
LE: loop exit
PB: predicated region body
PF: predicated region fallthrough
CT: control target
= control target key end

     0   :  { %s1019_s12 = smov 0   ;;  %s1021_s13 = smov 0   ;;  %s1316_s0 = inlined_call_operand.vmem [shape: f32[16,128], index: 0, kind: input, shape index: {}]   ;;  %s1317_s1 = inlined_call_operand.vmem [shape: bf16[128,512], index: 1, kind: input, shape index: {}]   ;;  %s1318_s2 = inlined_call_operand.vmem [shape: f32[1,512], index: 2, kind: input, shape index: {}]   ;;  %s1319_s3 = inlined_call_operand.vmem [shape: f32[16,512], index: 3, kind: output, shape index: {}]  }
   0x1   :  { %s1023_s14 = smov 0  }
   0x2 LB: > { %s25_s15 = sadd.s32 1, %s992_s13  ;;  %p766_p0 = scmp.ge.s32.totalorder %s996_s14, 1  ;;  %s996_s14 = sphi %s1023_s14, %s13_s14   ;;  %s992_s13 = sphi %s1021_s13, %s1321_s13   ;;  %s988_s12 = sphi %s1019_s12, %s1320_s12  }
   0x3   : > { %p27_p1 = scmp.ge.s32.totalorder %s25_s15, 2  ;;  %p171_p2 = scmp.lt.s32.totalorder %s996_s14, 3 }
   0x5   : > { %s1323_s15 = smov (%p27_p1, %s25_s15), 0  ;;  %p172_p3 = pnand %p766_p0, %p171_p2 }
   0x6   : > { %p207_p4 = scmp.lt.s32.totalorder (!%p172_p3), %s988_s12, 1 }
   0x7   : > { %175 = sbr.rel (%p172_p3) target bundleno = 236 (0xec), region = 32 }
   0xc   : > { %v884_v0 = vld [vmem:[%s1317_s1 + $0xe0] sm:$0xf]  ;;  %v931_v1 = vld [vmem:[%s1317_s1 + $0xec] sm:$0xf0]  ;;  %v929_v2 = vld [vmem:[%s1317_s1 + $0xe4] sm:$0xf] }
   0xd   : > { %v885_v3 = vor.u32 %v931_v1, %v884_v0  ;;  %v886_v4 = vld [vmem:[%s1317_s1 + $0xf0] sm:$0xf0]  ;;  %v892_v5 = vld [vmem:[%s1317_s1 + $0xe8] sm:$0xf]  ;;  %v932_v6 = vld [vmem:[%s1317_s1 + $0xf4] sm:$0xf0] }
   0xe   : > { %v889_v7 = vor.u32 %v929_v2, %v886_v4  ;;  %v893_v8 = vor.u32 %v932_v6, %v892_v5  ;;  %v930_v9 = vld [vmem:[%s1317_s1 + $0xec] sm:$0xf]  ;;  %v894_v10 = vld [vmem:[%s1317_s1 + $0xf8] sm:$0xf0]  ;;  %v868_v11 = vld [vmem:[%s1317_s1 + $0xc0] sm:$0xf] }
   0xf   : > { %436 = vmatpush.bf16.msra.mxu0 %v885_v3  ;;  %v897_v12 = vor.u32 %v930_v9, %v894_v10  ;;  %v927_v13 = vld [vmem:[%s1317_s1 + $0xcc] sm:$0xf0]  ;;  %v925_v14 = vld [vmem:[%s1317_s1 + $0xc4] sm:$0xf]  ;;  %v870_v15 = vld [vmem:[%s1317_s1 + $0xd0] sm:$0xf0] }
  0x10   : > { %449 = vmatpush.bf16.msra.mxu1 %v889_v7  ;;  %462 = vmatpush.bf16.msra.mxu2 %v893_v8  ;;  %v869_v16 = vor.u32 %v927_v13, %v868_v11  ;;  %v873_v17 = vor.u32 %v925_v14, %v870_v15  ;;  %v876_v18 = vld [vmem:[%s1317_s1 + $0xc8] sm:$0xf]  ;;  %v928_v19 = vld [vmem:[%s1317_s1 + $0xd4] sm:$0xf0]  ;;  %v926_v20 = vld [vmem:[%s1317_s1 + $0xcc] sm:$0xf] }
  0x11   : > { %475 = vmatpush.bf16.msra.mxu3 %v897_v12  ;;  %v877_v21 = vor.u32 %v928_v19, %v876_v18  ;;  %v878_v22 = vld [vmem:[%s1317_s1 + $0xd8] sm:$0xf0]  ;;  %v852_v23 = vld [vmem:[%s1317_s1 + $0xa0] sm:$0xf]  ;;  %v923_v24 = vld [vmem:[%s1317_s1 + $0xac] sm:$0xf0] }
  0x12   : > { %v881_v25 = vor.u32 %v926_v20, %v878_v22  ;;  %v921_v26 = vld [vmem:[%s1317_s1 + $0xa4] sm:$0xf]  ;;  %v854_v27 = vld [vmem:[%s1317_s1 + $0xb0] sm:$0xf0]  ;;  %v860_v28 = vld [vmem:[%s1317_s1 + $0xa8] sm:$0xf]  ;;  %v853_v29 = vor.u32 %v923_v24, %v852_v23 }
  0x13   : > { %437 = vmatpush.bf16.msra.mxu0 %v869_v16  ;;  %v924_v30 = vld [vmem:[%s1317_s1 + $0xb4] sm:$0xf0]  ;;  %v922_v31 = vld [vmem:[%s1317_s1 + $0xac] sm:$0xf]  ;;  %v862_v32 = vld [vmem:[%s1317_s1 + $0xb8] sm:$0xf0]  ;;  %v857_v33 = vor.u32 %v921_v26, %v854_v27 }
  0x14   : > { %450 = vmatpush.bf16.msra.mxu1 %v873_v17  ;;  %463 = vmatpush.bf16.msra.mxu2 %v877_v21  ;;  %v861_v34 = vor.u32 %v924_v30, %v860_v28  ;;  %v836_v35 = vld [vmem:[%s1317_s1 + $0x80] sm:$0xf]  ;;  %v919_v36 = vld [vmem:[%s1317_s1 + $0x8c] sm:$0xf0]  ;;  %v917_v37 = vld [vmem:[%s1317_s1 + $0x84] sm:$0xf]  ;;  %v865_v38 = vor.u32 %v922_v31, %v862_v32 }
  0x15   : > { %476 = vmatpush.bf16.msra.mxu3 %v881_v25  ;;  %v838_v39 = vld [vmem:[%s1317_s1 + $0x90] sm:$0xf0]  ;;  %v844_v40 = vld [vmem:[%s1317_s1 + $0x88] sm:$0xf]  ;;  %v920_v41 = vld [vmem:[%s1317_s1 + $0x94] sm:$0xf0]  ;;  %v837_v44 = vor.u32 %v919_v36, %v836_v35 }
  0x16   : > { %v918_v42 = vld [vmem:[%s1317_s1 + $0x8c] sm:$0xf]  ;;  %v846_v43 = vld [vmem:[%s1317_s1 + $0x98] sm:$0xf0]  ;;  %v841_v45 = vor.u32 %v917_v37, %v838_v39  ;;  %v845_v46 = vor.u32 %v920_v41, %v844_v40  ;;  %v820_v47 = vld [vmem:[%s1317_s1 + $0x60] sm:$0xf] }
  0x17   : > { %438 = vmatpush.bf16.msra.mxu0 %v853_v29  ;;  %v915_v48 = vld [vmem:[%s1317_s1 + $0x6c] sm:$0xf0]  ;;  %v913_v49 = vld [vmem:[%s1317_s1 + $0x64] sm:$0xf]  ;;  %v849_v50 = vor.u32 %v918_v42, %v846_v43  ;;  %v822_v51 = vld [vmem:[%s1317_s1 + $0x70] sm:$0xf0] }
  0x18   : > { %451 = vmatpush.bf16.msra.mxu1 %v857_v33  ;;  %464 = vmatpush.bf16.msra.mxu2 %v861_v34  ;;  %v828_v52 = vld [vmem:[%s1317_s1 + $0x68] sm:$0xf]  ;;  %v916_v53 = vld [vmem:[%s1317_s1 + $0x74] sm:$0xf0]  ;;  %v914_v54 = vld [vmem:[%s1317_s1 + $0x6c] sm:$0xf]  ;;  %v821_v56 = vor.u32 %v915_v48, %v820_v47  ;;  %v825_v57 = vor.u32 %v913_v49, %v822_v51 }
  0x19   : > { %477 = vmatpush.bf16.msra.mxu3 %v865_v38  ;;  %v830_v55 = vld [vmem:[%s1317_s1 + $0x78] sm:$0xf0]  ;;  %v829_v58 = vor.u32 %v916_v53, %v828_v52  ;;  %v804_v59 = vld [vmem:[%s1317_s1 + $0x40] sm:$0xf]  ;;  %v911_v60 = vld [vmem:[%s1317_s1 + $0x4c] sm:$0xf0] }
  0x1a   : > { %v909_v61 = vld [vmem:[%s1317_s1 + $0x44] sm:$0xf]  ;;  %v833_v62 = vor.u32 %v914_v54, %v830_v55  ;;  %v806_v63 = vld [vmem:[%s1317_s1 + $0x50] sm:$0xf0]  ;;  %v812_v0 = vld [vmem:[%s1317_s1 + $0x48] sm:$0xf]  ;;  %v805_v4 = vor.u32 %v911_v60, %v804_v59 }
  0x1b   : > { %439 = vmatpush.bf16.msra.mxu0 %v837_v44  ;;  %v912_v1 = vld [vmem:[%s1317_s1 + $0x54] sm:$0xf0]  ;;  %v910_v2 = vld [vmem:[%s1317_s1 + $0x4c] sm:$0xf]  ;;  %v814_v3 = vld [vmem:[%s1317_s1 + $0x58] sm:$0xf0]  ;;  %v809_v6 = vor.u32 %v909_v61, %v806_v63 }
  0x1c   : > { %452 = vmatpush.bf16.msra.mxu1 %v841_v45  ;;  %465 = vmatpush.bf16.msra.mxu2 %v845_v46  ;;  %v788_v5 = vld [vmem:[%s1317_s1 + $0x20] sm:$0xf]  ;;  %v813_v7 = vor.u32 %v912_v1, %v812_v0  ;;  %v907_v8 = vld [vmem:[%s1317_s1 + $0x2c] sm:$0xf0]  ;;  %v905_v9 = vld [vmem:[%s1317_s1 + $0x24] sm:$0xf]  ;;  %v817_v11 = vor.u32 %v910_v2, %v814_v3 }
  0x1d   : > { %478 = vmatpush.bf16.msra.mxu3 %v849_v50  ;;  %v790_v10 = vld [vmem:[%s1317_s1 + $0x30] sm:$0xf0]  ;;  %v796_v12 = vld [vmem:[%s1317_s1 + $0x28] sm:$0xf]  ;;  %v908_v13 = vld [vmem:[%s1317_s1 + $0x34] sm:$0xf0]  ;;  %v789_v16 = vor.u32 %v907_v8, %v788_v5 }
  0x1e   : > { %v906_v14 = vld [vmem:[%s1317_s1 + $0x2c] sm:$0xf]  ;;  %v798_v15 = vld [vmem:[%s1317_s1 + $0x38] sm:$0xf0]  ;;  %v772_v17 = vld [vmem:[%s1317_s1] sm:$0xf]  ;;  %v793_v18 = vor.u32 %v905_v9, %v790_v10  ;;  %v797_v19 = vor.u32 %v908_v13, %v796_v12 }
  0x1f   : > { %440 = vmatpush.bf16.msra.mxu0 %v821_v56  ;;  %s1325_s12 = smov (!%p207_p4, %s988_s12), 1  ;;  %v903_v20 = vld [vmem:[%s1317_s1 + $0xc] sm:$0xf0]  ;;  %v901_v21 = vld [vmem:[%s1317_s1 + $0x4] sm:$0xf]  ;;  %v801_v23 = vor.u32 %v906_v14, %v798_v15 }
  0x20   : > { %453 = vmatpush.bf16.msra.mxu1 %v825_v57  ;;  %466 = vmatpush.bf16.msra.mxu2 %v829_v58  ;;  %v774_v22 = vld [vmem:[%s1317_s1 + $0x10] sm:$0xf0]  ;;  %v780_v24 = vld [vmem:[%s1317_s1 + $0x8] sm:$0xf]  ;;  %v904_v25 = vld [vmem:[%s1317_s1 + $0x14] sm:$0xf0]  ;;  %v773_v28 = vor.u32 %v903_v20, %v772_v17 }
  0x21   : > { %479 = vmatpush.bf16.msra.mxu3 %v833_v62  ;;  %s767_s25 = sshll.u32 %s1325_s12, 3  ;;  %v902_v26 = vld [vmem:[%s1317_s1 + $0xc] sm:$0xf]  ;;  %v782_v27 = vld [vmem:[%s1317_s1 + $0x18] sm:$0xf0]  ;;  %v777_v30 = vor.u32 %v901_v21, %v774_v22  ;;  %v781_v31 = vor.u32 %v904_v25, %v780_v24  ;;  %s900_s8 = sshll.u32 %s1325_s12, 5 }
  0x22   : > { %s210_s5 = scalar_lea.vmem %s1316_s0, %s767_s25  ;;  %v785_v32 = vor.u32 %v902_v26, %v782_v27  ;;  %v266_v34 = vld [vmem:[%s1318_s2] sm:$0xf]  ;;  %s1296_s11 = scalar_lea.vmem %s1319_s3, %s900_s8 }
  0x23   : > { %441 = vmatpush.bf16.msra.mxu0 %v805_v4  ;;  %v232_v29 = vld [vmem:[%s210_s5] sm:$0xff]  ;;  %v268_v35 = vperm.slane %v266_v34, 0  ;;  %v269_v36 = vperm.slane %v266_v34, 1  ;;  %v270_v43 = vperm.slane %v266_v34, 2  ;;  %v271_v50 = vperm.slane %v266_v34, 3 }
  0x24   : > { %454 = vmatpush.bf16.msra.mxu1 %v809_v6  ;;  %467 = vmatpush.bf16.msra.mxu2 %v813_v7  ;;  %v233_v33 = vpack.c.bf16 %v232_v29, %v232_v29 }
  0x25   : > { %480 = vmatpush.bf16.msra.mxu3 %v817_v11 }
  0x27   : > { %442 = vmatpush.bf16.msra.mxu0 %v789_v16 }
  0x28   : > { %455 = vmatpush.bf16.msra.mxu1 %v793_v18  ;;  %468 = vmatpush.bf16.msra.mxu2 %v797_v19 }
  0x29   : > { %481 = vmatpush.bf16.msra.mxu3 %v801_v23 }
  0x2b   : > { %443 = vmatpush.bf16.msra.mxu0 %v773_v28 }
  0x2c   : > { %456 = vmatpush.bf16.msra.mxu1 %v777_v30  ;;  %469 = vmatpush.bf16.msra.mxu2 %v781_v31 }
  0x2d   : > { %482 = vmatpush.bf16.msra.mxu3 %v785_v32 }
  0x2e   : > { %444 = vmatmul.bf16.vlgmr.msra.gmra.mxu0 %v233_v33 }
  0x2f   : > { %457 = vmatmul.bf16.vlgmr.msra.gmra.mxu1 %v233_v33  ;;  %470 = vmatmul.bf16.vlgmr.msra.gmra.mxu2 %v233_v33 }
  0x30   : > { %483 = vmatmul.bf16.vlgmr.msra.gmra.mxu3 %v233_v33 }
  0xab   : > { %v445_v37 = vpop.f32.mrf.mxu0 }
  0xac   : > { %v1242_v38 = vadd.f32 %v445_v37, %v268_v35  ;;  %v458_v39 = vpop.f32.mrf.mxu1 }
  0xad   : > { %v1244_v40 = vadd.f32 %v458_v39, %v269_v36 }
  0xae   : > { %v1247_v41 = vmul.f32 0.70710677, %v1242_v38 }
  0xaf   : > { %v1250_v42 = vmul.f32 0.70710677, %v1244_v40 }
  0xb0   : > { %v504_v44 = vand.u32 2147483647, %v1247_v41 }
  0xb1   : > { %v1254_v45 = vand.u32 2147483647, %v1250_v42 }
  0xb2   : > { %v508_v46 = vmul.f32 0.3275911, %v504_v44  ;;  %v471_v47 = vpop.f32.mrf.mxu2  ;;  %v612_v15 = vsub.f32 0.0, %v504_v44 }
  0xb3   : > { %v509_v48 = vmul.f32 0.3275911, %v1254_v45  ;;  %v1257_v49 = vadd.f32 %v471_v47, %v270_v43  ;;  %v484_v51 = vpop.f32.mrf.mxu3  ;;  %v447_v52 = vpop.f32.mrf.mxu0  ;;  %v613_v19 = vsub.f32 0.0, %v1254_v45 }
  0xb4   : > { %v512_v53 = vadd.f32 1.0, %v508_v46  ;;  %v460_v54 = vpop.f32.mrf.mxu1  ;;  %v1262_v57 = vadd.f32 %v484_v51, %v271_v50  ;;  %v616_v27 = vmul.f32 %v612_v15, %v504_v44 }
  0xb5   : > { %v513_v55 = vadd.f32 1.0, %v509_v48  ;;  %v1260_v56 = vmul.f32 0.70710677, %v1257_v49  ;;  %v617_v32 = vmul.f32 %v613_v19, %v1254_v45 }
  0xb6   : > { %958 = vrcp.f32 %v512_v53  ;;  %v1269_v61 = vmul.f32 0.70710677, %v1262_v57  ;;  %vm521_vm0 = vweird.f32 %v512_v53  ;;  %v525_v6 = vand.u32 2147483647, %v512_v53 }
  0xb7   : > { %960 = vrcp.f32 %v513_v55  ;;  %v1265_v58 = vand.u32 2147483647, %v1260_v56  ;;  %v527_v7 = vand.u32 2147483648, %v512_v53  ;;  %v542_v10 = vand.u32 2147483648, %v513_v55 }
  0xb8   : > { %v1272_v4 = vand.u32 2147483647, %v1269_v61  ;;  %vm536_vm2 = vweird.f32 %v513_v55  ;;  %v540_v13 = vand.u32 2147483647, %v513_v55  ;;  %vm526_vm5 = vcmp.eq.f32.partialorder %v525_v6, 8.507059e+37 }
  0xb9   : > { %v510_v60 = vmul.f32 0.3275911, %v1265_v58  ;;  %v528_v17 = vor.u32 1.1754944e-38, %v527_v7  ;;  %v543_v22 = vor.u32 1.1754944e-38, %v542_v10  ;;  %v620_v43 = vmul.f32 1.442695, %v616_v27 }
  0xba   : > { %v473_v59 = vpop.f32.mrf.mxu2  ;;  %v511_v11 = vmul.f32 0.3275911, %v1272_v4  ;;  %vm541_vm7 = vcmp.eq.f32.partialorder %v540_v13, 8.507059e+37  ;;  %v622_v50 = vmul.f32 1.442695, %v617_v32  ;;  %v614_v52 = vsub.f32 0.0, %v1265_v58 }
  0xbb   : > { %v486_v62 = vpop.f32.mrf.mxu3  ;;  %v514_v2 = vadd.f32 1.0, %v510_v60  ;;  %v615_v15 = vsub.f32 0.0, %v1272_v4 }
  0xbc   : > { %v959_v63 = vpop.eup %958  ;;  %v1275_v16 = vadd.f32 1.0, %v511_v11 }
  0xbd   : > { %v961_v0 = vpop.eup %960  ;;  %v517_v1 = vmul.f32 %v959_v63, %v512_v53  ;;  %962 = vrcp.f32 %v514_v2  ;;  %vm522_vm1 = vweird.f32 %v959_v63  ;;  %v557_v33 = vand.u32 2147483648, %v514_v2 }
  0xbe   : > { %v532_v3 = vmul.f32 %v961_v0, %v513_v55  ;;  %vm537_vm3 = vweird.f32 %v961_v0  ;;  %vm523_vm4 = vmor %vm521_vm0, %vm522_vm1  ;;  %964 = vrcp.f32 %v1275_v16  ;;  %v555_v36 = vand.u32 2147483647, %v514_v2 }
  0xbf   : > { %v518_v5 = vsub.f32 1.0, %v517_v1  ;;  %vm538_vm6 = vmor %vm536_vm2, %vm537_vm3  ;;  %vm551_vm9 = vweird.f32 %v514_v2  ;;  %v558_v51 = vor.u32 1.1754944e-38, %v557_v33  ;;  %v570_v60 = vand.u32 2147483647, %v1275_v16 }
  0xc0   : > { %v533_v8 = vsub.f32 1.0, %v532_v3  ;;  %vm556_vm11 = vcmp.eq.f32.partialorder %v555_v36, 8.507059e+37  ;;  %v572_v62 = vand.u32 2147483648, %v1275_v16  ;;  %966 = vpow2.f32 %v620_v43 }
  0xc1   : > { %v519_v9 = vmul.f32 %v959_v63, %v518_v5  ;;  %vm566_vm13 = vweird.f32 %v1275_v16  ;;  %968 = vpow2.f32 %v622_v50  ;;  %vm571_vm15 = vcmp.eq.f32.partialorder %v570_v60, 8.507059e+37 }
  0xc2   : > { %v534_v12 = vmul.f32 %v961_v0, %v533_v8  ;;  %v618_v8 = vmul.f32 %v614_v52, %v1265_v58  ;;  %vm496_vm0 = vcmp.ge.f32.partialorder %v1247_v41, 0.0  ;;  %v619_v27 = vmul.f32 %v615_v15, %v1272_v4 }
  0xc3   : > { %v520_v14 = vadd.f32 %v959_v63, %v519_v9  ;;  %v963_v20 = vpop.eup %962  ;;  %v573_v9 = vor.u32 1.1754944e-38, %v572_v62  ;;  %vm497_vm1 = vcmp.ge.f32.partialorder %v1250_v42, 0.0  ;;  %v998_v33 = vmov -1.0  }
  0xc4   : > { %v535_v18 = vadd.f32 %v961_v0, %v534_v12  ;;  %v547_v25 = vmul.f32 %v963_v20, %v514_v2  ;;  %vm552_vm8 = vweird.f32 %v963_v20  ;;  %v965_v37 = vpop.eup %964  ;;  %v488_v4 = vmul.f32 0.5, %v1242_v38 }
  0xc5   : > { %v524_v21 = vsel %vm523_vm4, %v959_v63, %v520_v14  ;;  %v562_v48 = vmul.f32 %v965_v37, %v1275_v16  ;;  %vm553_vm10 = vmor %vm551_vm9, %vm552_vm8  ;;  %vm567_vm12 = vweird.f32 %v965_v37  ;;  %v624_v16 = vmul.f32 1.442695, %v618_v8 }
  0xc6   : > { %v529_v23 = vsel %vm526_vm5, %v528_v17, %v524_v21  ;;  %v539_v24 = vsel %vm538_vm6, %v961_v0, %v535_v18  ;;  %v548_v30 = vsub.f32 1.0, %v547_v25  ;;  %vm568_vm14 = vmor %vm566_vm13, %vm567_vm12  ;;  %vm498_vm2 = vcmp.ge.f32.partialorder %v1260_v56, 0.0 }
  0xc7   : > { %v576_v26 = vmul.f32 1.0614054, %v529_v23  ;;  %v544_v28 = vsel %vm541_vm7, %v543_v22, %v539_v24  ;;  %v563_v54 = vsub.f32 1.0, %v562_v48  ;;  %970 = vpow2.f32 %v624_v16 }
  0xc8   : > { %v577_v29 = vmul.f32 1.0614054, %v544_v28  ;;  %v549_v35 = vmul.f32 %v963_v20, %v548_v30  ;;  %v502_v60 = vsel %vm498_vm2, 1.0, %v998_v33  ;;  %vm499_vm3 = vcmp.ge.f32.partialorder %v1269_v61, 0.0 }
  0xc9   : > { %v580_v31 = vadd.f32 -1.4531521, %v576_v26  ;;  %v564_v1 = vmul.f32 %v965_v37, %v563_v54 }
  0xca   : > { %v581_v34 = vadd.f32 -1.4531521, %v577_v29  ;;  %v550_v47 = vadd.f32 %v963_v20, %v549_v35 }
  0xcb   : > { %v584_v39 = vmul.f32 %v580_v31, %v529_v23  ;;  %v565_v6 = vadd.f32 %v965_v37, %v564_v1 }
  0xcc   : > { %v585_v46 = vmul.f32 %v581_v34, %v544_v28  ;;  %v554_v53 = vsel %vm553_vm10, %v963_v20, %v550_v47  ;;  %v967_v20 = vpop.eup %966  ;;  %v489_v47 = vmul.f32 0.5, %v1244_v40 }
  0xcd   : > { %v588_v44 = vadd.f32 1.4214138, %v584_v39  ;;  %v559_v59 = vsel %vm556_vm11, %v558_v51, %v554_v53  ;;  %v569_v12 = vsel %vm568_vm14, %v965_v37, %v565_v6  ;;  %v969_v58 = vpop.eup %968  ;;  %v501_v37 = vsel %vm497_vm1, 1.0, %v998_v33 }
  0xce   : > { %v589_v45 = vadd.f32 1.4214138, %v585_v46  ;;  %v578_v0 = vmul.f32 1.0614054, %v559_v59  ;;  %v574_v14 = vsel %vm571_vm15, %v573_v9, %v569_v12  ;;  %v626_v39 = vmul.f32 1.442695, %v619_v27  ;;  %v971_v51 = vpop.eup %970 }
  0xcf   : > { %v592_v55 = vmul.f32 %v588_v44, %v529_v23  ;;  %v579_v19 = vmul.f32 1.0614054, %v574_v14  ;;  %v491_v6 = vmul.f32 0.5, %v1262_v57 }
  0xd0   : > { %v593_v63 = vmul.f32 %v589_v45, %v544_v28  ;;  %v582_v5 = vadd.f32 -1.4531521, %v578_v0  ;;  %972 = vpow2.f32 %v626_v39 }
  0xd1   : > { %v596_v2 = vadd.f32 -0.28449672, %v592_v55  ;;  %v583_v25 = vadd.f32 -1.4531521, %v579_v19 }
  0xd2   : > { %v597_v3 = vadd.f32 -0.28449672, %v593_v63  ;;  %v586_v11 = vmul.f32 %v582_v5, %v559_v59 }
  0xd3   : > { %v600_v7 = vmul.f32 %v596_v2, %v529_v23  ;;  %v587_v31 = vmul.f32 %v583_v25, %v574_v14 }
  0xd4   : > { %v601_v10 = vmul.f32 %v597_v3, %v544_v28  ;;  %v590_v18 = vadd.f32 1.4214138, %v586_v11  ;;  %v503_v3 = vsel %vm499_vm3, 1.0, %v998_v33 }
  0xd5   : > { %v604_v13 = vadd.f32 0.2548296, %v600_v7  ;;  %v591_v35 = vadd.f32 1.4214138, %v587_v31 }
  0xd6   : > { %v605_v17 = vadd.f32 0.2548296, %v601_v10  ;;  %v594_v24 = vmul.f32 %v590_v18, %v559_v59  ;;  %v973_v63 = vpop.eup %972 }
  0xd7   : > { %v608_v21 = vmul.f32 %v604_v13, %v529_v23  ;;  %v500_v23 = vsel %vm496_vm0, 1.0, %v998_v33  ;;  %v595_v46 = vmul.f32 %v591_v35, %v574_v14 }
  0xd8   : > { %v609_v22 = vmul.f32 %v605_v17, %v544_v28  ;;  %v598_v30 = vadd.f32 -0.28449672, %v594_v24 }
  0xd9   : > { %v628_v26 = vmul.f32 %v967_v20, %v608_v21  ;;  %v599_v50 = vadd.f32 -0.28449672, %v595_v46 }
  0xda   : > { %v629_v29 = vmul.f32 %v969_v58, %v609_v22  ;;  %v602_v28 = vmul.f32 %v598_v30, %v559_v59 }
  0xdb   : > { %v632_v32 = vsub.f32 1.0, %v628_v26  ;;  %v603_v53 = vmul.f32 %v599_v50, %v574_v14 }
  0xdc   : > { %v633_v34 = vsub.f32 1.0, %v629_v29  ;;  %v606_v43 = vadd.f32 0.2548296, %v602_v28 }
  0xdd   : > { %v636_v36 = vmul.f32 %v632_v32, %v500_v23  ;;  %v607_v55 = vadd.f32 0.2548296, %v603_v53 }
  0xde   : > { %v637_v41 = vmul.f32 %v633_v34, %v501_v37  ;;  %v610_v44 = vmul.f32 %v606_v43, %v559_v59  ;;  %v490_v59 = vmul.f32 0.5, %v1257_v49 }
  0xdf   : > { %v640_v42 = vadd.f32 1.0, %v636_v36  ;;  %v611_v40 = vmul.f32 %v607_v55, %v574_v14 }
  0xe0   : > { %v641_v48 = vadd.f32 1.0, %v637_v41  ;;  %v630_v38 = vmul.f32 %v971_v51, %v610_v44 }
  0xe1   : > { %v644_v52 = vmul.f32 %v640_v42, %v488_v4  ;;  %v631_v1 = vmul.f32 %v973_v63, %v611_v40 }
  0xe2   : > { %v645_v45 = vmul.f32 %v641_v48, %v489_v47  ;;  %v634_v54 = vsub.f32 1.0, %v630_v38 }
  0xe3   : > { %648 = vst [vmem:[%s1296_s11] sm:$0xff] %v644_v52  ;;  %v635_v56 = vsub.f32 1.0, %v631_v1 }
  0xe4   : > { %649 = vst [vmem:[%s1296_s11 + $0x8] sm:$0xff] %v645_v45  ;;  %v638_v62 = vmul.f32 %v634_v54, %v502_v60 }
  0xe5   : > { %v639_v5 = vmul.f32 %v635_v56, %v503_v3 }
  0xe6   : > { %v642_v0 = vadd.f32 1.0, %v638_v62 }
  0xe7   : > { %v643_v7 = vadd.f32 1.0, %v639_v5 }
  0xe8   : > { %v646_v2 = vmul.f32 %v642_v0, %v490_v59 }
  0xe9   : > { %v647_v8 = vmul.f32 %v643_v7, %v491_v6 }
  0xea   : > { %650 = vst [vmem:[%s1296_s11 + $0x10] sm:$0xff] %v646_v2 }
  0xeb   : > { %651 = vst [vmem:[%s1296_s11 + $0x18] sm:$0xff] %v647_v8 }
  0xec PF: > { %s13_s14 = sadd.s32 1, %s996_s14   ;;  %s1320_s12 = smov %s992_s13 }
  0xed   : > { %p10_p5 = scmp.ge.s32.totalorder %s13_s14, 4   ;;  %s1321_s13 = smov %s1323_s15 }
  0xef   :  { %12 = sbr.rel (!%p10_p5) target bundleno = 2 (0x2), region = 68 }

// kernel: forward.30
= control target key start
LH: loop header
LB: loop body
LE: loop exit
PB: predicated region body
PF: predicated region fallthrough
CT: control target
= control target key end

     0   :  { %s924_s21 = smov 0   ;;  %s1061_s0 = inlined_call_operand.vmem [shape: f32[16,512], index: 0, kind: input, shape index: {}]   ;;  %s1062_s1 = inlined_call_operand.vmem [shape: bf16[512,128], index: 1, kind: input, shape index: {}]   ;;  %s1063_s2 = inlined_call_operand.vmem [shape: f32[1,128], index: 2, kind: input, shape index: {}]   ;;  %s1064_s3 = inlined_call_operand.vmem [shape: f32[16,128], index: 3, kind: input, shape index: {}]   ;;  %s1065_s4 = inlined_call_operand.vmem [shape: f32[1,128], index: 4, kind: input, shape index: {}]   ;;  %s1066_s5 = inlined_call_operand.vmem [shape: f32[1,128], index: 5, kind: input, shape index: {}]   ;;  %s1067_s6 = inlined_call_operand.vmem [shape: f32[16,128], index: 6, kind: output, shape index: {}]  }
   0x1 LB: > { %s692_s22 = sadd.s32 4294967295, %s886_s21   ;;  %p696_p0 = scmp.ge.s32.totalorder %s886_s21, 1  ;;  %s886_s21 = sphi %s924_s21, %s16_s21  }
   0x2   : > { %p221_p1 = scmp.lt.s32.totalorder %s886_s21, 3 }
   0x4   : > { %p222_p2 = pnand %p696_p0, %p221_p1 }
   0x5   : > { %p254_p3 = scmp.lt.s32.totalorder (!%p222_p2), %s692_s22, 1 }
   0x6   : > { %225 = sbr.rel (%p222_p2) target bundleno = 450 (0x1c2), region = 44 }
   0xb   : > { %v839_v0 = vld [vmem:[%s1062_s1 + $0x38] sm:$0xff]  ;;  %v838_v4 = vld [vmem:[%s1062_s1 + $0x30] sm:$0xff]  ;;  %v837_v8 = vld [vmem:[%s1062_s1 + $0x28] sm:$0xff]  ;;  %s1069_s22 = smov (!%p254_p3, %s692_s22), 1  ;;  %v888_v55 = vmov 128.0  }
   0xc   : > { %v847_v1 = vld [vmem:[%s1062_s1 + $0x78] sm:$0xff]  ;;  %535 = vmatpush.bf16.msra.mxu0 %v839_v0  ;;  %v846_v5 = vld [vmem:[%s1062_s1 + $0x70] sm:$0xff]  ;;  %v845_v9 = vld [vmem:[%s1062_s1 + $0x68] sm:$0xff]  ;;  %s831_s27 = sshll.u32 %s1069_s22, 5  ;;  %876 = vrcp.f32 %v888_v55 }
   0xd   : > { %v855_v2 = vld [vmem:[%s1062_s1 + $0xb8] sm:$0xff]  ;;  %548 = vmatpush.bf16.msra.mxu1 %v847_v1  ;;  %v854_v6 = vld [vmem:[%s1062_s1 + $0xb0] sm:$0xff]  ;;  %v853_v10 = vld [vmem:[%s1062_s1 + $0xa8] sm:$0xff]  ;;  %s258_s14 = scalar_lea.vmem %s1061_s0, %s831_s27  ;;  %s699_s27 = sshll.u32 %s1069_s22, 3 }
   0xe   : > { %v863_v3 = vld [vmem:[%s1062_s1 + $0xf8] sm:$0xff]  ;;  %561 = vmatpush.bf16.msra.mxu2 %v855_v2  ;;  %v862_v7 = vld [vmem:[%s1062_s1 + $0xf0] sm:$0xff]  ;;  %v861_v11 = vld [vmem:[%s1062_s1 + $0xe8] sm:$0xff]  ;;  %s262_s30 = scalar_lea.vmem %s1064_s3, %s699_s27  ;;  %s266_s13 = scalar_lea.vmem %s1067_s6, %s699_s27 }
   0xf   : > { %574 = vmatpush.bf16.msra.mxu3 %v863_v3  ;;  %v836_v12 = vld [vmem:[%s1062_s1 + $0x20] sm:$0xff]  ;;  %v835_v16 = vld [vmem:[%s1062_s1 + $0x18] sm:$0xff]  ;;  %v834_v20 = vld [vmem:[%s1062_s1 + $0x10] sm:$0xff] }
  0x10   : > { %536 = vmatpush.bf16.msra.mxu0 %v838_v4  ;;  %v844_v13 = vld [vmem:[%s1062_s1 + $0x60] sm:$0xff]  ;;  %v843_v17 = vld [vmem:[%s1062_s1 + $0x58] sm:$0xff]  ;;  %v842_v21 = vld [vmem:[%s1062_s1 + $0x50] sm:$0xff] }
  0x11   : > { %549 = vmatpush.bf16.msra.mxu1 %v846_v5  ;;  %v852_v14 = vld [vmem:[%s1062_s1 + $0xa0] sm:$0xff]  ;;  %v851_v18 = vld [vmem:[%s1062_s1 + $0x98] sm:$0xff]  ;;  %v850_v22 = vld [vmem:[%s1062_s1 + $0x90] sm:$0xff] }
  0x12   : > { %562 = vmatpush.bf16.msra.mxu2 %v854_v6  ;;  %v860_v15 = vld [vmem:[%s1062_s1 + $0xe0] sm:$0xff]  ;;  %v859_v19 = vld [vmem:[%s1062_s1 + $0xd8] sm:$0xff]  ;;  %v858_v23 = vld [vmem:[%s1062_s1 + $0xd0] sm:$0xff]  ;;  %v877_v56 = vpop.eup %876 }
  0x13   : > { %575 = vmatpush.bf16.msra.mxu3 %v862_v7  ;;  %v833_v24 = vld [vmem:[%s1062_s1 + $0x8] sm:$0xff]  ;;  %v832_v28 = vld [vmem:[%s1062_s1] sm:$0xff]  ;;  %v269_v34 = vld [vmem:[%s258_s14 + $0x10] sm:$0xff]  ;;  %v592_v57 = vmul.f32 128.0, %v877_v56  ;;  %vm596_vm0 = vweird.f32 %v877_v56 }
  0x14   : > { %537 = vmatpush.bf16.msra.mxu0 %v837_v8  ;;  %v841_v25 = vld [vmem:[%s1062_s1 + $0x48] sm:$0xff]  ;;  %v840_v29 = vld [vmem:[%s1062_s1 + $0x40] sm:$0xff]  ;;  %v270_v35 = vld [vmem:[%s258_s14 + $0x18] sm:$0xff]  ;;  %v273_v38 = vpack.c.bf16 %v269_v34, %v269_v34 }
  0x15   : > { %550 = vmatpush.bf16.msra.mxu1 %v845_v9  ;;  %v849_v26 = vld [vmem:[%s1062_s1 + $0x88] sm:$0xff]  ;;  %v848_v30 = vld [vmem:[%s1062_s1 + $0x80] sm:$0xff]  ;;  %v274_v39 = vpack.c.bf16 %v270_v35, %v270_v35  ;;  %v593_v58 = vsub.f32 1.0, %v592_v57 }
  0x16   : > { %563 = vmatpush.bf16.msra.mxu2 %v853_v10  ;;  %v857_v27 = vld [vmem:[%s1062_s1 + $0xc8] sm:$0xff]  ;;  %v267_v31 = vld [vmem:[%s258_s14] sm:$0xff] }
  0x17   : > { %576 = vmatpush.bf16.msra.mxu3 %v861_v11  ;;  %v268_v32 = vld [vmem:[%s258_s14 + $0x8] sm:$0xff]  ;;  %v856_v33 = vld [vmem:[%s1062_s1 + $0xc0] sm:$0xff]  ;;  %v271_v36 = vpack.c.bf16 %v267_v31, %v267_v31  ;;  %v594_v59 = vmul.f32 %v877_v56, %v593_v58 }
  0x18   : > { %538 = vmatpush.bf16.msra.mxu0 %v836_v12  ;;  %v272_v37 = vpack.c.bf16 %v268_v32, %v268_v32  ;;  %v873_v40 = vld [vmem:[%s1063_s2] ss:$0 sm:$0xff] }
  0x19   : > { %551 = vmatpush.bf16.msra.mxu1 %v844_v13  ;;  %v587_v50 = vld [vmem:[%s262_s30] sm:$0xff]  ;;  %v595_v60 = vadd.f32 %v877_v56, %v594_v59 }
  0x1a   : > { %564 = vmatpush.bf16.msra.mxu2 %v852_v14  ;;  %v874_v11 = vld [vmem:[%s1065_s4] ss:$0 sm:$0xff] }
  0x1b   : > { %577 = vmatpush.bf16.msra.mxu3 %v860_v15  ;;  %v597_v61 = vsel %vm596_vm0, %v877_v56, %v595_v60  ;;  %v875_v13 = vld [vmem:[%s1066_s5] ss:$0 sm:$0xff] }
  0x1c   : > { %539 = vmatpush.bf16.msra.mxu0 %v835_v16 }
  0x1d   : > { %552 = vmatpush.bf16.msra.mxu1 %v843_v17 }
  0x1e   : > { %565 = vmatpush.bf16.msra.mxu2 %v851_v18 }
  0x1f   : > { %578 = vmatpush.bf16.msra.mxu3 %v859_v19 }
  0x20   : > { %540 = vmatpush.bf16.msra.mxu0 %v834_v20 }
  0x21   : > { %553 = vmatpush.bf16.msra.mxu1 %v842_v21 }
  0x22   : > { %566 = vmatpush.bf16.msra.mxu2 %v850_v22 }
  0x23   : > { %579 = vmatpush.bf16.msra.mxu3 %v858_v23 }
  0x24   : > { %541 = vmatpush.bf16.msra.mxu0 %v833_v24 }
  0x25   : > { %554 = vmatpush.bf16.msra.mxu1 %v841_v25 }
  0x26   : > { %567 = vmatpush.bf16.msra.mxu2 %v849_v26 }
  0x27   : > { %580 = vmatpush.bf16.msra.mxu3 %v857_v27 }
  0x28   : > { %542 = vmatpush.bf16.msra.mxu0 %v832_v28 }
  0x29   : > { %555 = vmatpush.bf16.msra.mxu1 %v840_v29 }
  0x2a   : > { %568 = vmatpush.bf16.msra.mxu2 %v848_v30 }
  0x2b   : > { %581 = vmatpush.bf16.msra.mxu3 %v856_v33  ;;  %543 = vmatmul.bf16.vlgmr.msra.gmra.mxu0 %v271_v36 }
  0x2c   : > { %556 = vmatmul.bf16.vlgmr.msra.gmra.mxu1 %v272_v37 }
  0x2d   : > { %569 = vmatmul.bf16.vlgmr.msra.gmra.mxu2 %v273_v38 }
  0x2e   : > { %582 = vmatmul.bf16.vlgmr.msra.gmra.mxu3 %v274_v39 }
  0xa8   : > { %v544_v41 = vpop.f32.mrf.mxu0 }
  0xa9   : > { %v557_v42 = vpop.f32.mrf.mxu1  ;;  %v545_v43 = vadd.f32 %v873_v40, %v544_v41 }
  0xab   : > { %v558_v44 = vadd.f32 %v557_v42, %v545_v43 }
  0xb0   : > { %v570_v45 = vpop.f32.mrf.mxu2  ;;  %v546_v48 = vpop.f32.mrf.mxu0 }
  0xb1   : > { %v583_v46 = vpop.f32.mrf.mxu3  ;;  %v571_v47 = vadd.f32 %v570_v45, %v558_v44  ;;  %v559_v49 = vpop.f32.mrf.mxu1 }
  0xb3   : > { %v584_v51 = vadd.f32 %v583_v46, %v571_v47 }
  0xb5   : > { %v588_v52 = vadd.f32 %v587_v50, %v584_v51 }
  0xb7   : > { %589 = vadd.xlane.f32.xlu0 %v588_v52 }
  0xb8   : > { %v572_v53 = vpop.f32.mrf.mxu2 }
  0xb9   : > { %v585_v54 = vpop.f32.mrf.mxu3 }
 0x12a   : > { %v590_v62 = vpop.xlane.xlu0 %589 }
 0x12b   : > { %v598_v63 = vmul.f32 %v597_v61, %v590_v62 }
 0x12d   : > { %v599_v0 = vsub.f32 %v588_v52, %v598_v63 }
 0x12f   : > { %v600_v1 = vmul.f32 %v599_v0, %v599_v0 }
 0x131   : > { %601 = vadd.xlane.f32.xlu0 %v600_v1 }
 0x1a4   : > { %v602_v2 = vpop.xlane.xlu0 %601 }
 0x1a5   : > { %v603_v3 = vmul.f32 %v602_v2, %v597_v61 }
 0x1a7   : > { %v604_v4 = vadd.f32 1e-05, %v603_v3 }
 0x1a9   : > { %878 = vrsqrt.f32 %v604_v4  ;;  %vm611_vm2 = vweird.f32 %v604_v4 }
 0x1af   : > { %v879_v5 = vpop.eup %878 }
 0x1b0   : > { %v606_v6 = vmul.f32 %v879_v5, %v604_v4  ;;  %vm612_vm1 = vweird.f32 %v879_v5 }
 0x1b1   : > { %vm613_vm3 = vmor %vm611_vm2, %vm612_vm1 }
 0x1b2   : > { %v607_v7 = vmul.f32 %v879_v5, %v606_v6 }
 0x1b4   : > { %v608_v8 = vmul.f32 0.5, %v607_v7 }
 0x1b6   : > { %v609_v9 = vsub.f32 1.5, %v608_v8 }
 0x1b8   : > { %v610_v10 = vmul.f32 %v879_v5, %v609_v9 }
 0x1ba   : > { %v614_v12 = vsel %vm613_vm3, %v879_v5, %v610_v10 }
 0x1bb   : > { %v615_v14 = vmul.f32 %v614_v12, %v599_v0 }
 0x1bd   : > { %v620_v15 = vmul.f32 %v874_v11, %v615_v14 }
 0x1bf   : > { %v625_v16 = vadd.f32 %v875_v13, %v620_v15 }
 0x1c1   : > { %626 = vst [vmem:[%s266_s13] sm:$0xff] %v625_v16 }
 0x1c2 PF: > { %s16_s21 = sadd.s32 1, %s886_s21  }
 0x1c3   : > { %p13_p4 = scmp.ge.s32.totalorder %s16_s21, 4  }
 0x1c5   :  { %15 = sbr.rel (!%p13_p4) target bundleno = 1 (0x1), region = 77 }

// kernel: forward.41
= control target key start
LH: loop header
LB: loop body
LE: loop exit
PB: predicated region body
PF: predicated region fallthrough
CT: control target
= control target key end

     0   :  { %8 = vsyncpa [#allocation3], 0  ;;  %s916_s0 = inlined_call_operand.vmem [shape: f32[16,128], index: 0, kind: input, shape index: {}]   ;;  %s917_s1 = inlined_call_operand.vmem [shape: bf16[128,256], index: 1, kind: input, shape index: {}]   ;;  %s918_s2 = inlined_call_operand.vmem [shape: f32[1,256], index: 2, kind: input, shape index: {}]   ;;  %s919_s3 = inlined_call_operand.hbm [shape: f32[16,256], index: 3, kind: output, shape index: {}]  }
   0x1   :  { %10 = vsyncpa [#allocation3 + $0x1], 0  ;;  %s720_s12 = smov 0   ;;  %s722_s13 = smov 0  }
   0x2   :  { %s724_s14 = smov 0   ;;  %s726_s15 = smov 0  }
   0x3   :  { %s728_s16 = smov 0   ;;  %s730_s17 = smov 0  }
   0x4 LB: > { %s470_s18 = sadd.s32 4294967295, %s698_s17   ;;  %s471_s19 = sadd.s32 4294967294, %s698_s17   ;;  %s698_s17 = sphi %s730_s17, %s16_s17   ;;  %s694_s16 = sphi %s728_s16, %s926_s16   ;;  %s690_s15 = sphi %s726_s15, %s925_s15   ;;  %s686_s14 = sphi %s724_s14, %s924_s14   ;;  %s682_s13 = sphi %s722_s13, %s923_s13   ;;  %s678_s12 = sphi %s720_s12, %s922_s12  }
   0x5   : > { %s28_s20 = sadd.s32 1, %s694_s16  ;;  %s115_s21 = sadd.s32 1, %s686_s14 }
   0x6   : > { %p30_p0 = scmp.ge.s32.totalorder %s28_s20, 2  ;;  %p125_p1 = scmp.ne.s32.totalorder %s686_s14, %s682_s13 }
   0x7   : > { %p126_p2 = scmp.eq.s32.totalorder %s470_s18, 1  ;;  %p131_p3 = scmp.ne.s32.totalorder %s682_s13, %s678_s12 }
   0x8   : > { %s928_s20 = smov (%p30_p0, %s28_s20), 0  ;;  %p132_p5 = scmp.eq.s32.totalorder %s471_s19, 1 }
   0x9   : > { %p760_p4 = por %p126_p2, %p125_p1  ;;  %s110_s23 = ssub.s32 %s694_s16, %s928_s20 }
   0xa   : > { %p476_p6 = scmp.ge.s32.totalorder %s698_s17, 1  ;;  %p113_p7 = scmp.eq.s32.totalorder %s110_s23, 0 }
   0xb   : > { %p767_p8 = por %p132_p5, %p131_p3  ;;  %p174_p9 = scmp.lt.s32.totalorder %s698_s17, 3 }
   0xc   : > { %s773_s25 = scalar_select %p113_p7, %s686_s14, %s115_s21  }
   0xd   : > { %p175_p10 = pnand %p476_p6, %p174_p9 }
   0xe   : > { %p206_p11 = scmp.lt.s32.totalorder (!%p175_p10), %s690_s15, 1  ;;  %s203_s27 = sand.u32 (!%p175_p10), 1, %s682_s13  }
   0xf   : > { %178 = sbr.rel (%p175_p10) target bundleno = 189 (0xbd), region = 32  ;;  %s564_s28 = sshll.u32 (!%p175_p10), %s690_s15, 4 }
  0x10   : > { %s477_s4 = sshll.u32 (!%p175_p10), %s203_s27, 4  ;;  %s368_s7 = scalar_lea.hbm (!%p175_p10), %s919_s3, %s564_s28 }
  0x11   : > { %s205_s8 = scalar_lea.vmem (!%p175_p10), [#allocation2], %s477_s4  ;;  %s372_s10 = sshll.u32 (!%p175_p10), %s368_s7, 4  ;;  %s373_s10 = int_to_ptr.hbm [resolvable:$true] %s372_s10 }
  0x12   : > { %s370_s9 = sshll.u32 (!%p175_p10), %s205_s8, 4  ;;  %s634_s11 = sshra.s32 (!%p175_p10), %s373_s10, 4  ;;  %s371_s9 = int_to_ptr.vmem [resolvable:$true] %s370_s9  ;;  %s635_s11 = int_to_ptr.hbm [resolvable:$true] %s634_s11 }
  0x13   : > { %s640_s23 = scalar_lea.hbm (!%p175_p10), %s919_s3, 32  ;;  %p641_p1 = scmp.lt.s32.totalorder (!%p175_p10), %s635_s11, %s919_s3 }
  0x14   : > { %v537_v0 = vld [vmem:[%s917_s1 + $0x70] sm:$0xf]  ;;  %v563_v1 = vld [vmem:[%s917_s1 + $0x74] sm:$0xf0]  ;;  %v562_v2 = vld [vmem:[%s917_s1 + $0x74] sm:$0xf] }
  0x15   : > { %v538_v3 = vor.u32 %v563_v1, %v537_v0  ;;  %v539_v4 = vld [vmem:[%s917_s1 + $0x78] sm:$0xf0]  ;;  %v529_v5 = vld [vmem:[%s917_s1 + $0x60] sm:$0xf]  ;;  %v561_v6 = vld [vmem:[%s917_s1 + $0x64] sm:$0xf0] }
  0x16   : > { %v542_v7 = vor.u32 %v562_v2, %v539_v4  ;;  %v560_v8 = vld [vmem:[%s917_s1 + $0x64] sm:$0xf]  ;;  %v531_v9 = vld [vmem:[%s917_s1 + $0x68] sm:$0xf0]  ;;  %v530_v10 = vor.u32 %v561_v6, %v529_v5  ;;  %v521_v12 = vld [vmem:[%s917_s1 + $0x50] sm:$0xf] }
  0x17   : > { %326 = vmatpush.bf16.msra.mxu0 %v538_v3  ;;  %v534_v11 = vor.u32 %v560_v8, %v531_v9  ;;  %v559_v13 = vld [vmem:[%s917_s1 + $0x54] sm:$0xf0]  ;;  %v558_v14 = vld [vmem:[%s917_s1 + $0x54] sm:$0xf]  ;;  %v523_v15 = vld [vmem:[%s917_s1 + $0x58] sm:$0xf0] }
  0x18   : > { %339 = vmatpush.bf16.msra.mxu1 %v542_v7  ;;  %v522_v16 = vor.u32 %v559_v13, %v521_v12  ;;  %v526_v17 = vor.u32 %v558_v14, %v523_v15  ;;  %v513_v18 = vld [vmem:[%s917_s1 + $0x40] sm:$0xf]  ;;  %v557_v19 = vld [vmem:[%s917_s1 + $0x44] sm:$0xf0]  ;;  %v556_v20 = vld [vmem:[%s917_s1 + $0x44] sm:$0xf] }
  0x19   : > { %v515_v21 = vld [vmem:[%s917_s1 + $0x48] sm:$0xf0]  ;;  %v514_v22 = vor.u32 %v557_v19, %v513_v18  ;;  %v505_v24 = vld [vmem:[%s917_s1 + $0x30] sm:$0xf]  ;;  %v555_v25 = vld [vmem:[%s917_s1 + $0x34] sm:$0xf0] }
  0x1a   : > { %v518_v23 = vor.u32 %v556_v20, %v515_v21  ;;  %v554_v26 = vld [vmem:[%s917_s1 + $0x34] sm:$0xf]  ;;  %v507_v27 = vld [vmem:[%s917_s1 + $0x38] sm:$0xf0]  ;;  %v506_v28 = vor.u32 %v555_v25, %v505_v24  ;;  %v497_v30 = vld [vmem:[%s917_s1 + $0x20] sm:$0xf] }
  0x1b   : > { %327 = vmatpush.bf16.msra.mxu0 %v530_v10  ;;  %v510_v29 = vor.u32 %v554_v26, %v507_v27  ;;  %v553_v31 = vld [vmem:[%s917_s1 + $0x24] sm:$0xf0]  ;;  %v552_v32 = vld [vmem:[%s917_s1 + $0x24] sm:$0xf]  ;;  %v499_v33 = vld [vmem:[%s917_s1 + $0x28] sm:$0xf0] }
  0x1c   : > { %340 = vmatpush.bf16.msra.mxu1 %v534_v11  ;;  %s207_s19 = scalar_select %p206_p11, %s690_s15, 1  ;;  %v498_v34 = vor.u32 %v553_v31, %v497_v30  ;;  %v502_v35 = vor.u32 %v552_v32, %v499_v33  ;;  %v489_v36 = vld [vmem:[%s917_s1 + $0x10] sm:$0xf]  ;;  %v551_v37 = vld [vmem:[%s917_s1 + $0x14] sm:$0xf0] }
  0x1d   : > { %v550_v38 = vld [vmem:[%s917_s1 + $0x14] sm:$0xf]  ;;  %v491_v39 = vld [vmem:[%s917_s1 + $0x18] sm:$0xf0]  ;;  %v490_v40 = vor.u32 %v551_v37, %v489_v36  ;;  %v481_v42 = vld [vmem:[%s917_s1] sm:$0xf] }
  0x1e   : > { %s478_s5 = sshll.u32 %s207_s19, 3  ;;  %v494_v41 = vor.u32 %v550_v38, %v491_v39  ;;  %v549_v43 = vld [vmem:[%s917_s1 + $0x4] sm:$0xf0]  ;;  %v548_v44 = vld [vmem:[%s917_s1 + $0x4] sm:$0xf]  ;;  %s355_s15 = scalar_lea.sflag [#allocation3], %s203_s27 }
  0x1f   : > { %328 = vmatpush.bf16.msra.mxu0 %v522_v16  ;;  %s209_s18 = scalar_lea.vmem %s916_s0, %s478_s5  ;;  %v483_v45 = vld [vmem:[%s917_s1 + $0x8] sm:$0xf0]  ;;  %v482_v46 = vor.u32 %v549_v43, %v481_v42  ;;  %v240_v50 = vld [vmem:[%s918_s2] sm:$0x3] }
  0x20   : > { %341 = vmatpush.bf16.msra.mxu1 %v526_v17  ;;  %v222_v47 = vld [vmem:[%s209_s18] sm:$0xff]  ;;  %v486_v48 = vor.u32 %v548_v44, %v483_v45  ;;  %v242_v51 = vperm.slane %v240_v50, 0  ;;  %v243_v52 = vperm.slane %v240_v50, 1  ;;  %s636_s18 = scalar_lea.hbm %s635_s11, 16 }
  0x21   : > { %v223_v49 = vpack.c.bf16 %v222_v47, %v222_v47  ;;  %p637_p12 = scmp.ne.s32.totalorder %s635_s11, %s636_s18  ;;  %p642_p2 = scmp.lt.s32.totalorder %s640_s23, %s636_s18 }
  0x23   : > { %329 = vmatpush.bf16.msra.mxu0 %v514_v22  ;;  %p638_p13 = pnand %p637_p12, %p760_p4  ;;  %p643_p3 = por %p642_p2, %p641_p1 }
  0x24   : > { %342 = vmatpush.bf16.msra.mxu1 %v518_v23 }
  0x25   : > { %p639_p0 = pneg %p638_p13 }
  0x27   : > { %330 = vmatpush.bf16.msra.mxu0 %v506_v28  ;;  %p644_p5 = pnand %p643_p3, %p639_p0 }
  0x28   : > { %343 = vmatpush.bf16.msra.mxu1 %v510_v29 }
  0x2b   : > { %331 = vmatpush.bf16.msra.mxu0 %v498_v34 }
  0x2c   : > { %344 = vmatpush.bf16.msra.mxu1 %v502_v35 }
  0x2f   : > { %332 = vmatpush.bf16.msra.mxu0 %v490_v40 }
  0x30   : > { %345 = vmatpush.bf16.msra.mxu1 %v494_v41 }
  0x33   : > { %333 = vmatpush.bf16.msra.mxu0 %v482_v46 }
  0x34   : > { %346 = vmatpush.bf16.msra.mxu1 %v486_v48 }
  0x36   : > { %334 = vmatmul.bf16.vlgmr.msra.gmra.mxu0 %v223_v49 }
  0x37   : > { %347 = vmatmul.bf16.vlgmr.msra.gmra.mxu1 %v223_v49 }
  0xb3   : > { %v335_v53 = vpop.f32.mrf.mxu0 }
  0xb4   : > { %v336_v54 = vadd.f32 %v335_v53, %v242_v51  ;;  %v348_v55 = vpop.f32.mrf.mxu1 }
  0xb5   : > { %v349_v56 = vadd.f32 %v348_v55, %v243_v52 }
  0xb6   : > { %352 = vst [vmem:[%s205_s8] sm:$0xff] %v336_v54 }
  0xb7   : > { %353 = vst [vmem:[%s205_s8 + $0x8] sm:$0xff] %v349_v56 }
  0xb8   : > { %647 = shalt.err (!%p644_p5)
}
  0xb9   : > { %565 = dma.vmem_to_hbm [thread:$0]  (%p760_p4), %s371_s9, 256, %s373_s10, %s355_s15  }
  0xbb   : > { %v337_v57 = vpop.f32.mrf.mxu0 }
  0xbc   : > { %v350_v58 = vpop.f32.mrf.mxu1 }
  0xbd PF: > { %p571_p6 = scmp.ge.s32.totalorder %s698_s17, 2  ;;  %s384_s27 = sand.u32 1, %s678_s12  }
  0xbe   : > { %s385_s29 = scalar_lea.sflag [#allocation3], %s384_s27 }
  0xbf   : > { %p568_p7 = pnand %p571_p6, %p767_p8 }
  0xc1   : > { %p569_p9 = pneg %p568_p7 }
  0xc3   : > { %673 = dma.done.wait (%p569_p9), %s385_s29, 256  }
  0xc4   : > { %675 = vsyncadd (%p569_p9), %s385_s29, 4294967040  ;;  %s16_s17 = sadd.s32 1, %s698_s17   ;;  %s922_s12 = smov %s682_s13 }
  0xc5   : > { %p13_p10 = scmp.ge.s32.totalorder %s16_s17, 4   ;;  %s923_s13 = smov %s686_s14 }
  0xc6   : > { %s924_s14 = smov %s773_s25  ;;  %s925_s15 = smov %s694_s16 }
  0xc7   : > { %s926_s16 = smov %s928_s20  ;;  %15 = sbr.rel (!%p13_p10) target bundleno = 4 (0x4), region = 73 }
  0xcc   :  { %391 = vsyncpa [#allocation3], 1 }
  0xcd   :  { %393 = vsyncpa [#allocation3 + $0x1], 1 }

</bundles_post_ra>
